<compile_context>
chip_gen: v7x
topology: tpu7x:2x2x1
jax: 0.10.0
libtpu: 0.0.40
codegen_flags: <defaults>
</compile_context>

<pallas_src>
import functools

import jax
import jax.numpy as jnp
from jax.experimental import pallas as pl
from jax.experimental.pallas import tpu as pltpu


# ------------------------------ in-kernel helpers ------------------------------

def _scse_apply(xflat, w1, b1, w2, b2, ws_row, bs):
    """SCSE on a (P, C) f32 tile: x * (sigmoid(cSE) + sigmoid(sSE))."""
    pix = xflat.shape[0]
    pooled = jnp.sum(xflat, axis=0, keepdims=True) * (1.0 / pix)            # (1, C)
    hid = jnp.maximum(
        jnp.dot(pooled, w1, preferred_element_type=jnp.float32) + b1, 0.0)  # (1, Cr)
    z = jnp.dot(hid, w2, preferred_element_type=jnp.float32) + b2           # (1, C)
    cse = 1.0 / (1.0 + jnp.exp(-z))                                         # (1, C)
    # spatial squeeze-excite as a VPU lane reduction (avoids an N=1 MXU dot)
    s = jnp.sum(xflat * ws_row, axis=-1, keepdims=True) + bs                # (P, 1)
    sse = 1.0 / (1.0 + jnp.exp(-s))                                         # (P, 1)
    # x*cse + x*sse == x*(cse + sse): one broadcast add + one full-tile mul
    return xflat * (cse + sse)


def _conv3x3(xflat, w_ref, bias, h, w):
    """3x3 SAME conv + bias on a (h*w, cin) f32 tile -> (h*w, cout) f32.

    The padded tile is built in VMEM in bf16 (no HBM pad pass, half the concat
    traffic); the 3 kw taps are folded into a single K = 3*cin bf16 MXU dot per
    kh (3 dots total), accumulating in f32.
    """
    cin = xflat.shape[-1]
    cout = w_ref.shape[-1]
    x3 = xflat.astype(jnp.bfloat16).reshape(h, w, cin)
    zc = jnp.zeros((h, 1, cin), jnp.bfloat16)
    zr = jnp.zeros((1, w + 2, cin), jnp.bfloat16)
    xp = jnp.concatenate([zr, jnp.concatenate([zc, x3, zc], axis=1), zr], axis=0)

    acc = jnp.zeros((h * w, cout), jnp.float32)
    for kh in range(3):                                    # static, unrolled
        rows = xp[kh:kh + h]                               # (h, w+2, cin) bf16
        taps = jnp.concatenate([rows[:, kw:kw + w, :] for kw in range(3)],
                               axis=-1)                    # (h, w, 3*cin) bf16
        acc = acc + jnp.dot(
            taps.reshape(h * w, 3 * cin),                  # bf16 MXU operands
            w_ref[kh],                                     # (3*cin, cout) bf16
            preferred_element_type=jnp.float32)
    return acc + bias                                      # f32 epilogue


def _make_decoder_kernel(has_skip, use_scse):
    def kernel(*refs):
        i = 0
        xw_ref = refs[i]; i += 1                           # (1, hin, wc, cx) f32
        skip_ref = None
        if has_skip:
            skip_ref = refs[i]; i += 1                     # (1, hc, wc, cs) f32
        w1_ref, b1_ref, w2_ref, b2_ref = refs[i:i + 4]; i += 4
        a1 = a2 = None
        if use_scse and has_skip:
            a1 = refs[i:i + 6]; i += 6
        if use_scse:
            a2 = refs[i:i + 6]; i += 6
        o_ref = refs[i]                                    # (1, cout, hc*wc)

        hin, wc = xw_ref.shape[1], xw_ref.shape[2]
        hc = 2 * hin
        pix = hc * wc

        # ---- fused nearest H-upsample + channel concat (stays in VMEM) ----------
        xw = xw_ref[0]                                                  # (hin,wc,cx)
        cx = xw.shape[-1]
        xu = jnp.broadcast_to(xw[:, None], (hin, 2, wc, cx)).reshape(hc, wc, cx)
        xcat = jnp.concatenate([xu, skip_ref[0]], axis=-1) if has_skip else xu
        c1 = xcat.shape[-1]
        xflat = xcat.reshape(pix, c1)                                   # (pix, c1)

        # ---- attention1 (SCSE), applied only when skip is present ---------------
        if use_scse and has_skip:
            xflat = _scse_apply(xflat, a1[0][...], a1[1][...], a1[2][...],
                                a1[3][...], a1[4][...], a1[5][...])

        # ---- conv1 -> ReLU -> conv2 -> ReLU (intermediate never leaves VMEM) ----
        y = jnp.maximum(_conv3x3(xflat, w1_ref, b1_ref[...], hc, wc), 0.0)
        y = jnp.maximum(_conv3x3(y, w2_ref, b2_ref[...], hc, wc), 0.0)   # (pix,cout)
        cout = y.shape[-1]

        # ---- attention2 (SCSE) ---------------------------------------------------
        if use_scse:
            y = _scse_apply(y, a2[0][...], a2[1][...], a2[2][...],
                            a2[3][...], a2[4][...], a2[5][...])

        # ---- lane-dense NCHW store: (pix, cout) -> (cout, pix) via an MXU "NT"
        #      identity dot (avoids relying on a standalone transpose lowering).
        #      f32 * exact identity is lossless. -----------------------------------
        r = jax.lax.broadcasted_iota(jnp.int32, (cout, cout), 0)
        c = jax.lax.broadcasted_iota(jnp.int32, (cout, cout), 1)
        ident = (r == c).astype(jnp.float32)
        y_t = jax.lax.dot_general(ident, y, (((1,), (1,)), ((), ())),
                                  preferred_element_type=jnp.float32)   # (cout, pix)
        o_ref[0] = y_t.astype(o_ref.dtype)
    return kernel


# ------------------------------- Pallas wrapper --------------------------------

def _const_spec(arr):
    nd = arr.ndim
    return pl.BlockSpec(arr.shape, lambda i, _nd=nd: (0,) * _nd)


@functools.partial(jax.jit, static_argnames=("attention_type",))
def decoder_block_forward(x_nchw, skip_nchw, params, attention_type=None):
    """DecoderBlock.forward.  Inputs/outputs are NCHW (PyTorch convention)."""
    n, cx, hin, win = x_nchw.shape
    hc, wc = 2 * hin, 2 * win
    has_skip = skip_nchw is not None
    use_scse = attention_type == "scse"
    cout = params["conv1"]["w"].shape[-1]

    # Host-side prep (one small fused XLA op): NCHW->NHWC for the kernel inputs and
    # nearest W-doubling of the (small, pre-upsample) x.  Everything else -- the
    # H-doubling, concat, pad, attention, both convs and the NCHW output layout --
    # is fused into the Pallas kernel.
    xw = jnp.repeat(jnp.transpose(x_nchw, (0, 2, 3, 1)), 2, axis=2)     # (n,hin,wc,cx)

    inputs = [xw]
    in_specs = [pl.BlockSpec((1, hin, wc, cx), lambda i: (i, 0, 0, 0))]
    c1 = cx
    if has_skip:
        cs = skip_nchw.shape[1]
        c1 = cx + cs
        skip_nhwc = jnp.transpose(skip_nchw, (0, 2, 3, 1))              # (n,hc,wc,cs)
        inputs.append(skip_nhwc)
        in_specs.append(pl.BlockSpec((1, hc, wc, cs), lambda i: (i, 0, 0, 0)))

    def conv_w(wh):   # HWIO (3,3,ci,co) -> (3, 3*ci, co) bf16 (kw-taps folded into K)
        return wh.reshape(3, 3 * wh.shape[2], wh.shape[3]).astype(jnp.bfloat16)

    consts = [conv_w(params["conv1"]["w"]), params["conv1"]["b"],
              conv_w(params["conv2"]["w"]), params["conv2"]["b"]]
    if use_scse and has_skip:
        a = params["att1"]
        consts += [a["w1"], a["b1"], a["w2"], a["b2"], a["ws"].reshape(1, c1), a["bs"]]
    if use_scse:
        a = params["att2"]
        consts += [a["w1"], a["b1"], a["w2"], a["b2"], a["ws"].reshape(1, cout), a["bs"]]
    inputs += consts
    in_specs += [_const_spec(a) for a in consts]

    out = pl.pallas_call(
        _make_decoder_kernel(has_skip, use_scse),
        out_shape=jax.ShapeDtypeStruct((n, cout, hc * wc), x_nchw.dtype),
        grid=(n,),
        in_specs=in_specs,
        out_specs=pl.BlockSpec((1, cout, hc * wc), lambda i: (i, 0, 0)),
        compiler_params=pltpu.CompilerParams(
            dimension_semantics=("parallel",),          # batch across TCs on v7x
            vmem_limit_bytes=48 * 1024 * 1024),         # explicit, with headroom
    )(*inputs)
    return out.reshape(n, cout, hc, wc)                 # free reshape, already NCHW


# ---------------------------- deterministic params -----------------------------

def init_params(key, in_channels, skip_channels, out_channels, reduction=16):
    c1_in = in_channels + skip_channels

    def normal(k, shape):
        return 0.1 * jax.random.normal(k, shape, jnp.float32)

    def conv_p(k, cin, cout):
        kw, kb = jax.random.split(k)
        return {"w": normal(kw, (3, 3, cin, cout)), "b": normal(kb, (1, cout))}

    def scse_p(k, c, r):
        cr = max(c // r, 1)
        k1, k2, k3, k4, k5, k6 = jax.random.split(k, 6)
        return {"w1": normal(k1, (c, cr)), "b1": normal(k2, (1, cr)),
                "w2": normal(k3, (cr, c)), "b2": normal(k4, (1, c)),
                "ws": normal(k5, (c, 1)), "bs": normal(k6, (1, 1))}

    kc1, kc2, ka1, ka2 = jax.random.split(key, 4)
    return {
        "conv1": conv_p(kc1, c1_in, out_channels),
        "conv2": conv_p(kc2, out_channels, out_channels),
        "att1": scse_p(ka1, c1_in, reduction),
        "att2": scse_p(ka2, out_channels, reduction),
    }


# ---------------------------- plain-JAX reference ------------------------------

def _ref_forward(x_nchw, skip_nchw, params, attention_type=None):
    x = jnp.repeat(jnp.repeat(x_nchw, 2, axis=2), 2, axis=3)
    if skip_nchw is not None:
        x = jnp.concatenate([x, skip_nchw], axis=1)
    x = jnp.transpose(x, (0, 2, 3, 1))

    def scse(x, p):
        pooled = jnp.mean(x, axis=(1, 2), keepdims=True)
        h = jax.nn.relu(jnp.einsum("nabc,cd->nabd", pooled, p["w1"]) + p["b1"])
        c = jax.nn.sigmoid(jnp.einsum("nabc,cd->nabd", h, p["w2"]) + p["b2"])
        s = jax.nn.sigmoid(jnp.einsum("nhwc,cd->nhwd", x, p["ws"]) + p["bs"])
        return x * c + x * s

    def conv(x, w, b):
        y = jax.lax.conv_general_dilated(
            x, w, (1, 1), "SAME",
            dimension_numbers=("NHWC", "HWIO", "NHWC"),
            precision=jax.lax.Precision.HIGHEST)
        return jax.nn.relu(y + b)

    if skip_nchw is not None and attention_type == "scse":
        x = scse(x, params["att1"])
    x = conv(x, params["conv1"]["w"], params["conv1"]["b"])
    x = conv(x, params["conv2"]["w"], params["conv2"]["b"])
    if attention_type == "scse":
        x = scse(x, params["att2"])
    return jnp.transpose(x, (0, 3, 1, 2))


# ------------------------------------ main --------------------------------------

if __name__ == "__main__":
    key = jax.random.PRNGKey(0)
    kx, ks, kp, kp0 = jax.random.split(key, 4)

    N = 2
    in_ch, skip_ch, out_ch = 16, 16, 16           # reduction=16 -> cSE hidden dims 2 / 1
    H = W = 8                                     # upsampled to 16 x 16

    x = jax.random.normal(kx, (N, in_ch, H, W), jnp.float32)
    skip = jax.random.normal(ks, (N, skip_ch, 2 * H, 2 * W), jnp.float32)
    params = init_params(kp, in_ch, skip_ch, out_ch, reduction=16)

    def check(out, ref):
        assert out.shape == ref.shape and out.dtype == ref.dtype
        err = float(jnp.max(jnp.abs(out - ref)))
        scale = float(jnp.max(jnp.abs(ref))) + 1e-6
        # bf16 MXU operands vs f32 reference -> allow ~2% relative error
        assert err / scale < 2e-2, (err, scale)

    # 1) attention_type='scse' with skip (exercises SCSE fusion)
    out = jax.block_until_ready(
        decoder_block_forward(x, skip, params, attention_type="scse"))
    check(out, _ref_forward(x, skip, params, attention_type="scse"))

    # 2) default path (attention_type=None -> nn.Identity attention)
    out = jax.block_until_ready(
        decoder_block_forward(x, skip, params, attention_type=None))
    check(out, _ref_forward(x, skip, params, attention_type=None))

    # 3) skip=None path (module built with skip_channels=0; attention1 never applied)
    params0 = init_params(kp0, in_ch, 0, out_ch, reduction=16)
    out = jax.block_until_ready(
        decoder_block_forward(x, None, params0, attention_type="scse"))
    check(out, _ref_forward(x, None, params0, attention_type="scse"))

    print("KERNEL_OK")
</pallas_src>

<mosaic_0001>
module attributes {stable_mosaic.version = 11 : i64} {
  func.func @kernel(%arg0: i32, %arg1: memref<1x8x16x16xf32, #tpu.memory_space<vmem>>, %arg2: memref<1x16x16x16xf32, #tpu.memory_space<vmem>>, %arg3: memref<3x96x16xbf16, #tpu.memory_space<vmem>>, %arg4: memref<1x16xf32, #tpu.memory_space<vmem>>, %arg5: memref<3x48x16xbf16, #tpu.memory_space<vmem>>, %arg6: memref<1x16xf32, #tpu.memory_space<vmem>>, %arg7: memref<32x2xf32, #tpu.memory_space<vmem>>, %arg8: memref<1x2xf32, #tpu.memory_space<vmem>>, %arg9: memref<2x32xf32, #tpu.memory_space<vmem>>, %arg10: memref<1x32xf32, #tpu.memory_space<vmem>>, %arg11: memref<1x32xf32, #tpu.memory_space<vmem>>, %arg12: memref<1x1xf32, #tpu.memory_space<vmem>>, %arg13: memref<16x1xf32, #tpu.memory_space<vmem>>, %arg14: memref<1x1xf32, #tpu.memory_space<vmem>>, %arg15: memref<1x16xf32, #tpu.memory_space<vmem>>, %arg16: memref<1x16xf32, #tpu.memory_space<vmem>>, %arg17: memref<1x16xf32, #tpu.memory_space<vmem>>, %arg18: memref<1x1xf32, #tpu.memory_space<vmem>>, %arg19: memref<1x16x256xf32, #tpu.memory_space<vmem>>) attributes {dimension_semantics = [#tpu.dimension_semantics<parallel>], iteration_bounds = array<i64: 2>, scalar_prefetch = 0 : i64, scratch_operands = 0 : i64, tpu.core_type = #tpu.core_type<tc>, window_params = [{transform_indices = @transform_0, window_bounds = array<i64: 1, 8, 16, 16>}, {transform_indices = @transform_1, window_bounds = array<i64: 1, 16, 16, 16>}, {pipeline_mode = #tpu.pipeline_mode<synchronous>, transform_indices = @transform_2, window_bounds = array<i64: 3, 96, 16>}, {pipeline_mode = #tpu.pipeline_mode<synchronous>, transform_indices = @transform_3, window_bounds = array<i64: 1, 16>}, {pipeline_mode = #tpu.pipeline_mode<synchronous>, transform_indices = @transform_4, window_bounds = array<i64: 3, 48, 16>}, {pipeline_mode = #tpu.pipeline_mode<synchronous>, transform_indices = @transform_5, window_bounds = array<i64: 1, 16>}, {pipeline_mode = #tpu.pipeline_mode<synchronous>, transform_indices = @transform_6, window_bounds = array<i64: 32, 2>}, {pipeline_mode = #tpu.pipeline_mode<synchronous>, transform_indices = @transform_7, window_bounds = array<i64: 1, 2>}, {pipeline_mode = #tpu.pipeline_mode<synchronous>, transform_indices = @transform_8, window_bounds = array<i64: 2, 32>}, {pipeline_mode = #tpu.pipeline_mode<synchronous>, transform_indices = @transform_9, window_bounds = array<i64: 1, 32>}, {pipeline_mode = #tpu.pipeline_mode<synchronous>, transform_indices = @transform_10, window_bounds = array<i64: 1, 32>}, {pipeline_mode = #tpu.pipeline_mode<synchronous>, transform_indices = @transform_11, window_bounds = array<i64: 1, 1>}, {pipeline_mode = #tpu.pipeline_mode<synchronous>, transform_indices = @transform_12, window_bounds = array<i64: 16, 1>}, {pipeline_mode = #tpu.pipeline_mode<synchronous>, transform_indices = @transform_13, window_bounds = array<i64: 1, 1>}, {pipeline_mode = #tpu.pipeline_mode<synchronous>, transform_indices = @transform_14, window_bounds = array<i64: 1, 16>}, {pipeline_mode = #tpu.pipeline_mode<synchronous>, transform_indices = @transform_15, window_bounds = array<i64: 1, 16>}, {pipeline_mode = #tpu.pipeline_mode<synchronous>, transform_indices = @transform_16, window_bounds = array<i64: 1, 16>}, {pipeline_mode = #tpu.pipeline_mode<synchronous>, transform_indices = @transform_17, window_bounds = array<i64: 1, 1>}, {transform_indices = @transform_18, window_bounds = array<i64: 1, 16, 256>}]} {
    %c0 = arith.constant 0 : index
    %c0_0 = arith.constant 0 : index
    %c0_1 = arith.constant 0 : index
    %c0_2 = arith.constant 0 : index
    %0 = vector.load %arg1[%c0, %c0_0, %c0_1, %c0_2] : memref<1x8x16x16xf32, #tpu.memory_space<vmem>>, vector<1x8x16x16xf32>
    %1 = vector.shape_cast %0 : vector<1x8x16x16xf32> to vector<8x16x16xf32>
    %2 = vector.shape_cast %1 : vector<8x16x16xf32> to vector<8x1x16x16xf32>
    %3 = vector.shape_cast %2 : vector<8x1x16x16xf32> to vector<8x1x16x16xf32>
    %4 = vector.broadcast %3 : vector<8x1x16x16xf32> to vector<8x2x16x16xf32>
    %5 = vector.shape_cast %4 : vector<8x2x16x16xf32> to vector<16x16x16xf32>
    %c0_3 = arith.constant 0 : index
    %c0_4 = arith.constant 0 : index
    %c0_5 = arith.constant 0 : index
    %c0_6 = arith.constant 0 : index
    %6 = vector.load %arg2[%c0_3, %c0_4, %c0_5, %c0_6] : memref<1x16x16x16xf32, #tpu.memory_space<vmem>>, vector<1x16x16x16xf32>
    %7 = vector.shape_cast %6 : vector<1x16x16x16xf32> to vector<16x16x16xf32>
    %8 = tpu.concatenate %5, %7 in 2 : vector<16x16x16xf32>, vector<16x16x16xf32> -> vector<16x16x32xf32>
    %9 = vector.shape_cast %8 : vector<16x16x32xf32> to vector<256x32xf32>
    %c0_7 = arith.constant 0 : index
    %c0_8 = arith.constant 0 : index
    %10 = vector.load %arg7[%c0_7, %c0_8] : memref<32x2xf32, #tpu.memory_space<vmem>>, vector<32x2xf32>
    %c0_9 = arith.constant 0 : index
    %c0_10 = arith.constant 0 : index
    %11 = vector.load %arg8[%c0_9, %c0_10] : memref<1x2xf32, #tpu.memory_space<vmem>>, vector<1x2xf32>
    %c0_11 = arith.constant 0 : index
    %c0_12 = arith.constant 0 : index
    %12 = vector.load %arg9[%c0_11, %c0_12] : memref<2x32xf32, #tpu.memory_space<vmem>>, vector<2x32xf32>
    %c0_13 = arith.constant 0 : index
    %c0_14 = arith.constant 0 : index
    %13 = vector.load %arg10[%c0_13, %c0_14] : memref<1x32xf32, #tpu.memory_space<vmem>>, vector<1x32xf32>
    %c0_15 = arith.constant 0 : index
    %c0_16 = arith.constant 0 : index
    %14 = vector.load %arg11[%c0_15, %c0_16] : memref<1x32xf32, #tpu.memory_space<vmem>>, vector<1x32xf32>
    %c0_17 = arith.constant 0 : index
    %c0_18 = arith.constant 0 : index
    %15 = vector.load %arg12[%c0_17, %c0_18] : memref<1x1xf32, #tpu.memory_space<vmem>>, vector<1x1xf32>
    %cst = arith.constant dense<0.000000e+00> : vector<32xf32>
    %16 = vector.multi_reduction <add>, %9, %cst [0] : vector<256x32xf32> to vector<32xf32>
    %17 = vector.shape_cast %16 : vector<32xf32> to vector<1x32xf32>
    %cst_19 = arith.constant 3.906250e-03 : f32
    %18 = vector.broadcast %cst_19 : f32 to vector<1x32xf32>
    %19 = arith.mulf %17, %18 : vector<1x32xf32>
    %cst_20 = arith.constant dense<0.000000e+00> : vector<1x2xf32>
    %20 = tpu.matmul %19, %10, %cst_20 {dimension_numbers = #tpu.dot_dimension_numbers<[1], [0], [0], [1], [0, 0, 1, 1], [], []>} : vector<1x32xf32>, vector<32x2xf32>, vector<1x2xf32> -> vector<1x2xf32>
    %21 = arith.addf %20, %11 : vector<1x2xf32>
    %cst_21 = arith.constant 0.000000e+00 : f32
    %22 = vector.broadcast %cst_21 : f32 to vector<1x2xf32>
    %23 = arith.maximumf %21, %22 : vector<1x2xf32>
    %cst_22 = arith.constant dense<0.000000e+00> : vector<1x32xf32>
    %24 = tpu.matmul %23, %12, %cst_22 {dimension_numbers = #tpu.dot_dimension_numbers<[1], [0], [0], [1], [0, 0, 1, 1], [], []>} : vector<1x2xf32>, vector<2x32xf32>, vector<1x32xf32> -> vector<1x32xf32>
    %25 = arith.addf %24, %13 : vector<1x32xf32>
    %cst_23 = arith.constant 0.000000e+00 : f32
    %26 = vector.broadcast %cst_23 : f32 to vector<1x32xf32>
    %27 = arith.subf %26, %25 : vector<1x32xf32>
    %28 = math.exp %27 : vector<1x32xf32>
    %cst_24 = arith.constant 1.000000e+00 : f32
    %29 = vector.broadcast %cst_24 : f32 to vector<1x32xf32>
    %30 = arith.addf %29, %28 : vector<1x32xf32>
    %cst_25 = arith.constant 1.000000e+00 : f32
    %31 = vector.broadcast %cst_25 : f32 to vector<1x32xf32>
    %32 = arith.divf %31, %30 : vector<1x32xf32>
    %33 = vector.broadcast %14 : vector<1x32xf32> to vector<256x32xf32>
    %34 = arith.mulf %9, %33 : vector<256x32xf32>
    %cst_26 = arith.constant dense<0.000000e+00> : vector<256xf32>
    %35 = vector.multi_reduction <add>, %34, %cst_26 [1] : vector<256x32xf32> to vector<256xf32>
    %36 = vector.shape_cast %35 : vector<256xf32> to vector<256x1xf32>
    %37 = vector.broadcast %15 : vector<1x1xf32> to vector<256x1xf32>
    %38 = arith.addf %36, %37 : vector<256x1xf32>
    %cst_27 = arith.constant 0.000000e+00 : f32
    %39 = vector.broadcast %cst_27 : f32 to vector<256x1xf32>
    %40 = arith.subf %39, %38 : vector<256x1xf32>
    %41 = math.exp %40 : vector<256x1xf32>
    %cst_28 = arith.constant 1.000000e+00 : f32
    %42 = vector.broadcast %cst_28 : f32 to vector<256x1xf32>
    %43 = arith.addf %42, %41 : vector<256x1xf32>
    %cst_29 = arith.constant 1.000000e+00 : f32
    %44 = vector.broadcast %cst_29 : f32 to vector<256x1xf32>
    %45 = arith.divf %44, %43 : vector<256x1xf32>
    %46 = vector.broadcast %32 : vector<1x32xf32> to vector<256x32xf32>
    %47 = vector.broadcast %45 : vector<256x1xf32> to vector<256x32xf32>
    %48 = arith.addf %46, %47 : vector<256x32xf32>
    %49 = arith.mulf %9, %48 : vector<256x32xf32>
    %c0_30 = arith.constant 0 : index
    %c0_31 = arith.constant 0 : index
    %50 = vector.load %arg4[%c0_30, %c0_31] : memref<1x16xf32, #tpu.memory_space<vmem>>, vector<1x16xf32>
    %51 = arith.truncf %49 : vector<256x32xf32> to vector<256x32xbf16>
    %52 = vector.shape_cast %51 : vector<256x32xbf16> to vector<16x16x32xbf16>
    %cst_32 = arith.constant 0.000000e+00 : bf16
    %53 = vector.broadcast %cst_32 : bf16 to vector<16x1x32xbf16>
    %cst_33 = arith.constant 0.000000e+00 : bf16
    %54 = vector.broadcast %cst_33 : bf16 to vector<1x18x32xbf16>
    %55 = tpu.concatenate %53, %52, %53 in 1 : vector<16x1x32xbf16>, vector<16x16x32xbf16>, vector<16x1x32xbf16> -> vector<16x18x32xbf16>
    %56 = tpu.concatenate %54, %55, %54 in 0 : vector<1x18x32xbf16>, vector<16x18x32xbf16>, vector<1x18x32xbf16> -> vector<18x18x32xbf16>
    %cst_34 = arith.constant 0.000000e+00 : f32
    %57 = vector.broadcast %cst_34 : f32 to vector<256x16xf32>
    %58 = vector.extract_strided_slice %56 {offsets = [0, 0, 0], sizes = [16, 18, 32], strides = [1, 1, 1]} : vector<18x18x32xbf16> to vector<16x18x32xbf16>
    %59 = vector.extract_strided_slice %58 {offsets = [0, 0, 0], sizes = [16, 16, 32], strides = [1, 1, 1]} : vector<16x18x32xbf16> to vector<16x16x32xbf16>
    %60 = vector.extract_strided_slice %58 {offsets = [0, 1, 0], sizes = [16, 16, 32], strides = [1, 1, 1]} : vector<16x18x32xbf16> to vector<16x16x32xbf16>
    %61 = vector.extract_strided_slice %58 {offsets = [0, 2, 0], sizes = [16, 16, 32], strides = [1, 1, 1]} : vector<16x18x32xbf16> to vector<16x16x32xbf16>
    %62 = tpu.concatenate %59, %60, %61 in 2 : vector<16x16x32xbf16>, vector<16x16x32xbf16>, vector<16x16x32xbf16> -> vector<16x16x96xbf16>
    %63 = vector.shape_cast %62 : vector<16x16x96xbf16> to vector<256x96xbf16>
    %c0_35 = arith.constant 0 : index
    %c0_36 = arith.constant 0 : index
    %c0_37 = arith.constant 0 : index
    %64 = vector.load %arg3[%c0_35, %c0_36, %c0_37] : memref<3x96x16xbf16, #tpu.memory_space<vmem>>, vector<1x96x16xbf16>
    %65 = vector.shape_cast %64 : vector<1x96x16xbf16> to vector<96x16xbf16>
    %cst_38 = arith.constant dense<0.000000e+00> : vector<256x16xf32>
    %66 = tpu.matmul %63, %65, %cst_38 {dimension_numbers = #tpu.dot_dimension_numbers<[1], [0], [0], [1], [0, 0, 1, 1], [], []>} : vector<256x96xbf16>, vector<96x16xbf16>, vector<256x16xf32> -> vector<256x16xf32>
    %67 = arith.addf %57, %66 : vector<256x16xf32>
    %68 = vector.extract_strided_slice %56 {offsets = [1, 0, 0], sizes = [16, 18, 32], strides = [1, 1, 1]} : vector<18x18x32xbf16> to vector<16x18x32xbf16>
    %69 = vector.extract_strided_slice %68 {offsets = [0, 0, 0], sizes = [16, 16, 32], strides = [1, 1, 1]} : vector<16x18x32xbf16> to vector<16x16x32xbf16>
    %70 = vector.extract_strided_slice %68 {offsets = [0, 1, 0], sizes = [16, 16, 32], strides = [1, 1, 1]} : vector<16x18x32xbf16> to vector<16x16x32xbf16>
    %71 = vector.extract_strided_slice %68 {offsets = [0, 2, 0], sizes = [16, 16, 32], strides = [1, 1, 1]} : vector<16x18x32xbf16> to vector<16x16x32xbf16>
    %72 = tpu.concatenate %69, %70, %71 in 2 : vector<16x16x32xbf16>, vector<16x16x32xbf16>, vector<16x16x32xbf16> -> vector<16x16x96xbf16>
    %73 = vector.shape_cast %72 : vector<16x16x96xbf16> to vector<256x96xbf16>
    %c1 = arith.constant 1 : index
    %c0_39 = arith.constant 0 : index
    %c0_40 = arith.constant 0 : index
    %74 = vector.load %arg3[%c1, %c0_39, %c0_40] : memref<3x96x16xbf16, #tpu.memory_space<vmem>>, vector<1x96x16xbf16>
    %75 = vector.shape_cast %74 : vector<1x96x16xbf16> to vector<96x16xbf16>
    %cst_41 = arith.constant dense<0.000000e+00> : vector<256x16xf32>
    %76 = tpu.matmul %73, %75, %cst_41 {dimension_numbers = #tpu.dot_dimension_numbers<[1], [0], [0], [1], [0, 0, 1, 1], [], []>} : vector<256x96xbf16>, vector<96x16xbf16>, vector<256x16xf32> -> vector<256x16xf32>
    %77 = arith.addf %67, %76 : vector<256x16xf32>
    %78 = vector.extract_strided_slice %56 {offsets = [2, 0, 0], sizes = [16, 18, 32], strides = [1, 1, 1]} : vector<18x18x32xbf16> to vector<16x18x32xbf16>
    %79 = vector.extract_strided_slice %78 {offsets = [0, 0, 0], sizes = [16, 16, 32], strides = [1, 1, 1]} : vector<16x18x32xbf16> to vector<16x16x32xbf16>
    %80 = vector.extract_strided_slice %78 {offsets = [0, 1, 0], sizes = [16, 16, 32], strides = [1, 1, 1]} : vector<16x18x32xbf16> to vector<16x16x32xbf16>
    %81 = vector.extract_strided_slice %78 {offsets = [0, 2, 0], sizes = [16, 16, 32], strides = [1, 1, 1]} : vector<16x18x32xbf16> to vector<16x16x32xbf16>
    %82 = tpu.concatenate %79, %80, %81 in 2 : vector<16x16x32xbf16>, vector<16x16x32xbf16>, vector<16x16x32xbf16> -> vector<16x16x96xbf16>
    %83 = vector.shape_cast %82 : vector<16x16x96xbf16> to vector<256x96xbf16>
    %c2 = arith.constant 2 : index
    %c0_42 = arith.constant 0 : index
    %c0_43 = arith.constant 0 : index
    %84 = vector.load %arg3[%c2, %c0_42, %c0_43] : memref<3x96x16xbf16, #tpu.memory_space<vmem>>, vector<1x96x16xbf16>
    %85 = vector.shape_cast %84 : vector<1x96x16xbf16> to vector<96x16xbf16>
    %cst_44 = arith.constant dense<0.000000e+00> : vector<256x16xf32>
    %86 = tpu.matmul %83, %85, %cst_44 {dimension_numbers = #tpu.dot_dimension_numbers<[1], [0], [0], [1], [0, 0, 1, 1], [], []>} : vector<256x96xbf16>, vector<96x16xbf16>, vector<256x16xf32> -> vector<256x16xf32>
    %87 = arith.addf %77, %86 : vector<256x16xf32>
    %88 = vector.broadcast %50 : vector<1x16xf32> to vector<256x16xf32>
    %89 = arith.addf %87, %88 : vector<256x16xf32>
    %cst_45 = arith.constant 0.000000e+00 : f32
    %90 = vector.broadcast %cst_45 : f32 to vector<256x16xf32>
    %91 = arith.maximumf %89, %90 : vector<256x16xf32>
    %c0_46 = arith.constant 0 : index
    %c0_47 = arith.constant 0 : index
    %92 = vector.load %arg6[%c0_46, %c0_47] : memref<1x16xf32, #tpu.memory_space<vmem>>, vector<1x16xf32>
    %93 = arith.truncf %91 : vector<256x16xf32> to vector<256x16xbf16>
    %94 = vector.shape_cast %93 : vector<256x16xbf16> to vector<16x16x16xbf16>
    %cst_48 = arith.constant 0.000000e+00 : bf16
    %95 = vector.broadcast %cst_48 : bf16 to vector<16x1x16xbf16>
    %cst_49 = arith.constant 0.000000e+00 : bf16
    %96 = vector.broadcast %cst_49 : bf16 to vector<1x18x16xbf16>
    %97 = tpu.concatenate %95, %94, %95 in 1 : vector<16x1x16xbf16>, vector<16x16x16xbf16>, vector<16x1x16xbf16> -> vector<16x18x16xbf16>
    %98 = tpu.concatenate %96, %97, %96 in 0 : vector<1x18x16xbf16>, vector<16x18x16xbf16>, vector<1x18x16xbf16> -> vector<18x18x16xbf16>
    %cst_50 = arith.constant 0.000000e+00 : f32
    %99 = vector.broadcast %cst_50 : f32 to vector<256x16xf32>
    %100 = vector.extract_strided_slice %98 {offsets = [0, 0, 0], sizes = [16, 18, 16], strides = [1, 1, 1]} : vector<18x18x16xbf16> to vector<16x18x16xbf16>
    %101 = vector.extract_strided_slice %100 {offsets = [0, 0, 0], sizes = [16, 16, 16], strides = [1, 1, 1]} : vector<16x18x16xbf16> to vector<16x16x16xbf16>
    %102 = vector.extract_strided_slice %100 {offsets = [0, 1, 0], sizes = [16, 16, 16], strides = [1, 1, 1]} : vector<16x18x16xbf16> to vector<16x16x16xbf16>
    %103 = vector.extract_strided_slice %100 {offsets = [0, 2, 0], sizes = [16, 16, 16], strides = [1, 1, 1]} : vector<16x18x16xbf16> to vector<16x16x16xbf16>
    %104 = tpu.concatenate %101, %102, %103 in 2 : vector<16x16x16xbf16>, vector<16x16x16xbf16>, vector<16x16x16xbf16> -> vector<16x16x48xbf16>
    %105 = vector.shape_cast %104 : vector<16x16x48xbf16> to vector<256x48xbf16>
    %c0_51 = arith.constant 0 : index
    %c0_52 = arith.constant 0 : index
    %c0_53 = arith.constant 0 : index
    %106 = vector.load %arg5[%c0_51, %c0_52, %c0_53] : memref<3x48x16xbf16, #tpu.memory_space<vmem>>, vector<1x48x16xbf16>
    %107 = vector.shape_cast %106 : vector<1x48x16xbf16> to vector<48x16xbf16>
    %cst_54 = arith.constant dense<0.000000e+00> : vector<256x16xf32>
    %108 = tpu.matmul %105, %107, %cst_54 {dimension_numbers = #tpu.dot_dimension_numbers<[1], [0], [0], [1], [0, 0, 1, 1], [], []>} : vector<256x48xbf16>, vector<48x16xbf16>, vector<256x16xf32> -> vector<256x16xf32>
    %109 = arith.addf %99, %108 : vector<256x16xf32>
    %110 = vector.extract_strided_slice %98 {offsets = [1, 0, 0], sizes = [16, 18, 16], strides = [1, 1, 1]} : vector<18x18x16xbf16> to vector<16x18x16xbf16>
    %111 = vector.extract_strided_slice %110 {offsets = [0, 0, 0], sizes = [16, 16, 16], strides = [1, 1, 1]} : vector<16x18x16xbf16> to vector<16x16x16xbf16>
    %112 = vector.extract_strided_slice %110 {offsets = [0, 1, 0], sizes = [16, 16, 16], strides = [1, 1, 1]} : vector<16x18x16xbf16> to vector<16x16x16xbf16>
    %113 = vector.extract_strided_slice %110 {offsets = [0, 2, 0], sizes = [16, 16, 16], strides = [1, 1, 1]} : vector<16x18x16xbf16> to vector<16x16x16xbf16>
    %114 = tpu.concatenate %111, %112, %113 in 2 : vector<16x16x16xbf16>, vector<16x16x16xbf16>, vector<16x16x16xbf16> -> vector<16x16x48xbf16>
    %115 = vector.shape_cast %114 : vector<16x16x48xbf16> to vector<256x48xbf16>
    %c1_55 = arith.constant 1 : index
    %c0_56 = arith.constant 0 : index
    %c0_57 = arith.constant 0 : index
    %116 = vector.load %arg5[%c1_55, %c0_56, %c0_57] : memref<3x48x16xbf16, #tpu.memory_space<vmem>>, vector<1x48x16xbf16>
    %117 = vector.shape_cast %116 : vector<1x48x16xbf16> to vector<48x16xbf16>
    %cst_58 = arith.constant dense<0.000000e+00> : vector<256x16xf32>
    %118 = tpu.matmul %115, %117, %cst_58 {dimension_numbers = #tpu.dot_dimension_numbers<[1], [0], [0], [1], [0, 0, 1, 1], [], []>} : vector<256x48xbf16>, vector<48x16xbf16>, vector<256x16xf32> -> vector<256x16xf32>
    %119 = arith.addf %109, %118 : vector<256x16xf32>
    %120 = vector.extract_strided_slice %98 {offsets = [2, 0, 0], sizes = [16, 18, 16], strides = [1, 1, 1]} : vector<18x18x16xbf16> to vector<16x18x16xbf16>
    %121 = vector.extract_strided_slice %120 {offsets = [0, 0, 0], sizes = [16, 16, 16], strides = [1, 1, 1]} : vector<16x18x16xbf16> to vector<16x16x16xbf16>
    %122 = vector.extract_strided_slice %120 {offsets = [0, 1, 0], sizes = [16, 16, 16], strides = [1, 1, 1]} : vector<16x18x16xbf16> to vector<16x16x16xbf16>
    %123 = vector.extract_strided_slice %120 {offsets = [0, 2, 0], sizes = [16, 16, 16], strides = [1, 1, 1]} : vector<16x18x16xbf16> to vector<16x16x16xbf16>
    %124 = tpu.concatenate %121, %122, %123 in 2 : vector<16x16x16xbf16>, vector<16x16x16xbf16>, vector<16x16x16xbf16> -> vector<16x16x48xbf16>
    %125 = vector.shape_cast %124 : vector<16x16x48xbf16> to vector<256x48xbf16>
    %c2_59 = arith.constant 2 : index
    %c0_60 = arith.constant 0 : index
    %c0_61 = arith.constant 0 : index
    %126 = vector.load %arg5[%c2_59, %c0_60, %c0_61] : memref<3x48x16xbf16, #tpu.memory_space<vmem>>, vector<1x48x16xbf16>
    %127 = vector.shape_cast %126 : vector<1x48x16xbf16> to vector<48x16xbf16>
    %cst_62 = arith.constant dense<0.000000e+00> : vector<256x16xf32>
    %128 = tpu.matmul %125, %127, %cst_62 {dimension_numbers = #tpu.dot_dimension_numbers<[1], [0], [0], [1], [0, 0, 1, 1], [], []>} : vector<256x48xbf16>, vector<48x16xbf16>, vector<256x16xf32> -> vector<256x16xf32>
    %129 = arith.addf %119, %128 : vector<256x16xf32>
    %130 = vector.broadcast %92 : vector<1x16xf32> to vector<256x16xf32>
    %131 = arith.addf %129, %130 : vector<256x16xf32>
    %cst_63 = arith.constant 0.000000e+00 : f32
    %132 = vector.broadcast %cst_63 : f32 to vector<256x16xf32>
    %133 = arith.maximumf %131, %132 : vector<256x16xf32>
    %c0_64 = arith.constant 0 : index
    %c0_65 = arith.constant 0 : index
    %134 = vector.load %arg13[%c0_64, %c0_65] : memref<16x1xf32, #tpu.memory_space<vmem>>, vector<16x1xf32>
    %c0_66 = arith.constant 0 : index
    %c0_67 = arith.constant 0 : index
    %135 = vector.load %arg14[%c0_66, %c0_67] : memref<1x1xf32, #tpu.memory_space<vmem>>, vector<1x1xf32>
    %c0_68 = arith.constant 0 : index
    %c0_69 = arith.constant 0 : index
    %136 = vector.load %arg15[%c0_68, %c0_69] : memref<1x16xf32, #tpu.memory_space<vmem>>, vector<1x16xf32>
    %c0_70 = arith.constant 0 : index
    %c0_71 = arith.constant 0 : index
    %137 = vector.load %arg16[%c0_70, %c0_71] : memref<1x16xf32, #tpu.memory_space<vmem>>, vector<1x16xf32>
    %c0_72 = arith.constant 0 : index
    %c0_73 = arith.constant 0 : index
    %138 = vector.load %arg17[%c0_72, %c0_73] : memref<1x16xf32, #tpu.memory_space<vmem>>, vector<1x16xf32>
    %c0_74 = arith.constant 0 : index
    %c0_75 = arith.constant 0 : index
    %139 = vector.load %arg18[%c0_74, %c0_75] : memref<1x1xf32, #tpu.memory_space<vmem>>, vector<1x1xf32>
    %cst_76 = arith.constant dense<0.000000e+00> : vector<16xf32>
    %140 = vector.multi_reduction <add>, %133, %cst_76 [0] : vector<256x16xf32> to vector<16xf32>
    %141 = vector.shape_cast %140 : vector<16xf32> to vector<1x16xf32>
    %cst_77 = arith.constant 3.906250e-03 : f32
    %142 = vector.broadcast %cst_77 : f32 to vector<1x16xf32>
    %143 = arith.mulf %141, %142 : vector<1x16xf32>
    %cst_78 = arith.constant dense<0.000000e+00> : vector<1x1xf32>
    %144 = tpu.matmul %143, %134, %cst_78 {dimension_numbers = #tpu.dot_dimension_numbers<[1], [0], [0], [1], [0, 0, 1, 1], [], []>} : vector<1x16xf32>, vector<16x1xf32>, vector<1x1xf32> -> vector<1x1xf32>
    %145 = arith.addf %144, %135 : vector<1x1xf32>
    %cst_79 = arith.constant 0.000000e+00 : f32
    %146 = vector.broadcast %cst_79 : f32 to vector<1x1xf32>
    %147 = arith.maximumf %145, %146 : vector<1x1xf32>
    %cst_80 = arith.constant dense<0.000000e+00> : vector<1x16xf32>
    %148 = tpu.matmul %147, %136, %cst_80 {dimension_numbers = #tpu.dot_dimension_numbers<[1], [0], [0], [1], [0, 0, 1, 1], [], []>} : vector<1x1xf32>, vector<1x16xf32>, vector<1x16xf32> -> vector<1x16xf32>
    %149 = arith.addf %148, %137 : vector<1x16xf32>
    %cst_81 = arith.constant 0.000000e+00 : f32
    %150 = vector.broadcast %cst_81 : f32 to vector<1x16xf32>
    %151 = arith.subf %150, %149 : vector<1x16xf32>
    %152 = math.exp %151 : vector<1x16xf32>
    %cst_82 = arith.constant 1.000000e+00 : f32
    %153 = vector.broadcast %cst_82 : f32 to vector<1x16xf32>
    %154 = arith.addf %153, %152 : vector<1x16xf32>
    %cst_83 = arith.constant 1.000000e+00 : f32
    %155 = vector.broadcast %cst_83 : f32 to vector<1x16xf32>
    %156 = arith.divf %155, %154 : vector<1x16xf32>
    %157 = vector.broadcast %138 : vector<1x16xf32> to vector<256x16xf32>
    %158 = arith.mulf %133, %157 : vector<256x16xf32>
    %cst_84 = arith.constant dense<0.000000e+00> : vector<256xf32>
    %159 = vector.multi_reduction <add>, %158, %cst_84 [1] : vector<256x16xf32> to vector<256xf32>
    %160 = vector.shape_cast %159 : vector<256xf32> to vector<256x1xf32>
    %161 = vector.broadcast %139 : vector<1x1xf32> to vector<256x1xf32>
    %162 = arith.addf %160, %161 : vector<256x1xf32>
    %cst_85 = arith.constant 0.000000e+00 : f32
    %163 = vector.broadcast %cst_85 : f32 to vector<256x1xf32>
    %164 = arith.subf %163, %162 : vector<256x1xf32>
    %165 = math.exp %164 : vector<256x1xf32>
    %cst_86 = arith.constant 1.000000e+00 : f32
    %166 = vector.broadcast %cst_86 : f32 to vector<256x1xf32>
    %167 = arith.addf %166, %165 : vector<256x1xf32>
    %cst_87 = arith.constant 1.000000e+00 : f32
    %168 = vector.broadcast %cst_87 : f32 to vector<256x1xf32>
    %169 = arith.divf %168, %167 : vector<256x1xf32>
    %170 = vector.broadcast %156 : vector<1x16xf32> to vector<256x16xf32>
    %171 = vector.broadcast %169 : vector<256x1xf32> to vector<256x16xf32>
    %172 = arith.addf %170, %171 : vector<256x16xf32>
    %173 = arith.mulf %133, %172 : vector<256x16xf32>
    %174 = tpu.iota {dimensions = array<i32: 0>} : vector<16x16xi32>
    %175 = tpu.iota {dimensions = array<i32: 1>} : vector<16x16xi32>
    %176 = arith.cmpi eq, %174, %175 : vector<16x16xi32>
    %177 = arith.extui %176 : vector<16x16xi1> to vector<16x16xi32>
    %178 = arith.sitofp %177 : vector<16x16xi32> to vector<16x16xf32>
    %cst_88 = arith.constant dense<0.000000e+00> : vector<16x256xf32>
    %179 = tpu.matmul %178, %173, %cst_88 {dimension_numbers = #tpu.dot_dimension_numbers<[1], [1], [0], [0], [0, 0, 1, 0], [], []>} : vector<16x16xf32>, vector<256x16xf32>, vector<16x256xf32> -> vector<16x256xf32>
    %c0_89 = arith.constant 0 : index
    %c0_90 = arith.constant 0 : index
    %c0_91 = arith.constant 0 : index
    %180 = vector.load %arg19[%c0_89, %c0_90, %c0_91] : memref<1x16x256xf32, #tpu.memory_space<vmem>>, vector<1x16x256xf32>
    %181 = vector.shape_cast %180 : vector<1x16x256xf32> to vector<16x256xf32>
    %182 = vector.shape_cast %179 : vector<16x256xf32> to vector<1x16x256xf32>
    tpu.vector_store %arg19[%c0_89, %c0_90, %c0_91], %182 {strides = array<i32>} : memref<1x16x256xf32, #tpu.memory_space<vmem>>, vector<1x16x256xf32>,
    return
  }
  func.func @transform_0(%arg0: i32) -> (i32, i32, i32, i32) {
    %c0_i32 = arith.constant 0 : i32
    %c0_i32_0 = arith.constant 0 : i32
    %c0_i32_1 = arith.constant 0 : i32
    %c0_i32_2 = arith.constant 0 : i32
    return %arg0, %c0_i32, %c0_i32_0, %c0_i32_1 : i32, i32, i32, i32
  }
  func.func @transform_1(%arg0: i32) -> (i32, i32, i32, i32) {
    %c0_i32 = arith.constant 0 : i32
    %c0_i32_0 = arith.constant 0 : i32
    %c0_i32_1 = arith.constant 0 : i32
    %c0_i32_2 = arith.constant 0 : i32
    return %arg0, %c0_i32, %c0_i32_0, %c0_i32_1 : i32, i32, i32, i32
  }
  func.func @transform_2(%arg0: i32) -> (i32, i32, i32) {
    %c0_i32 = arith.constant 0 : i32
    %c0_i32_0 = arith.constant 0 : i32
    %c0_i32_1 = arith.constant 0 : i32
    %c0_i32_2 = arith.constant 0 : i32
    return %c0_i32, %c0_i32_0, %c0_i32_1 : i32, i32, i32
  }
  func.func @transform_3(%arg0: i32) -> (i32, i32) {
    %c0_i32 = arith.constant 0 : i32
    %c0_i32_0 = arith.constant 0 : i32
    %c0_i32_1 = arith.constant 0 : i32
    return %c0_i32, %c0_i32_0 : i32, i32
  }
  func.func @transform_4(%arg0: i32) -> (i32, i32, i32) {
    %c0_i32 = arith.constant 0 : i32
    %c0_i32_0 = arith.constant 0 : i32
    %c0_i32_1 = arith.constant 0 : i32
    %c0_i32_2 = arith.constant 0 : i32
    return %c0_i32, %c0_i32_0, %c0_i32_1 : i32, i32, i32
  }
  func.func @transform_5(%arg0: i32) -> (i32, i32) {
    %c0_i32 = arith.constant 0 : i32
    %c0_i32_0 = arith.constant 0 : i32
    %c0_i32_1 = arith.constant 0 : i32
    return %c0_i32, %c0_i32_0 : i32, i32
  }
  func.func @transform_6(%arg0: i32) -> (i32, i32) {
    %c0_i32 = arith.constant 0 : i32
    %c0_i32_0 = arith.constant 0 : i32
    %c0_i32_1 = arith.constant 0 : i32
    return %c0_i32, %c0_i32_0 : i32, i32
  }
  func.func @transform_7(%arg0: i32) -> (i32, i32) {
    %c0_i32 = arith.constant 0 : i32
    %c0_i32_0 = arith.constant 0 : i32
    %c0_i32_1 = arith.constant 0 : i32
    return %c0_i32, %c0_i32_0 : i32, i32
  }
  func.func @transform_8(%arg0: i32) -> (i32, i32) {
    %c0_i32 = arith.constant 0 : i32
    %c0_i32_0 = arith.constant 0 : i32
    %c0_i32_1 = arith.constant 0 : i32
    return %c0_i32, %c0_i32_0 : i32, i32
  }
  func.func @transform_9(%arg0: i32) -> (i32, i32) {
    %c0_i32 = arith.constant 0 : i32
    %c0_i32_0 = arith.constant 0 : i32
    %c0_i32_1 = arith.constant 0 : i32
    return %c0_i32, %c0_i32_0 : i32, i32
  }
  func.func @transform_10(%arg0: i32) -> (i32, i32) {
    %c0_i32 = arith.constant 0 : i32
    %c0_i32_0 = arith.constant 0 : i32
    %c0_i32_1 = arith.constant 0 : i32
    return %c0_i32, %c0_i32_0 : i32, i32
  }
  func.func @transform_11(%arg0: i32) -> (i32, i32) {
    %c0_i32 = arith.constant 0 : i32
    %c0_i32_0 = arith.constant 0 : i32
    %c0_i32_1 = arith.constant 0 : i32
    return %c0_i32, %c0_i32_0 : i32, i32
  }
  func.func @transform_12(%arg0: i32) -> (i32, i32) {
    %c0_i32 = arith.constant 0 : i32
    %c0_i32_0 = arith.constant 0 : i32
    %c0_i32_1 = arith.constant 0 : i32
    return %c0_i32, %c0_i32_0 : i32, i32
  }
  func.func @transform_13(%arg0: i32) -> (i32, i32) {
    %c0_i32 = arith.constant 0 : i32
    %c0_i32_0 = arith.constant 0 : i32
    %c0_i32_1 = arith.constant 0 : i32
    return %c0_i32, %c0_i32_0 : i32, i32
  }
  func.func @transform_14(%arg0: i32) -> (i32, i32) {
    %c0_i32 = arith.constant 0 : i32
    %c0_i32_0 = arith.constant 0 : i32
    %c0_i32_1 = arith.constant 0 : i32
    return %c0_i32, %c0_i32_0 : i32, i32
  }
  func.func @transform_15(%arg0: i32) -> (i32, i32) {
    %c0_i32 = arith.constant 0 : i32
    %c0_i32_0 = arith.constant 0 : i32
    %c0_i32_1 = arith.constant 0 : i32
    return %c0_i32, %c0_i32_0 : i32, i32
  }
  func.func @transform_16(%arg0: i32) -> (i32, i32) {
    %c0_i32 = arith.constant 0 : i32
    %c0_i32_0 = arith.constant 0 : i32
    %c0_i32_1 = arith.constant 0 : i32
    return %c0_i32, %c0_i32_0 : i32, i32
  }
  func.func @transform_17(%arg0: i32) -> (i32, i32) {
    %c0_i32 = arith.constant 0 : i32
    %c0_i32_0 = arith.constant 0 : i32
    %c0_i32_1 = arith.constant 0 : i32
    return %c0_i32, %c0_i32_0 : i32, i32
  }
  func.func @transform_18(%arg0: i32) -> (i32, i32, i32) {
    %c0_i32 = arith.constant 0 : i32
    %c0_i32_0 = arith.constant 0 : i32
    %c0_i32_1 = arith.constant 0 : i32
    return %arg0, %c0_i32, %c0_i32_0 : i32, i32, i32
  }
}

</mosaic_0001>

<bundles_post_ra>
// kernel: decoder_block_forward.1
= control target key start
LH: loop header
LB: loop body
LE: loop exit
PB: predicated region body
PF: predicated region fallthrough
CT: control target
= control target key end

     0   :  { %s8657_s0 = inlined_call_operand.vmem [shape: f32[2,8,16,16], index: 0, kind: input, shape index: {}]   ;;  %s8658_s1 = inlined_call_operand.vmem [shape: f32[2,16,16,16], index: 1, kind: input, shape index: {}]   ;;  %s8659_s2 = inlined_call_operand.vmem [shape: bf16[3,96,16], index: 2, kind: input, shape index: {}]   ;;  %s8660_s3 = inlined_call_operand.vmem [shape: f32[1,16], index: 3, kind: input, shape index: {}]   ;;  %s8661_s4 = inlined_call_operand.vmem [shape: bf16[3,48,16], index: 4, kind: input, shape index: {}]   ;;  %s8662_s5 = inlined_call_operand.vmem [shape: f32[1,16], index: 5, kind: input, shape index: {}]   ;;  %s8663_s6 = inlined_call_operand.vmem [shape: f32[32,2], index: 6, kind: input, shape index: {}]   ;;  %s8664_s7 = inlined_call_operand.vmem [shape: f32[1,2], index: 7, kind: input, shape index: {}]   ;;  %s8665_s8 = inlined_call_operand.vmem [shape: f32[2,32], index: 8, kind: input, shape index: {}]   ;;  %s8666_s9 = inlined_call_operand.vmem [shape: f32[1,32], index: 9, kind: input, shape index: {}]   ;;  %s8667_s10 = inlined_call_operand.vmem [shape: f32[1,32], index: 10, kind: input, shape index: {}]   ;;  %s8668_s11 = inlined_call_operand.<no memory space> [shape: f32[1,1], index: 11, kind: input, shape index: {}]   ;;  %s8669_s12 = inlined_call_operand.vmem [shape: f32[16,1], index: 12, kind: input, shape index: {}]   ;;  %s8670_s14 = inlined_call_operand.vmem [shape: f32[1,16], index: 14, kind: input, shape index: {}]   ;;  %s8671_s15 = inlined_call_operand.vmem [shape: f32[1,16], index: 15, kind: input, shape index: {}]   ;;  %s8672_s16 = inlined_call_operand.vmem [shape: f32[1,16], index: 16, kind: input, shape index: {}]   ;;  %s8673_s18 = inlined_call_operand.vmem [shape: f32[2,16,256], index: 18, kind: output, shape index: {}]   ;;  %s8674_s13 = inlined_call_operand.<no memory space> [shape: f32[1,1], index: 13, kind: input, shape index: {}]   ;;  %s8675_s17 = inlined_call_operand.<no memory space> [shape: f32[1,1], index: 17, kind: input, shape index: {}]  }
   0x1   :  { %8696 = sst [smem:[#allocation17_spill]] %s8657_s0  ;;  %v23_v0 = vstv %s8668_s11  ;;  %v25_v1 = vstv %s8674_s13  ;;  %v27_v2 = vstv %s8675_s17 }
   0x2   :  { %8697 = sst [smem:[#allocation18_spill]] %s8658_s1  ;;  %24 = vst [vmem:[#allocation2] sm:$0x1] %v23_v0  ;;  %26 = vst [vmem:[#allocation3] sm:$0x1] %v25_v1  ;;  %s6689_s1 = smov 0  }
   0x3   :  { %8698 = sst [smem:[#allocation19_spill]] %s8659_s2  ;;  %28 = vst [vmem:[#allocation4] sm:$0x1] %v27_v2 }
   0x4 LB: > { %s5409_s11 = sadd.s32 4294967295, %s6576_s1   ;;  %p5413_p0 = scmp.ge.s32.totalorder %s6576_s1, 1  ;;  %s6576_s1 = sphi %s6689_s1, %s34_s1  }
   0x5   : > { %p528_p1 = scmp.lt.s32.totalorder %s6576_s1, 3 }
   0x7   : > { %p529_p2 = pnand %p5413_p0, %p528_p1 }
   0x9   : > { %532 = sbr.rel (%p529_p2) target bundleno = 2510 (0x9ce), region = 92 }
  0x10   : > { %p587_p3 = scmp.lt.s32.totalorder %s5409_s11, 1  ;;  %s8699_s21 = sld [smem:[#allocation18_spill]]  ;;  %v812_v35 = vld [vmem:[%s8663_s6] sm:$0xff]  ;;  %v813_v36 = vld [vmem:[%s8663_s6 + $0x8] sm:$0xff]  ;;  %v8679_v38 = vmov 0.0|0.0   ;;  %v814_v39 = vld [vmem:[%s8663_s6 + $0x10] sm:$0xff] }
  0x11   : > { %s6578_s2 = smov 16   ;;  %v6078_v37 = vpack.c.bf16 %v813_v36, %v812_v35  ;;  %6077 = vmatprep.subr.bf16.mxu0 %v8679_v38  ;;  %v815_v40 = vld [vmem:[%s8663_s6 + $0x18] sm:$0xff]  ;;  %vm6580_vm0 = vmmov 0   ;;  %v8677_v42 = vmov 0.0   ;;  %s8700_s17 = sld [smem:[#allocation17_spill]]  ;;  %vm779_vm1 = vcmask 130048  }
  0x12   : > { %s8736_s11 = smov (!%p587_p3, %s5409_s11), 1  ;;  %v6081_v41 = vpack.c.bf16 %v815_v40, %v814_v39  ;;  %5811 = vmatprep.mubr.msk.f32.mxu0 %vm6580_vm0, %v8677_v42  ;;  %v6796_v44 = vld [vmem:[%s8667_s10] ss:$0 sm:$0xff]  ;;  %vm821_vm2 = vcmask 261120   ;;  %vm970_vm3 = vcmask 1041408   ;;  %vm966_vm4 = vcmask 15360   ;;  %vm8555_vm15 = vmpackc.low %vm779_vm1, %vm779_vm1 }
  0x13   : > { %s5630_s13 = sshll.u32 %s8736_s11, 8  ;;  %6079 = vmatpush3.bf16.msra.mxu0 %v6078_v37  ;;  %s5629_s0 = sshll.u32 %s8736_s11, 7  ;;  %vm1803_vm5 = vcmask 1040384   ;;  %vm1804_vm6 = vsmask.f32 256  ;;  %vm2090_vm9 = vcmask 1046528  }
  0x14   : > { %6080 = vmatprep.subr.bf16.mxu0 %v8679_v38  ;;  %vm7178_vm7 = vmand %vm1803_vm5, %vm1804_vm6  ;;  %vm1838_vm8 = vsmask.f32 7424  ;;  %s6583_s29 = smov 32   ;;  %s6584_s30 = smov 64   ;;  %vm2202_vm10 = vcmask 523264   ;;  %vm2321_vm11 = vcmask 785408  }
  0x15   : > { %vm3658_vm12 = vcmask 392192   ;;  %vm4472_vm13 = vcmask 7168   ;;  %s5631_s28 = sshll.u32 %s8736_s11, 5 }
  0x16   : > { %s6703_s22 = scalar_lea.vmem %s8699_s21, %s5630_s13  ;;  %s601_s13 = scalar_lea.vmem %s8673_s18, %s5631_s28 }
  0x17   : > { %v619_v3 = vld [vmem:[%s6703_s22] sm:$0xff]  ;;  %v621_v4 = vld [vmem:[%s6703_s22 + $0x10] sm:$0xff]  ;;  %v620_v5 = vld [vmem:[%s6703_s22 + $0x8] sm:$0xff]  ;;  %6082 = vmatpush3.bf16.msra.mxu0 %v6081_v41  ;;  %s6790_s20 = scalar_lea.vmem %s8700_s17, %s5629_s0  ;;  %s8712_s0 = sld [smem:[#allocation19_spill]] }
  0x18   : > { %683 = vrot.lane.b32.xlu0 %v619_v3, %s6578_s2  ;;  %687 = vrot.lane.b32.xlu1 %v621_v4, %s6578_s2  ;;  %v622_v6 = vld [vmem:[%s6703_s22 + $0x18] sm:$0xff]  ;;  %v623_v7 = vld [vmem:[%s6703_s22 + $0x20] sm:$0xff] }
  0x19   : > { %v624_v8 = vld [vmem:[%s6703_s22 + $0x28] sm:$0xff]  ;;  %v625_v9 = vld [vmem:[%s6703_s22 + $0x30] sm:$0xff]  ;;  %v626_v10 = vld [vmem:[%s6703_s22 + $0x38] sm:$0xff]  ;;  %5814 = vmatprep.subr.mxu0 %v8677_v42 }
  0x1a   : > { %v627_v11 = vld [vmem:[%s6703_s22 + $0x40] sm:$0xff]  ;;  %v628_v12 = vld [vmem:[%s6703_s22 + $0x48] sm:$0xff]  ;;  %v629_v13 = vld [vmem:[%s6703_s22 + $0x50] sm:$0xff] }
  0x1b   : > { %v630_v14 = vld [vmem:[%s6703_s22 + $0x58] sm:$0xff]  ;;  %v631_v15 = vld [vmem:[%s6703_s22 + $0x60] sm:$0xff]  ;;  %v632_v16 = vld [vmem:[%s6703_s22 + $0x68] sm:$0xff] }
  0x1c   : > { %685 = vrot.lane.b32.xlu0 %v620_v5, %s6578_s2  ;;  %689 = vrot.lane.b32.xlu1 %v622_v6, %s6578_s2  ;;  %v633_v17 = vld [vmem:[%s6703_s22 + $0x70] sm:$0xff]  ;;  %v634_v18 = vld [vmem:[%s6703_s22 + $0x78] sm:$0xff] }
  0x1d   : > { %v635_v19 = vld [vmem:[%s6703_s22 + $0x80] sm:$0xff]  ;;  %v636_v20 = vld [vmem:[%s6703_s22 + $0x88] sm:$0xff]  ;;  %v637_v21 = vld [vmem:[%s6703_s22 + $0x90] sm:$0xff] }
  0x1e   : > { %v638_v22 = vld [vmem:[%s6703_s22 + $0x98] sm:$0xff]  ;;  %v639_v23 = vld [vmem:[%s6703_s22 + $0xa0] sm:$0xff]  ;;  %v640_v24 = vld [vmem:[%s6703_s22 + $0xa8] sm:$0xff] }
  0x1f   : > { %v641_v25 = vld [vmem:[%s6703_s22 + $0xb0] sm:$0xff]  ;;  %v642_v26 = vld [vmem:[%s6703_s22 + $0xb8] sm:$0xff]  ;;  %v643_v27 = vld [vmem:[%s6703_s22 + $0xc0] sm:$0xff] }
  0x20   : > { %691 = vrot.lane.b32.xlu0 %v623_v7, %s6578_s2  ;;  %693 = vrot.lane.b32.xlu1 %v624_v8, %s6578_s2  ;;  %v644_v28 = vld [vmem:[%s6703_s22 + $0xc8] sm:$0xff]  ;;  %v645_v29 = vld [vmem:[%s6703_s22 + $0xd0] sm:$0xff] }
  0x21   : > { %v646_v30 = vld [vmem:[%s6703_s22 + $0xd8] sm:$0xff]  ;;  %v647_v31 = vld [vmem:[%s6703_s22 + $0xe0] sm:$0xff]  ;;  %v648_v32 = vld [vmem:[%s6703_s22 + $0xe8] sm:$0xff] }
  0x22   : > { %v649_v33 = vld [vmem:[%s6703_s22 + $0xf0] sm:$0xff]  ;;  %v650_v34 = vld [vmem:[%s6703_s22 + $0xf8] sm:$0xff]  ;;  %v603_v43 = vld [vmem:[%s6790_s20] sm:$0xff] }
  0x23   : > { %v604_v49 = vld [vmem:[%s6790_s20 + $0x8] sm:$0xff]  ;;  %v605_v61 = vld [vmem:[%s6790_s20 + $0x10] sm:$0xff]  ;;  %v606_v62 = vld [vmem:[%s6790_s20 + $0x18] sm:$0xff] }
  0x24   : > { %695 = vrot.lane.b32.xlu0 %v625_v9, %s6578_s2  ;;  %697 = vrot.lane.b32.xlu1 %v626_v10, %s6578_s2 }
  0x28   : > { %699 = vrot.lane.b32.xlu0 %v627_v11, %s6578_s2  ;;  %701 = vrot.lane.b32.xlu1 %v628_v12, %s6578_s2 }
  0x2c   : > { %703 = vrot.lane.b32.xlu0 %v629_v13, %s6578_s2  ;;  %705 = vrot.lane.b32.xlu1 %v630_v14, %s6578_s2 }
  0x30   : > { %707 = vrot.lane.b32.xlu0 %v631_v15, %s6578_s2  ;;  %709 = vrot.lane.b32.xlu1 %v632_v16, %s6578_s2 }
  0x34   : > { %711 = vrot.lane.b32.xlu0 %v633_v17, %s6578_s2  ;;  %713 = vrot.lane.b32.xlu1 %v634_v18, %s6578_s2 }
  0x38   : > { %715 = vrot.lane.b32.xlu0 %v635_v19, %s6578_s2  ;;  %717 = vrot.lane.b32.xlu1 %v636_v20, %s6578_s2 }
  0x3c   : > { %719 = vrot.lane.b32.xlu0 %v637_v21, %s6578_s2  ;;  %721 = vrot.lane.b32.xlu1 %v638_v22, %s6578_s2 }
  0x40   : > { %723 = vrot.lane.b32.xlu0 %v639_v23, %s6578_s2  ;;  %725 = vrot.lane.b32.xlu1 %v640_v24, %s6578_s2  ;;  %v607_v23 = vld [vmem:[%s6790_s20 + $0x20] sm:$0xff] }
  0x44   : > { %727 = vrot.lane.b32.xlu0 %v641_v25, %s6578_s2  ;;  %729 = vrot.lane.b32.xlu1 %v642_v26, %s6578_s2  ;;  %v608_v25 = vld [vmem:[%s6790_s20 + $0x28] sm:$0xff] }
  0x48   : > { %731 = vrot.lane.b32.xlu0 %v643_v27, %s6578_s2  ;;  %733 = vrot.lane.b32.xlu1 %v644_v28, %s6578_s2 }
  0x4c   : > { %735 = vrot.lane.b32.xlu0 %v645_v29, %s6578_s2  ;;  %737 = vrot.lane.b32.xlu1 %v646_v30, %s6578_s2 }
  0x50   : > { %739 = vrot.lane.b32.xlu0 %v647_v31, %s6578_s2  ;;  %741 = vrot.lane.b32.xlu1 %v648_v32, %s6578_s2 }
  0x54   : > { %743 = vrot.lane.b32.xlu0 %v649_v33, %s6578_s2  ;;  %745 = vrot.lane.b32.xlu1 %v650_v34, %s6578_s2 }
  0x8a   : > { %v684_v45 = vpop.permute.xlu0 %683  ;;  %v688_v46 = vpop.permute.xlu1 %687 }
  0x8b   : > { %v6799_v47 = vsel %vm779_vm1, %v603_v43, %v684_v45  ;;  %v6802_v48 = vsel %vm779_vm1, %v603_v43, %v688_v46 }
  0x8c   : > { %v1056_v50 = vmul.f32 %v6796_v44, %v6799_v47  ;;  %v1058_v51 = vmul.f32 %v6796_v44, %v6802_v48  ;;  %v822_v55 = vsel %vm821_vm2, %v6799_v47, 0.0  ;;  %v825_v1 = vsel %vm821_vm2, %v6802_v48, 0.0 }
  0x8e   : > { %v686_v52 = vpop.permute.xlu0 %685  ;;  %v1088_v53 = vsel %vm821_vm2, %v1056_v50, 0.0  ;;  %v690_v54 = vpop.permute.xlu1 %689  ;;  %v1094_v60 = vsel %vm821_vm2, %v1058_v51, 0.0 }
  0x8f   : > { %v6813_v56 = vsel %vm779_vm1, %v604_v49, %v686_v52  ;;  %1089 = vadd.xlane.f32.xlu0 %v1088_v53  ;;  %v6816_v57 = vsel %vm779_vm1, %v604_v49, %v690_v54  ;;  %v609_v54 = vld [vmem:[%s6790_s20 + $0x30] sm:$0xff] }
  0x90   : > { %v823_v58 = vsel %vm821_vm2, %v6813_v56, 0.0  ;;  %v1057_v59 = vmul.f32 %v6796_v44, %v6813_v56  ;;  %v1059_v63 = vmul.f32 %v6796_v44, %v6816_v57  ;;  %v827_v2 = vsel %vm821_vm2, %v6816_v57, 0.0 }
  0x91   : > { %v824_v0 = vadd.f32 %v823_v58, %v822_v55  ;;  %v610_v58 = vld [vmem:[%s6790_s20 + $0x38] sm:$0xff] }
  0x92   : > { %v1091_v3 = vsel %vm821_vm2, %v1057_v59, 0.0  ;;  %v692_v4 = vpop.permute.xlu0 %691  ;;  %v694_v5 = vpop.permute.xlu1 %693  ;;  %v1097_v10 = vsel %vm821_vm2, %v1059_v63, 0.0 }
  0x93   : > { %v826_v6 = vadd.f32 %v825_v1, %v824_v0  ;;  %1092 = vadd.xlane.f32.xlu1 %v1091_v3  ;;  %1095 = vadd.xlane.f32.xlu0 %v1094_v60  ;;  %v6833_v7 = vsel %vm779_vm1, %v605_v61, %v692_v4  ;;  %v6836_v8 = vsel %vm779_vm1, %v606_v62, %v694_v5 }
  0x94   : > { %v829_v9 = vsel %vm821_vm2, %v6833_v7, 0.0  ;;  %v1060_v11 = vmul.f32 %v6796_v44, %v6833_v7  ;;  %v1061_v12 = vmul.f32 %v6796_v44, %v6836_v8  ;;  %v831_v14 = vsel %vm821_vm2, %v6836_v8, 0.0 }
  0x95   : > { %v828_v13 = vadd.f32 %v827_v2, %v826_v6 }
  0x96   : > { %v696_v15 = vpop.permute.xlu0 %695  ;;  %v1100_v16 = vsel %vm821_vm2, %v1060_v11, 0.0  ;;  %v698_v17 = vpop.permute.xlu1 %697  ;;  %v1103_v22 = vsel %vm821_vm2, %v1061_v12, 0.0 }
  0x97   : > { %v830_v18 = vadd.f32 %v829_v9, %v828_v13  ;;  %1098 = vadd.xlane.f32.xlu0 %v1097_v10  ;;  %v6849_v19 = vsel %vm779_vm1, %v605_v61, %v696_v15  ;;  %1101 = vadd.xlane.f32.xlu1 %v1100_v16  ;;  %v6852_v20 = vsel %vm779_vm1, %v606_v62, %v698_v17 }
  0x98   : > { %v833_v21 = vsel %vm821_vm2, %v6849_v19, 0.0  ;;  %v1062_v24 = vmul.f32 %v6796_v44, %v6849_v19  ;;  %v1063_v26 = vmul.f32 %v6796_v44, %v6852_v20  ;;  %v835_v28 = vsel %vm821_vm2, %v6852_v20, 0.0 }
  0x99   : > { %v832_v27 = vadd.f32 %v831_v14, %v830_v18 }
  0x9a   : > { %v700_v29 = vpop.permute.xlu0 %699  ;;  %v1106_v30 = vsel %vm821_vm2, %v1062_v24, 0.0  ;;  %v702_v31 = vpop.permute.xlu1 %701  ;;  %v1109_v36 = vsel %vm821_vm2, %v1063_v26, 0.0  ;;  %v612_v24 = vld [vmem:[%s6790_s20 + $0x48] sm:$0xff] }
  0x9b   : > { %v834_v32 = vadd.f32 %v833_v21, %v832_v27  ;;  %1104 = vadd.xlane.f32.xlu0 %v1103_v22  ;;  %v6867_v33 = vsel %vm779_vm1, %v607_v23, %v700_v29  ;;  %1107 = vadd.xlane.f32.xlu1 %v1106_v30  ;;  %v6870_v34 = vsel %vm779_vm1, %v608_v25, %v702_v31  ;;  %v611_v22 = vld [vmem:[%s6790_s20 + $0x40] sm:$0xff] }
  0x9c   : > { %v837_v35 = vsel %vm821_vm2, %v6867_v33, 0.0  ;;  %v1064_v37 = vmul.f32 %v6796_v44, %v6867_v33  ;;  %v1065_v39 = vmul.f32 %v6796_v44, %v6870_v34  ;;  %v839_v41 = vsel %vm821_vm2, %v6870_v34, 0.0 }
  0x9d   : > { %v836_v40 = vadd.f32 %v835_v28, %v834_v32 }
  0x9e   : > { %v704_v43 = vpop.permute.xlu0 %703  ;;  %v1112_v45 = vsel %vm821_vm2, %v1064_v37, 0.0  ;;  %v706_v46 = vpop.permute.xlu1 %705  ;;  %v1115_v53 = vsel %vm821_vm2, %v1065_v39, 0.0 }
  0x9f   : > { %v838_v49 = vadd.f32 %v837_v35, %v836_v40  ;;  %1110 = vadd.xlane.f32.xlu0 %v1109_v36  ;;  %v6883_v50 = vsel %vm779_vm1, %v607_v23, %v704_v43  ;;  %1113 = vadd.xlane.f32.xlu1 %v1112_v45  ;;  %v6886_v51 = vsel %vm779_vm1, %v608_v25, %v706_v46 }
  0xa0   : > { %v841_v52 = vsel %vm821_vm2, %v6883_v50, 0.0  ;;  %v1066_v55 = vmul.f32 %v6796_v44, %v6883_v50  ;;  %v1067_v59 = vmul.f32 %v6796_v44, %v6886_v51  ;;  %v843_v61 = vsel %vm821_vm2, %v6886_v51, 0.0 }
  0xa1   : > { %v840_v60 = vadd.f32 %v839_v41, %v838_v49 }
  0xa2   : > { %v708_v62 = vpop.permute.xlu0 %707  ;;  %v1118_v63 = vsel %vm821_vm2, %v1066_v55, 0.0  ;;  %v710_v0 = vpop.permute.xlu1 %709  ;;  %v1121_v5 = vsel %vm821_vm2, %v1067_v59, 0.0  ;;  %v613_v59 = vld [vmem:[%s6790_s20 + $0x50] sm:$0xff] }
  0xa3   : > { %v842_v1 = vadd.f32 %v841_v52, %v840_v60  ;;  %1116 = vadd.xlane.f32.xlu0 %v1115_v53  ;;  %v6901_v2 = vsel %vm779_vm1, %v609_v54, %v708_v62  ;;  %1119 = vadd.xlane.f32.xlu1 %v1118_v63  ;;  %v6904_v3 = vsel %vm779_vm1, %v610_v58, %v710_v0 }
  0xa4   : > { %v845_v4 = vsel %vm821_vm2, %v6901_v2, 0.0  ;;  %v1068_v6 = vmul.f32 %v6796_v44, %v6901_v2  ;;  %v1069_v9 = vmul.f32 %v6796_v44, %v6904_v3  ;;  %v847_v11 = vsel %vm821_vm2, %v6904_v3, 0.0 }
  0xa5   : > { %v844_v10 = vadd.f32 %v843_v61, %v842_v1  ;;  %v614_v61 = vld [vmem:[%s6790_s20 + $0x58] sm:$0xff] }
  0xa6   : > { %v712_v12 = vpop.permute.xlu0 %711  ;;  %v1124_v13 = vsel %vm821_vm2, %v1068_v6, 0.0  ;;  %v714_v14 = vpop.permute.xlu1 %713  ;;  %v1127_v21 = vsel %vm821_vm2, %v1069_v9, 0.0 }
  0xa7   : > { %v846_v15 = vadd.f32 %v845_v4, %v844_v10  ;;  %1122 = vadd.xlane.f32.xlu0 %v1121_v5  ;;  %v6917_v16 = vsel %vm779_vm1, %v609_v54, %v712_v12  ;;  %1125 = vadd.xlane.f32.xlu1 %v1124_v13  ;;  %v6920_v17 = vsel %vm779_vm1, %v610_v58, %v714_v14 }
  0xa8   : > { %v849_v18 = vsel %vm821_vm2, %v6917_v16, 0.0  ;;  %v1070_v23 = vmul.f32 %v6796_v44, %v6917_v16  ;;  %v1071_v25 = vmul.f32 %v6796_v44, %v6920_v17  ;;  %v851_v27 = vsel %vm821_vm2, %v6920_v17, 0.0 }
  0xa9   : > { %v848_v26 = vadd.f32 %v847_v11, %v846_v15 }
  0xaa   : > { %v716_v28 = vpop.permute.xlu0 %715  ;;  %v1130_v29 = vsel %vm821_vm2, %v1070_v23, 0.0  ;;  %v718_v30 = vpop.permute.xlu1 %717  ;;  %v1133_v37 = vsel %vm821_vm2, %v1071_v25, 0.0 }
  0xab   : > { %v850_v31 = vadd.f32 %v849_v18, %v848_v26  ;;  %1128 = vadd.xlane.f32.xlu0 %v1127_v21  ;;  %v6935_v32 = vsel %vm779_vm1, %v611_v22, %v716_v28  ;;  %1131 = vadd.xlane.f32.xlu1 %v1130_v29  ;;  %v6938_v35 = vsel %vm779_vm1, %v612_v24, %v718_v30  ;;  %v615_v29 = vld [vmem:[%s6790_s20 + $0x60] sm:$0xff] }
  0xac   : > { %v853_v36 = vsel %vm821_vm2, %v6935_v32, 0.0  ;;  %v1072_v39 = vmul.f32 %v6796_v44, %v6935_v32  ;;  %v1073_v40 = vmul.f32 %v6796_v44, %v6938_v35  ;;  %v855_v43 = vsel %vm821_vm2, %v6938_v35, 0.0 }
  0xad   : > { %v852_v41 = vadd.f32 %v851_v27, %v850_v31  ;;  %v616_v31 = vld [vmem:[%s6790_s20 + $0x68] sm:$0xff] }
  0xae   : > { %v720_v45 = vpop.permute.xlu0 %719  ;;  %v1136_v46 = vsel %vm821_vm2, %v1072_v39, 0.0  ;;  %v722_v49 = vpop.permute.xlu1 %721  ;;  %v1139_v58 = vsel %vm821_vm2, %v1073_v40, 0.0 }
  0xaf   : > { %v854_v52 = vadd.f32 %v853_v36, %v852_v41  ;;  %1134 = vadd.xlane.f32.xlu0 %v1133_v37  ;;  %v6951_v53 = vsel %vm779_vm1, %v611_v22, %v720_v45  ;;  %1137 = vadd.xlane.f32.xlu1 %v1136_v46  ;;  %v6954_v54 = vsel %vm779_vm1, %v612_v24, %v722_v49 }
  0xb0   : > { %v857_v55 = vsel %vm821_vm2, %v6951_v53, 0.0  ;;  %v1074_v60 = vmul.f32 %v6796_v44, %v6951_v53  ;;  %v1075_v62 = vmul.f32 %v6796_v44, %v6954_v54  ;;  %v859_v0 = vsel %vm821_vm2, %v6954_v54, 0.0 }
  0xb1   : > { %v856_v63 = vadd.f32 %v855_v43, %v854_v52 }
  0xb2   : > { %v724_v1 = vpop.permute.xlu0 %723  ;;  %v1142_v4 = vsel %vm821_vm2, %v1074_v60, 0.0  ;;  %v726_v5 = vpop.permute.xlu1 %725  ;;  %v1145_v12 = vsel %vm821_vm2, %v1075_v62, 0.0  ;;  %v8680_v60 = vmov 0  }
  0xb3   : > { %v858_v6 = vadd.f32 %v857_v55, %v856_v63  ;;  %1140 = vadd.xlane.f32.xlu0 %v1139_v58  ;;  %v6969_v9 = vsel %vm779_vm1, %v613_v59, %v724_v1  ;;  %1143 = vadd.xlane.f32.xlu1 %v1142_v4  ;;  %v6972_v10 = vsel %vm779_vm1, %v614_v61, %v726_v5 }
  0xb4   : > { %8701 = vst [vmem:[#allocation5_spill] sm:$0xff] %v6972_v10  ;;  %v861_v11 = vsel %vm821_vm2, %v6969_v9, 0.0  ;;  %v1076_v13 = vmul.f32 %v6796_v44, %v6969_v9  ;;  %v1077_v14 = vmul.f32 %v6796_v44, %v6972_v10  ;;  %v863_v18 = vsel %vm821_vm2, %v6972_v10, 0.0  ;;  %6277 = vset.pattern.permute.xlu1 %v8680_v60  ;;  %6278 = vset.pattern.permute.xlu0 %v8680_v60 }
  0xb5   : > { %v860_v15 = vadd.f32 %v859_v0, %v858_v6 }
  0xb6   : > { %v728_v21 = vpop.permute.xlu0 %727  ;;  %v1148_v22 = vsel %vm821_vm2, %v1076_v13, 0.0  ;;  %v730_v23 = vpop.permute.xlu1 %729  ;;  %v1151_v28 = vsel %vm821_vm2, %v1077_v14, 0.0  ;;  %v617_v13 = vld [vmem:[%s6790_s20 + $0x70] sm:$0xff] }
  0xb7   : > { %v862_v24 = vadd.f32 %v861_v11, %v860_v15  ;;  %1146 = vadd.xlane.f32.xlu0 %v1145_v12  ;;  %v6985_v25 = vsel %vm779_vm1, %v613_v59, %v728_v21  ;;  %1149 = vadd.xlane.f32.xlu1 %v1148_v22  ;;  %v6988_v26 = vsel %vm779_vm1, %v614_v61, %v730_v23  ;;  %v618_v15 = vld [vmem:[%s6790_s20 + $0x78] sm:$0xff] }
  0xb8   : > { %8702 = vst [vmem:[#allocation6_spill] sm:$0xff] %v6985_v25  ;;  %8703 = vst [vmem:[#allocation7_spill] sm:$0xff] %v6988_v26  ;;  %v865_v27 = vsel %vm821_vm2, %v6985_v25, 0.0  ;;  %v1078_v30 = vmul.f32 %v6796_v44, %v6985_v25  ;;  %v1079_v36 = vmul.f32 %v6796_v44, %v6988_v26  ;;  %v867_v39 = vsel %vm821_vm2, %v6988_v26, 0.0 }
  0xb9   : > { %v864_v37 = vadd.f32 %v863_v18, %v862_v24 }
  0xba   : > { %v732_v40 = vpop.permute.xlu0 %731  ;;  %v1154_v41 = vsel %vm821_vm2, %v1078_v30, 0.0  ;;  %v734_v43 = vpop.permute.xlu1 %733  ;;  %v1157_v55 = vsel %vm821_vm2, %v1079_v36, 0.0 }
  0xbb   : > { %v866_v45 = vadd.f32 %v865_v27, %v864_v37  ;;  %1152 = vadd.xlane.f32.xlu0 %v1151_v28  ;;  %v7003_v46 = vsel %vm779_vm1, %v615_v29, %v732_v40  ;;  %1155 = vadd.xlane.f32.xlu1 %v1154_v41  ;;  %v7006_v49 = vsel %vm779_vm1, %v616_v31, %v734_v43 }
  0xbc   : > { %8704 = vst [vmem:[#allocation8_spill] sm:$0xff] %v7003_v46  ;;  %8705 = vst [vmem:[#allocation9_spill] sm:$0xff] %v7006_v49  ;;  %v869_v52 = vsel %vm821_vm2, %v7003_v46, 0.0  ;;  %v1080_v58 = vmul.f32 %v6796_v44, %v7003_v46  ;;  %v1081_v59 = vmul.f32 %v6796_v44, %v7006_v49  ;;  %v871_v62 = vsel %vm821_vm2, %v7006_v49, 0.0 }
  0xbd   : > { %v868_v61 = vadd.f32 %v867_v39, %v866_v45 }
  0xbe   : > { %v736_v63 = vpop.permute.xlu0 %735  ;;  %v1160_v0 = vsel %vm821_vm2, %v1080_v58, 0.0  ;;  %v738_v1 = vpop.permute.xlu1 %737  ;;  %v1163_v12 = vsel %vm821_vm2, %v1081_v59, 0.0 }
  0xbf   : > { %v870_v4 = vadd.f32 %v869_v52, %v868_v61  ;;  %1158 = vadd.xlane.f32.xlu0 %v1157_v55  ;;  %v7021_v5 = vsel %vm779_vm1, %v615_v29, %v736_v63  ;;  %1161 = vadd.xlane.f32.xlu1 %v1160_v0  ;;  %v7024_v6 = vsel %vm779_vm1, %v616_v31, %v738_v1 }
  0xc0   : > { %8706 = vst [vmem:[#allocation10_spill] sm:$0xff] %v7021_v5  ;;  %8707 = vst [vmem:[#allocation11_spill] sm:$0xff] %v7024_v6  ;;  %v873_v11 = vsel %vm821_vm2, %v7021_v5, 0.0  ;;  %v1082_v14 = vmul.f32 %v6796_v44, %v7021_v5  ;;  %v1083_v18 = vmul.f32 %v6796_v44, %v7024_v6  ;;  %v875_v22 = vsel %vm821_vm2, %v7024_v6, 0.0 }
  0xc1   : > { %v872_v21 = vadd.f32 %v871_v62, %v870_v4 }
  0xc2   : > { %v740_v23 = vpop.permute.xlu0 %739  ;;  %v1166_v24 = vsel %vm821_vm2, %v1082_v14, 0.0  ;;  %v742_v27 = vpop.permute.xlu1 %741  ;;  %v1169_v36 = vsel %vm821_vm2, %v1083_v18, 0.0 }
  0xc3   : > { %v874_v28 = vadd.f32 %v873_v11, %v872_v21  ;;  %1164 = vadd.xlane.f32.xlu0 %v1163_v12  ;;  %v7039_v29 = vsel %vm779_vm1, %v617_v13, %v740_v23  ;;  %1167 = vadd.xlane.f32.xlu1 %v1166_v24  ;;  %v7042_v30 = vsel %vm779_vm1, %v618_v15, %v742_v27  ;;  %v7074_v27 = vld [vmem:[#allocation2] ss:$0 sm:$0xff] }
  0xc4   : > { %8708 = vst [vmem:[#allocation12_spill] sm:$0xff] %v7039_v29  ;;  %8709 = vst [vmem:[#allocation13_spill] sm:$0xff] %v7042_v30  ;;  %v877_v31 = vsel %vm821_vm2, %v7039_v29, 0.0  ;;  %v1084_v37 = vmul.f32 %v6796_v44, %v7039_v29  ;;  %v1085_v39 = vmul.f32 %v6796_v44, %v7042_v30  ;;  %v879_v41 = vsel %vm821_vm2, %v7042_v30, 0.0 }
  0xc5   : > { %v876_v40 = vadd.f32 %v875_v22, %v874_v28 }
  0xc6   : > { %v744_v43 = vpop.permute.xlu0 %743  ;;  %v1172_v45 = vsel %vm821_vm2, %v1084_v37, 0.0  ;;  %v746_v52 = vpop.permute.xlu1 %745  ;;  %v1175_v62 = vsel %vm821_vm2, %v1085_v39, 0.0 }
  0xc7   : > { %v878_v55 = vadd.f32 %v877_v31, %v876_v40  ;;  %1170 = vadd.xlane.f32.xlu0 %v1169_v36  ;;  %v7055_v58 = vsel %vm779_vm1, %v617_v13, %v744_v43  ;;  %1173 = vadd.xlane.f32.xlu1 %v1172_v45  ;;  %v7058_v59 = vsel %vm779_vm1, %v618_v15, %v746_v52 }
  0xc8   : > { %8710 = vst [vmem:[#allocation14_spill] sm:$0xff] %v7055_v58  ;;  %8711 = vst [vmem:[#allocation15_spill] sm:$0xff] %v7058_v59  ;;  %v881_v61 = vsel %vm821_vm2, %v7055_v58, 0.0  ;;  %v1086_v63 = vmul.f32 %v6796_v44, %v7055_v58  ;;  %v1087_v0 = vmul.f32 %v6796_v44, %v7058_v59  ;;  %v883_v4 = vsel %vm821_vm2, %v7058_v59, 0.0 }
  0xc9   : > { %v880_v1 = vadd.f32 %v879_v41, %v878_v55 }
  0xca   : > { %v1178_v11 = vsel %vm821_vm2, %v1086_v63, 0.0  ;;  %v1181_v13 = vsel %vm821_vm2, %v1087_v0, 0.0 }
  0xcb   : > { %v882_v12 = vadd.f32 %v881_v61, %v880_v1  ;;  %1176 = vadd.xlane.f32.xlu0 %v1175_v62  ;;  %1179 = vadd.xlane.f32.xlu1 %v1178_v11 }
  0xcd   : > { %v884_v14 = vadd.f32 %v883_v4, %v882_v12 }
  0xcf   : > { %v885_v15 = vrot.slane %v884_v14, 4  ;;  %1182 = vadd.xlane.f32.xlu0 %v1181_v13 }
  0xd1   : > { %v886_v18 = vadd.f32 %v885_v15, %v884_v14 }
  0xd3   : > { %v887_v21 = vrot.slane %v886_v18, 2 }
  0xd5   : > { %v888_v22 = vadd.f32 %v887_v21, %v886_v18 }
  0xd7   : > { %v889_v23 = vrot.slane %v888_v22, 1 }
  0xd9   : > { %v890_v24 = vadd.f32 %v889_v23, %v888_v22 }
  0xdb   : > { %v891_v44 = vmul.f32 0.00390625, %v890_v24 }
  0xdd   : > { %5812 = vmatmul.mubr.msk.f32.vlgmr.msra.gmra.mrb[0].mxu0 %vm821_vm2, %v891_v44 }
  0xde   : > { %5816 = vmatprep.mubr.msk.f32.mxu0 %vm6580_vm0, %v8677_v42 }
 0x11c   : > { %v1090_v28 = vpop.xlane.xlu0 %1089 }
 0x11d   : > { %v1190_v31 = vadd.f32 %v7074_v27, %v1090_v28 }
 0x11f   : > { %v1222_v36 = vsub.f32 0.0, %v1190_v31 }
 0x120   : > { %v1093_v37 = vpop.xlane.xlu1 %1092  ;;  %v1096_v39 = vpop.xlane.xlu0 %1095 }
 0x121   : > { %v1254_v40 = vmul.f32 1.442695, %v1222_v36  ;;  %v1191_v41 = vadd.f32 %v7074_v27, %v1093_v37  ;;  %v1192_v43 = vadd.f32 %v7074_v27, %v1096_v39 }
 0x123   : > { %6306 = vpow2.f32 %v1254_v40  ;;  %v1223_v45 = vsub.f32 0.0, %v1191_v41  ;;  %v1224_v52 = vsub.f32 0.0, %v1192_v43 }
 0x124   : > { %v1099_v55 = vpop.xlane.xlu0 %1098  ;;  %v1102_v61 = vpop.xlane.xlu1 %1101 }
 0x125   : > { %v1256_v62 = vmul.f32 1.442695, %v1223_v45  ;;  %v1258_v63 = vmul.f32 1.442695, %v1224_v52  ;;  %v1193_v0 = vadd.f32 %v7074_v27, %v1099_v55  ;;  %v1194_v1 = vadd.f32 %v7074_v27, %v1102_v61 }
 0x127   : > { %6308 = vpow2.f32 %v1256_v62  ;;  %v1225_v4 = vsub.f32 0.0, %v1193_v0  ;;  %v1226_v11 = vsub.f32 0.0, %v1194_v1 }
 0x128   : > { %6310 = vpow2.f32 %v1258_v63  ;;  %v1105_v12 = vpop.xlane.xlu0 %1104  ;;  %v1108_v13 = vpop.xlane.xlu1 %1107 }
 0x129   : > { %v1260_v14 = vmul.f32 1.442695, %v1225_v4  ;;  %v1262_v15 = vmul.f32 1.442695, %v1226_v11  ;;  %v1195_v18 = vadd.f32 %v7074_v27, %v1105_v12  ;;  %v1196_v21 = vadd.f32 %v7074_v27, %v1108_v13  ;;  %v817_v13 = vld [vmem:[%s8665_s8] sm:$0x3] }
 0x12a   : > { %5815 = vmatpush3.msk.msra.mxu0 %vm970_vm3, %v817_v13 }
 0x12b   : > { %6312 = vpow2.f32 %v1260_v14  ;;  %v1227_v22 = vsub.f32 0.0, %v1195_v18  ;;  %v1228_v23 = vsub.f32 0.0, %v1196_v21 }
 0x12c   : > { %6314 = vpow2.f32 %v1262_v15  ;;  %v1111_v24 = vpop.xlane.xlu0 %1110  ;;  %v1114_v44 = vpop.xlane.xlu1 %1113 }
 0x12d   : > { %v6307_v28 = vpop.eup %6306  ;;  %v1264_v31 = vmul.f32 1.442695, %v1227_v22  ;;  %v1197_v36 = vadd.f32 %v7074_v27, %v1111_v24  ;;  %v1198_v37 = vadd.f32 %v7074_v27, %v1114_v44  ;;  %v1266_v40 = vmul.f32 1.442695, %v1228_v23 }
 0x12e   : > { %v1318_v39 = vadd.f32 1.0, %v6307_v28 }
 0x12f   : > { %6316 = vpow2.f32 %v1264_v31  ;;  %v1229_v41 = vsub.f32 0.0, %v1197_v36  ;;  %v1230_v43 = vsub.f32 0.0, %v1198_v37 }
 0x130   : > { %6318 = vrcp.f32 %v1318_v39  ;;  %v1117_v45 = vpop.xlane.xlu0 %1116  ;;  %v1120_v52 = vpop.xlane.xlu1 %1119 }
 0x131   : > { %v6309_v55 = vpop.eup %6308  ;;  %v1268_v61 = vmul.f32 1.442695, %v1229_v41  ;;  %v1199_v62 = vadd.f32 %v7074_v27, %v1117_v45  ;;  %6320 = vpow2.f32 %v1266_v40  ;;  %v1270_v1 = vmul.f32 1.442695, %v1230_v43 }
 0x132   : > { %v6311_v63 = vpop.eup %6310  ;;  %v1319_v0 = vadd.f32 1.0, %v6309_v55  ;;  %v1200_v4 = vadd.f32 %v7074_v27, %v1120_v52 }
 0x133   : > { %v1320_v11 = vadd.f32 1.0, %v6311_v63  ;;  %6322 = vpow2.f32 %v1268_v61  ;;  %v1231_v12 = vsub.f32 0.0, %v1199_v62 }
 0x134   : > { %6324 = vrcp.f32 %v1319_v0  ;;  %v1232_v14 = vsub.f32 0.0, %v1200_v4  ;;  %v1123_v15 = vpop.xlane.xlu0 %1122  ;;  %v1126_v18 = vpop.xlane.xlu1 %1125 }
 0x135   : > { %v6313_v21 = vpop.eup %6312  ;;  %6326 = vrcp.f32 %v1320_v11  ;;  %v1201_v22 = vadd.f32 %v7074_v27, %v1123_v15  ;;  %v1202_v23 = vadd.f32 %v7074_v27, %v1126_v18  ;;  %v1272_v31 = vmul.f32 1.442695, %v1231_v12 }
 0x136   : > { %v6315_v24 = vpop.eup %6314  ;;  %v1321_v44 = vadd.f32 1.0, %v6313_v21  ;;  %v1274_v28 = vmul.f32 1.442695, %v1232_v14  ;;  %6328 = vpow2.f32 %v1270_v1 }
 0x137   : > { %v1233_v36 = vsub.f32 0.0, %v1201_v22  ;;  %v1234_v37 = vsub.f32 0.0, %v1202_v23  ;;  %v1322_v39 = vadd.f32 1.0, %v6315_v24 }
 0x138   : > { %6330 = vrcp.f32 %v1321_v44  ;;  %v1129_v40 = vpop.xlane.xlu0 %1128  ;;  %v1132_v41 = vpop.xlane.xlu1 %1131 }
 0x139   : > { %v6317_v43 = vpop.eup %6316  ;;  %v1278_v45 = vmul.f32 1.442695, %v1234_v37  ;;  %v1203_v52 = vadd.f32 %v7074_v27, %v1129_v40  ;;  %6332 = vpow2.f32 %v1274_v28  ;;  %v1204_v61 = vadd.f32 %v7074_v27, %v1132_v41 }
 0x13a   : > { %v6319_v55 = vpop.eup %6318  ;;  %6334 = vpow2.f32 %v1272_v31  ;;  %v1276_v62 = vmul.f32 1.442695, %v1233_v36  ;;  %v1323_v0 = vadd.f32 1.0, %v6317_v43 }
 0x13b   : > { %1420 = vperm.xlu1 %6277, %v6319_v55   ;;  %v6321_v63 = vpop.eup %6320  ;;  %6336 = vrcp.f32 %v1322_v39  ;;  %v1235_v1 = vsub.f32 0.0, %v1203_v52  ;;  %v1236_v4 = vsub.f32 0.0, %v1204_v61 }
 0x13c   : > { %v1135_v11 = vpop.xlane.xlu0 %1134  ;;  %v1138_v12 = vpop.xlane.xlu1 %1137  ;;  %6338 = vpow2.f32 %v1278_v45  ;;  %v1324_v23 = vadd.f32 1.0, %v6321_v63 }
 0x13d   : > { %v6323_v13 = vpop.eup %6322  ;;  %v1205_v14 = vadd.f32 %v7074_v27, %v1135_v11  ;;  %v1206_v15 = vadd.f32 %v7074_v27, %v1138_v12  ;;  %v1282_v21 = vmul.f32 1.442695, %v1236_v4  ;;  %6340 = vpow2.f32 %v1276_v62 }
 0x13e   : > { %v6325_v18 = vpop.eup %6324  ;;  %6342 = vrcp.f32 %v1323_v0  ;;  %v1280_v44 = vmul.f32 1.442695, %v1235_v1  ;;  %v1325_v37 = vadd.f32 1.0, %v6323_v13 }
 0x13f   : > { %v6327_v22 = vpop.eup %6326  ;;  %v1238_v24 = vsub.f32 0.0, %v1206_v15  ;;  %1425 = vperm.xlu0 %6278, %v6325_v18   ;;  %6344 = vpow2.f32 %v1282_v21  ;;  %v1237_v39 = vsub.f32 0.0, %v1205_v14 }
 0x140   : > { %1430 = vperm.xlu1 %6277, %v6327_v22   ;;  %v1141_v28 = vpop.xlane.xlu0 %1140  ;;  %v1144_v31 = vpop.xlane.xlu1 %1143  ;;  %6346 = vrcp.f32 %v1324_v23 }
 0x141   : > { %v6329_v36 = vpop.eup %6328  ;;  %v1286_v41 = vmul.f32 1.442695, %v1238_v24  ;;  %v1208_v43 = vadd.f32 %v7074_v27, %v1144_v31  ;;  %6348 = vpow2.f32 %v1280_v44  ;;  %v1207_v55 = vadd.f32 %v7074_v27, %v1141_v28 }
 0x142   : > { %v6331_v40 = vpop.eup %6330  ;;  %v1326_v52 = vadd.f32 1.0, %v6329_v36  ;;  %6350 = vrcp.f32 %v1325_v37  ;;  %v1284_v4 = vmul.f32 1.442695, %v1237_v39 }
 0x143   : > { %v6333_v45 = vpop.eup %6332  ;;  %v1240_v61 = vsub.f32 0.0, %v1208_v43  ;;  %6352 = vpow2.f32 %v1286_v41  ;;  %v1239_v21 = vsub.f32 0.0, %v1207_v55 }
 0x144   : > { %1435 = vperm.xlu1 %6277, %v6331_v40   ;;  %v1147_v62 = vpop.xlane.xlu0 %1146  ;;  %v1150_v63 = vpop.xlane.xlu1 %1149  ;;  %v1328_v1 = vadd.f32 1.0, %v6333_v45 }
 0x145   : > { %v6335_v0 = vpop.eup %6334  ;;  %v1210_v11 = vadd.f32 %v7074_v27, %v1150_v63  ;;  %v1290_v14 = vmul.f32 1.442695, %v1240_v61  ;;  %v1209_v22 = vadd.f32 %v7074_v27, %v1147_v62  ;;  %v1288_v43 = vmul.f32 1.442695, %v1239_v21 }
 0x146   : > { %v6337_v12 = vpop.eup %6336  ;;  %6354 = vrcp.f32 %v1328_v1  ;;  %v1327_v28 = vadd.f32 1.0, %v6335_v0 }
 0x147   : > { %v6339_v13 = vpop.eup %6338  ;;  %v1242_v15 = vsub.f32 0.0, %v1210_v11  ;;  %6356 = vrcp.f32 %v1326_v52  ;;  %v1241_v45 = vsub.f32 0.0, %v1209_v22 }
 0x148   : > { %v1330_v18 = vadd.f32 1.0, %v6339_v13  ;;  %1440 = vperm.xlu1 %6277, %v6337_v12   ;;  %v1153_v23 = vpop.xlane.xlu0 %1152  ;;  %v1156_v24 = vpop.xlane.xlu1 %1155  ;;  %6358 = vpow2.f32 %v1284_v4 }
 0x149   : > { %v6341_v44 = vpop.eup %6340  ;;  %v1212_v36 = vadd.f32 %v7074_v27, %v1156_v24  ;;  %v1294_v39 = vmul.f32 1.442695, %v1242_v15  ;;  %v1211_v40 = vadd.f32 %v7074_v27, %v1153_v23 }
 0x14a   : > { %v6343_v31 = vpop.eup %6342  ;;  %6360 = vrcp.f32 %v1330_v18  ;;  %v1329_v1 = vadd.f32 1.0, %v6341_v44  ;;  %v1292_v18 = vmul.f32 1.442695, %v1241_v45 }
 0x14b   : > { %v6345_v37 = vpop.eup %6344  ;;  %6362 = vpow2.f32 %v1290_v14  ;;  %v1244_v52 = vsub.f32 0.0, %v1212_v36  ;;  %v1243_v13 = vsub.f32 0.0, %v1211_v40 }
 0x14c   : > { %v1332_v41 = vadd.f32 1.0, %v6345_v37  ;;  %1445 = vperm.xlu1 %6277, %v6343_v31   ;;  %v1159_v55 = vpop.xlane.xlu0 %1158  ;;  %v1162_v61 = vpop.xlane.xlu1 %1161  ;;  %6364 = vrcp.f32 %v1327_v28 }
 0x14d   : > { %v6347_v62 = vpop.eup %6346  ;;  %v1214_v63 = vadd.f32 %v7074_v27, %v1162_v61  ;;  %v1298_v4 = vmul.f32 1.442695, %v1244_v52  ;;  %v1213_v11 = vadd.f32 %v7074_v27, %v1159_v55 }
 0x14e   : > { %v6349_v0 = vpop.eup %6348  ;;  %6366 = vrcp.f32 %v1332_v41 }
 0x14f   : > { %v6351_v12 = vpop.eup %6350  ;;  %6368 = vpow2.f32 %v1294_v39  ;;  %v1246_v14 = vsub.f32 0.0, %v1214_v63  ;;  %v1245_v44 = vsub.f32 0.0, %v1213_v11  ;;  %v1296_v39 = vmul.f32 1.442695, %v1243_v13 }
 0x150   : > { %v6353_v15 = vpop.eup %6352  ;;  %6370 = vpow2.f32 %v1288_v43  ;;  %1450 = vperm.xlu1 %6277, %v6347_v62   ;;  %v1165_v21 = vpop.xlane.xlu0 %1164  ;;  %v1331_v61 = vadd.f32 1.0, %v6349_v0 }
 0x151   : > { %v1168_v22 = vpop.xlane.xlu1 %1167  ;;  %v6355_v23 = vpop.eup %6354  ;;  %v1334_v24 = vadd.f32 1.0, %v6353_v15  ;;  %6372 = vpow2.f32 %v1298_v4  ;;  %v1302_v28 = vmul.f32 1.442695, %v1246_v14  ;;  %v1215_v40 = vadd.f32 %v7074_v27, %v1165_v21 }
 0x152   : > { %v6357_v31 = vpop.eup %6356  ;;  %6374 = vrcp.f32 %v1329_v1  ;;  %1470 = vperm.xlu0 %6278, %v6355_v23   ;;  %v1216_v36 = vadd.f32 %v7074_v27, %v1168_v22  ;;  %v1300_v1 = vmul.f32 1.442695, %v1245_v44 }
 0x153   : > { %v6359_v37 = vpop.eup %6358  ;;  %6376 = vrcp.f32 %v1334_v24  ;;  %v1247_v11 = vsub.f32 0.0, %v1215_v40 }
 0x154   : > { %v6361_v41 = vpop.eup %6360  ;;  %6378 = vpow2.f32 %v1292_v18  ;;  %v1248_v43 = vsub.f32 0.0, %v1216_v36  ;;  %1455 = vperm.xlu1 %6277, %v6351_v12   ;;  %v1171_v45 = vpop.xlane.xlu0 %1170  ;;  %v1333_v0 = vadd.f32 1.0, %v6359_v37 }
 0x155   : > { %v1174_v52 = vpop.xlane.xlu1 %1173  ;;  %v6363_v55 = vpop.eup %6362  ;;  %6380 = vpow2.f32 %v1302_v28  ;;  %v1217_v14 = vadd.f32 %v7074_v27, %v1171_v45  ;;  %v1304_v36 = vmul.f32 1.442695, %v1247_v11 }
 0x156   : > { %v1218_v62 = vadd.f32 %v7074_v27, %v1174_v52  ;;  %v1336_v63 = vadd.f32 1.0, %v6363_v55  ;;  %1480 = vperm.xlu0 %6278, %v6361_v41   ;;  %v6365_v4 = vpop.eup %6364  ;;  %6382 = vpow2.f32 %v1296_v39  ;;  %v1306_v13 = vmul.f32 1.442695, %v1248_v43 }
 0x157   : > { %v1249_v39 = vsub.f32 0.0, %v1217_v14 }
 0x158   : > { %v6367_v15 = vpop.eup %6366  ;;  %6384 = vrcp.f32 %v1336_v63  ;;  %v1250_v18 = vsub.f32 0.0, %v1218_v62  ;;  %1460 = vperm.xlu1 %6277, %v6357_v31   ;;  %v1177_v12 = vpop.xlane.xlu0 %1176 }
 0x159   : > { %v1180_v21 = vpop.xlane.xlu1 %1179  ;;  %v6369_v22 = vpop.eup %6368  ;;  %6386 = vrcp.f32 %v1331_v61  ;;  %v1219_v40 = vadd.f32 %v7074_v27, %v1177_v12  ;;  %v1308_v63 = vmul.f32 1.442695, %v1249_v39 }
 0x15a   : > { %v6371_v23 = vpop.eup %6370  ;;  %v1338_v24 = vadd.f32 1.0, %v6369_v22  ;;  %6388 = vpow2.f32 %v1300_v1  ;;  %1490 = vperm.xlu0 %6278, %v6367_v15   ;;  %v1220_v28 = vadd.f32 %v7074_v27, %v1180_v21  ;;  %v1310_v43 = vmul.f32 1.442695, %v1250_v18 }
 0x15b   : > { %v6373_v44 = vpop.eup %6372  ;;  %6390 = vpow2.f32 %v1306_v13  ;;  %v1335_v37 = vadd.f32 1.0, %v6371_v23  ;;  %v1251_v1 = vsub.f32 0.0, %v1219_v40 }
 0x15c   : > { %v6375_v41 = vpop.eup %6374  ;;  %6392 = vrcp.f32 %v1338_v24  ;;  %v1340_v31 = vadd.f32 1.0, %v6373_v44  ;;  %v1252_v45 = vsub.f32 0.0, %v1220_v28  ;;  %1465 = vperm.xlu1 %6277, %v6365_v4   ;;  %v1183_v55 = vpop.xlane.xlu0 %1182 }
 0x15d   : > { %v6377_v52 = vpop.eup %6376  ;;  %6394 = vrcp.f32 %v1333_v0  ;;  %v1221_v14 = vadd.f32 %v7074_v27, %v1183_v55  ;;  %v1312_v21 = vmul.f32 1.442695, %v1251_v1 }
 0x15e   : > { %v6379_v61 = vpop.eup %6378  ;;  %6396 = vrcp.f32 %v1340_v31  ;;  %1500 = vperm.xlu0 %6278, %v6377_v52   ;;  %v1314_v13 = vmul.f32 1.442695, %v1252_v45 }
 0x15f   : > { %v6381_v62 = vpop.eup %6380  ;;  %6398 = vpow2.f32 %v1304_v36  ;;  %v1337_v4 = vadd.f32 1.0, %v6379_v61  ;;  %v1253_v0 = vsub.f32 0.0, %v1221_v14 }
 0x160   : > { %v1342_v11 = vadd.f32 1.0, %v6381_v62  ;;  %6400 = vpow2.f32 %v1310_v43  ;;  %1475 = vperm.xlu1 %6277, %v6375_v41   ;;  %v6383_v15 = vpop.eup %6382 }
 0x161   : > { %6402 = vrcp.f32 %v1335_v37  ;;  %v1339_v24 = vadd.f32 1.0, %v6383_v15  ;;  %v1316_v40 = vmul.f32 1.442695, %v1253_v0 }
 0x162   : > { %v6385_v18 = vpop.eup %6384  ;;  %6404 = vrcp.f32 %v1342_v11 }
 0x163   : > { %v6387_v12 = vpop.eup %6386  ;;  %6406 = vpow2.f32 %v1308_v63  ;;  %1510 = vperm.xlu0 %6278, %v6385_v18  }
 0x164   : > { %v6389_v22 = vpop.eup %6388  ;;  %6408 = vpow2.f32 %v1314_v13  ;;  %1485 = vperm.xlu1 %6277, %v6387_v12  }
 0x165   : > { %v6391_v23 = vpop.eup %6390  ;;  %6410 = vrcp.f32 %v1337_v4  ;;  %v1341_v36 = vadd.f32 1.0, %v6389_v22 }
 0x166   : > { %v6393_v28 = vpop.eup %6392  ;;  %v1344_v44 = vadd.f32 1.0, %v6391_v23  ;;  %6412 = vpow2.f32 %v1312_v21 }
 0x167   : > { %v6395_v27 = vpop.eup %6394  ;;  %1520 = vperm.xlu0 %6278, %v6393_v28  }
 0x168   : > { %v6397_v39 = vpop.eup %6396  ;;  %6414 = vrcp.f32 %v1344_v44  ;;  %1495 = vperm.xlu1 %6277, %v6395_v27   ;;  %v816_v44 = vld [vmem:[%s8664_s7] sm:$0x1] }
 0x169   : > { %v6399_v41 = vpop.eup %6398  ;;  %6416 = vrcp.f32 %v1339_v24 }
 0x16a   : > { %v6401_v31 = vpop.eup %6400  ;;  %6418 = vrcp.f32 %v1341_v36  ;;  %v1343_v37 = vadd.f32 1.0, %v6399_v41 }
 0x16b   : > { %v6403_v43 = vpop.eup %6402  ;;  %v1346_v45 = vadd.f32 1.0, %v6401_v31  ;;  %1530 = vperm.xlu0 %6278, %v6397_v39   ;;  %6420 = vpow2.f32 %v1316_v40 }
 0x16c   : > { %v6405_v52 = vpop.eup %6404  ;;  %1505 = vperm.xlu1 %6277, %v6403_v43  }
 0x16d   : > { %v6407_v55 = vpop.eup %6406  ;;  %6422 = vrcp.f32 %v1346_v45 }
 0x16e   : > { %v6409_v61 = vpop.eup %6408  ;;  %6424 = vrcp.f32 %v1343_v37  ;;  %v1345_v11 = vadd.f32 1.0, %v6407_v55 }
 0x16f   : > { %v6411_v62 = vpop.eup %6410  ;;  %v1348_v63 = vadd.f32 1.0, %v6409_v61  ;;  %1540 = vperm.xlu0 %6278, %v6405_v52  }
 0x170   : > { %1515 = vperm.xlu1 %6277, %v6411_v62   ;;  %v6413_v1 = vpop.eup %6412 }
 0x171   : > { %6426 = vrcp.f32 %v1348_v63  ;;  %v1347_v4 = vadd.f32 1.0, %v6413_v1 }
 0x172   : > { %v6415_v13 = vpop.eup %6414  ;;  %6428 = vrcp.f32 %v1345_v11 }
 0x173   : > { %v6417_v14 = vpop.eup %6416  ;;  %1550 = vperm.xlu0 %6278, %v6415_v13   ;;  %6430 = vrcp.f32 %v1347_v4 }
 0x174   : > { %1525 = vperm.xlu1 %6277, %v6417_v14   ;;  %v6419_v15 = vpop.eup %6418 }
 0x175   : > { %v6421_v18 = vpop.eup %6420 }
 0x176   : > { %v1349_v21 = vadd.f32 1.0, %v6421_v18 }
 0x177   : > { %v6423_v12 = vpop.eup %6422 }
 0x178   : > { %1560 = vperm.xlu0 %6278, %v6423_v12   ;;  %1535 = vperm.xlu1 %6277, %v6419_v15   ;;  %v6425_v22 = vpop.eup %6424  ;;  %6432 = vrcp.f32 %v1349_v21  ;;  %v818_v15 = vld [vmem:[%s8666_s9] sm:$0x1] }
 0x17b   : > { %v6427_v0 = vpop.eup %6426 }
 0x17c   : > { %1570 = vperm.xlu0 %6278, %v6427_v0   ;;  %1545 = vperm.xlu1 %6277, %v6425_v22   ;;  %v6429_v23 = vpop.eup %6428 }
 0x17d   : > { %v6431_v24 = vpop.eup %6430 }
 0x180   : > { %1555 = vperm.xlu1 %6277, %v6429_v23  }
 0x182   : > { %v6433_v28 = vpop.eup %6432 }
 0x184   : > { %1565 = vperm.xlu1 %6277, %v6431_v24  }
 0x188   : > { %1575 = vperm.xlu1 %6277, %v6433_v28  }
 0x1b0   : > { %v961_v27 = vpop.f32.mrb[0].mxu0 }
 0x1b1   : > { %v962_v36 = vadd.f32 %v961_v27, %v816_v44  ;;  %v5813_v39 = vpop.f32.mrb[1].mxu0  ;;  %v6279_v27 = vld [vmem:[%s8712_s0 + $0x30] sm:$0xff]  }
 0x1b2   : > { %5819 = vmatprep.subr.bf16.mxu1 %v6279_v27 }
 0x1b3   : > { %v965_v40 = vmax.f32 %v962_v36, 0.0  ;;  %v6280_v36 = vld [vmem:[%s8712_s0 + $0x38] sm:$0xff]   ;;  %5820 = vmatpush3.bf16.msra.mxu1 %v6279_v27  ;;  %v6283_v27 = vld [vmem:[%s8712_s0 + $0x50] sm:$0xff]  }
 0x1b4   : > { %5821 = vmatprep.subr.bf16.mxu1 %v6280_v36 }
 0x1b5   : > { %5817 = vmatmul.mubr.msk.f32.vlgmr.msra.gmra.mrb[2].mxu0 %vm966_vm4, %v965_v40 }
 0x1b7   : > { %5822 = vmatpush3.bf16.msra.mxu1 %v6280_v36 }
 0x1ba   : > { %v1421_v41 = vpop.permute.xlu1 %1420 }
 0x1be   : > { %v1426_v63 = vpop.permute.xlu0 %1425 }
 0x1bf   : > { %v1431_v31 = vpop.permute.xlu1 %1430 }
 0x1c3   : > { %v1436_v43 = vpop.permute.xlu1 %1435 }
 0x1c7   : > { %v1441_v45 = vpop.permute.xlu1 %1440 }
 0x1cb   : > { %v1446_v52 = vpop.permute.xlu1 %1445 }
 0x1cf   : > { %v7114_v37 = vpop.permute.xlu1 %1450 }
 0x1d1   : > { %v7122_v1 = vpop.permute.xlu0 %1470 }
 0x1d3   : > { %v7116_v55 = vpop.permute.xlu1 %1455 }
 0x1d5   : > { %v7126_v13 = vpop.permute.xlu0 %1480 }
 0x1d7   : > { %v7118_v61 = vpop.permute.xlu1 %1460 }
 0x1d9   : > { %v1491_v21 = vpop.permute.xlu0 %1490 }
 0x1db   : > { %v7120_v62 = vpop.permute.xlu1 %1465 }
 0x1dd   : > { %v1501_v24 = vpop.permute.xlu0 %1500 }
 0x1df   : > { %v7124_v11 = vpop.permute.xlu1 %1475 }
 0x1e2   : > { %v1511_v44 = vpop.permute.xlu0 %1510 }
 0x1e3   : > { %v7128_v14 = vpop.permute.xlu1 %1485 }
 0x1e7   : > { %v1496_v0 = vpop.permute.xlu1 %1495 }
 0x1eb   : > { %v1506_v28 = vpop.permute.xlu1 %1505 }
 0x1ef   : > { %v1516_v39 = vpop.permute.xlu1 %1515 }
 0x288   : > { %v1040_v4 = vpop.f32.mrb[2].mxu0 }
 0x289   : > { %v1041_v18 = vadd.f32 %v1040_v4, %v818_v15  ;;  %v5818_v12 = vpop.f32.mrb[3].mxu0  ;;  %v6281_v15 = vld [vmem:[%s8712_s0 + $0x40] sm:$0xff]  }
 0x28a   : > { %v1526_v12 = vpop.permute.xlu1 %1525  ;;  %5823 = vmatprep.subr.bf16.mxu1 %v6281_v15 }
 0x28b   : > { %v1044_v22 = vsub.f32 0.0, %v1041_v18  ;;  %v1521_v18 = vpop.permute.xlu0 %1520  ;;  %5824 = vmatpush3.bf16.msra.mxu1 %v6281_v15 }
 0x28d   : > { %v1045_v23 = vmul.f32 1.442695, %v1044_v22  ;;  %v6282_v22 = vld [vmem:[%s8712_s0 + $0x48] sm:$0xff]  }
 0x28e   : > { %5825 = vmatprep.subr.bf16.mxu1 %v6282_v22  ;;  %v1536_v38 = vpop.permute.xlu1 %1535 }
 0x28f   : > { %6434 = vpow2.f32 %v1045_v23  ;;  %v8688_v23 = vlaneseq  ;;  %v1531_v42 = vpop.permute.xlu0 %1530  ;;  %5826 = vmatpush3.bf16.msra.mxu1 %v6282_v22 }
 0x290   : > { %5827 = vmatprep.subr.bf16.mxu1 %v6283_v27 }
 0x292   : > { %v1546_v58 = vpop.permute.xlu1 %1545 }
 0x293   : > { %v1541_v36 = vpop.permute.xlu0 %1540  ;;  %5828 = vmatpush3.bf16.msra.mxu1 %v6283_v27 }
 0x296   : > { %v1556_v30 = vpop.permute.xlu1 %1555 }
 0x299   : > { %v6435_v40 = vpop.eup %6434 }
 0x29a   : > { %v1047_v4 = vadd.f32 1.0, %v6435_v40  ;;  %v7149_v40 = vshrl.u32 %v8688_v23, 7 }
 0x29c   : > { %6436 = vrcp.f32 %v1047_v4  ;;  %8713 = vst [vmem:[#allocation16_spill] sm:$0xff] %v7149_v40  ;;  %v8694_v60 = vsub.s32 0, %v7149_v40  ;;  %v1551_v4 = vpop.permute.xlu0 %1550 }
 0x2a0   : > { %v1561_v46 = vpop.permute.xlu0 %1560 }
 0x2a6   : > { %v6437_v59 = vpop.eup %6436 }
 0x2a7   : > { %v1417_v15 = vrot.slane %v6437_v59, %v8694_v60  ;;  %v1566_v59 = vpop.permute.xlu1 %1565 }
 0x2a9   : > { %v1578_v29 = vadd.f32 %v1421_v41, %v1417_v15  ;;  %v1579_v6 = vadd.f32 %v1426_v63, %v1417_v15  ;;  %v1580_v5 = vadd.f32 %v1431_v31, %v1417_v15  ;;  %v1581_v49 = vadd.f32 %v1436_v43, %v1417_v15 }
 0x2aa   : > { %v1582_v23 = vadd.f32 %v1441_v45, %v1417_v15  ;;  %v1583_v22 = vadd.f32 %v1446_v52, %v1417_v15  ;;  %v1584_v60 = vadd.f32 %v7114_v37, %v1417_v15  ;;  %v1585_v41 = vadd.f32 %v7116_v55, %v1417_v15 }
 0x2ab   : > { %v1610_v26 = vmul.f32 %v1578_v29, %v6799_v47  ;;  %v1611_v25 = vmul.f32 %v1579_v6, %v6813_v56  ;;  %v1612_v27 = vmul.f32 %v1580_v5, %v6802_v48  ;;  %v1613_v40 = vmul.f32 %v1581_v49, %v6816_v57 }
 0x2ac   : > { %v1586_v31 = vadd.f32 %v7118_v61, %v1417_v15  ;;  %v1587_v43 = vadd.f32 %v7120_v62, %v1417_v15  ;;  %v1588_v45 = vadd.f32 %v7122_v1, %v1417_v15  ;;  %v1589_v52 = vadd.f32 %v7124_v11, %v1417_v15  ;;  %v1571_v1 = vpop.permute.xlu0 %1570 }
 0x2ad   : > { %v1590_v47 = vadd.f32 %v7126_v13, %v1417_v15  ;;  %v1591_v56 = vadd.f32 %v7128_v14, %v1417_v15  ;;  %v1592_v48 = vadd.f32 %v1491_v21, %v1417_v15  ;;  %v1593_v5 = vadd.f32 %v1496_v0, %v1417_v15 }
 0x2ae   : > { %v1594_v57 = vadd.f32 %v1501_v24, %v1417_v15  ;;  %v1595_v49 = vadd.f32 %v1506_v28, %v1417_v15  ;;  %v1596_v6 = vadd.f32 %v1511_v44, %v1417_v15  ;;  %v1597_v29 = vadd.f32 %v1516_v39, %v1417_v15 }
 0x2af   : > { %v1644_v37 = vpack.c.bf16 %v1613_v40, %v1612_v27  ;;  %v1643_v55 = vpack.c.bf16 %v1611_v25, %v1610_v26  ;;  %v1598_v63 = vadd.f32 %v1521_v18, %v1417_v15  ;;  %v1599_v61 = vadd.f32 %v1526_v12, %v1417_v15  ;;  %v1576_v25 = vpop.permute.xlu1 %1575 }
 0x2b0   : > { %v7166_v10 = vadd.f32 %v1531_v42, %v1417_v15  ;;  %v7168_v62 = vadd.f32 %v1536_v38, %v1417_v15  ;;  %v7170_v11 = vadd.f32 %v1541_v36, %v1417_v15  ;;  %v7172_v13 = vadd.f32 %v1546_v58, %v1417_v15 }
 0x2b1   : > { %v7174_v14 = vadd.f32 %v1551_v4, %v1417_v15  ;;  %v1667_v21 = vshrl.u32 %v1644_v37, 16  ;;  %v7182_v26 = vadd.f32 %v1556_v30, %v1417_v15  ;;  %v7184_v42 = vadd.f32 %v1561_v46, %v1417_v15  ;;  %v6284_v46 = vld [vmem:[%s8712_s0 + $0x58] sm:$0xff]  }
 0x2b2   : > { %v7186_v38 = vadd.f32 %v1566_v59, %v1417_v15  ;;  %v7188_v24 = vadd.f32 %v1571_v1, %v1417_v15  ;;  %v7190_v58 = vadd.f32 %v1576_v25, %v1417_v15  ;;  %v1670_v44 = vshll.u32 %v1644_v37, 16  ;;  %5829 = vmatprep.subr.bf16.mxu1 %v6284_v46  ;;  %v8716_v1 = vld [vmem:[#allocation5_spill] sm:$0xff] }
 0x2b3   : > { %v1669_v28 = vrot.slane %v1667_v21, 7  ;;  %v1660_v39 = vshrl.u32 %v1643_v55, 16  ;;  %v1614_v18 = vmul.f32 %v1582_v23, %v6833_v7  ;;  %v1615_v12 = vmul.f32 %v1583_v22, %v6836_v8  ;;  %5830 = vmatpush3.bf16.msra.mxu1 %v6284_v46 }
 0x2b4   : > { %v1616_v40 = vmul.f32 %v1584_v60, %v6849_v19  ;;  %v1617_v30 = vmul.f32 %v1585_v41, %v6852_v20  ;;  %v1663_v27 = vshll.u32 %v1643_v55, 16  ;;  %v1618_v59 = vmul.f32 %v1586_v31, %v6867_v33 }
 0x2b5   : > { %v1672_v36 = vor.u32 %v1670_v44, %v1669_v28  ;;  %v7201_v15 = vsel %vm7178_vm7, %v1669_v28, 0  ;;  %v1662_v4 = vrot.slane %v1660_v39, 7  ;;  %v1619_v7 = vmul.f32 %v1587_v43, %v6870_v34  ;;  %v8718_v44 = vld [vmem:[#allocation7_spill] sm:$0xff] }
 0x2b6   : > { %v1620_v8 = vmul.f32 %v1588_v45, %v6883_v50  ;;  %v1621_v19 = vmul.f32 %v1589_v52, %v6886_v51  ;;  %v1622_v20 = vmul.f32 %v1590_v47, %v6901_v2  ;;  %v1623_v33 = vmul.f32 %v1591_v56, %v6904_v3 }
 0x2b7   : > { %v7210_v60 = vsel %vm7178_vm7, 0, %v1672_v36  ;;  %v1665_v23 = vor.u32 %v1663_v27, %v1662_v4  ;;  %v7214_v22 = vsel %vm7178_vm7, %v1662_v4, 0  ;;  %v1624_v34 = vmul.f32 %v1592_v48, %v6917_v16 }
 0x2b8   : > { %v1862_v50 = vshll.u32 %v7210_v60, 16  ;;  %v1867_v51 = vshll.u32 %v7201_v15, 16  ;;  %v1625_v2 = vmul.f32 %v1593_v5, %v6920_v17  ;;  %v1626_v41 = vmul.f32 %v1594_v57, %v6935_v32 }
 0x2b9   : > { %v1646_v31 = vpack.c.bf16 %v1617_v30, %v1616_v40  ;;  %v7224_v43 = vsel %vm7178_vm7, 0, %v1665_v23  ;;  %v1860_v45 = vshrl.u32 %v7210_v60, 16  ;;  %v1855_v16 = vshll.u32 %v7214_v22, 16  ;;  %v8725_v23 = vld [vmem:[#allocation14_spill] sm:$0xff] }
 0x2ba   : > { %v1864_v52 = vrot.slane %v1862_v50, 1  ;;  %v1850_v3 = vshll.u32 %v7224_v43, 16  ;;  %v1627_v47 = vmul.f32 %v1595_v49, %v6938_v35  ;;  %v1628_v56 = vmul.f32 %v1596_v6, %v6951_v53  ;;  %v7238_v35 = vld [vmem:[%s8712_s0] sm:$0xff]   ;;  %v8717_v53 = vld [vmem:[#allocation6_spill] sm:$0xff] }
 0x2bb   : > { %v1629_v17 = vmul.f32 %v1597_v29, %v6954_v54  ;;  %v1645_v48 = vpack.c.bf16 %v1615_v12, %v1614_v18  ;;  %v1869_v5 = vrot.slane %v1867_v51, 1  ;;  %v1848_v57 = vshrl.u32 %v7224_v43, 16  ;;  %5863 = vmatprep.subr.bf16.mxu1 %v7238_v35  ;;  %v8720_v12 = vld [vmem:[#allocation9_spill] sm:$0xff] }
 0x2bc   : > { %v1865_v32 = vor.u32 %v1864_v52, %v1860_v45  ;;  %v1852_v37 = vrot.slane %v1850_v3, 1  ;;  %v1630_v55 = vmul.f32 %v1598_v63, %v6969_v9  ;;  %v1631_v21 = vmul.f32 %v1599_v61, %v8716_v1  ;;  %v8719_v9 = vld [vmem:[#allocation8_spill] sm:$0xff]  ;;  %v8726_v52 = vld [vmem:[#allocation15_spill] sm:$0xff] }
 0x2bd   : > { %v1648_v25 = vpack.c.bf16 %v1621_v19, %v1620_v8  ;;  %v1681_v28 = vshrl.u32 %v1646_v31, 16  ;;  %v1632_v54 = vmul.f32 %v7166_v10, %v8717_v53  ;;  %v1857_v29 = vrot.slane %v1855_v16, 1 }
 0x2be   : > { %v1870_v49 = vsel %vm1838_vm8, %v1865_v32, %v1869_v5  ;;  %v1853_v6 = vor.u32 %v1852_v37, %v1848_v57  ;;  %v1633_v39 = vmul.f32 %v7168_v62, %v8718_v44  ;;  %v1634_v63 = vmul.f32 %v7170_v11, %v8719_v9  ;;  %v8721_v62 = vld [vmem:[#allocation10_spill] sm:$0xff]  ;;  %v8722_v11 = vld [vmem:[#allocation11_spill] sm:$0xff] }
 0x2bf   : > { %2031 = vrot.lane.b32.xlu1 %v1870_v49, %s6583_s29  ;;  %v1647_v61 = vpack.c.bf16 %v1619_v7, %v1618_v59  ;;  %v1674_v18 = vshrl.u32 %v1645_v48, 16  ;;  %v1635_v10 = vmul.f32 %v7172_v13, %v8720_v12  ;;  %v2096_v30 = vrot.slane %v7210_v60, 1  ;;  %v8723_v7 = vld [vmem:[#allocation12_spill] sm:$0xff]  ;;  %v8724_v13 = vld [vmem:[#allocation13_spill] sm:$0xff] }
 0x2c0   : > { %v1858_v40 = vsel %vm1838_vm8, %v1853_v6, %v1857_v29  ;;  %v2097_v46 = vrot.slane %v7201_v15, 1  ;;  %v1636_v36 = vmul.f32 %v7174_v14, %v8721_v62  ;;  %v1637_v4 = vmul.f32 %v7182_v26, %v8722_v11 }
 0x2c1   : > { %2029 = vrot.lane.b32.xlu0 %v1858_v40, %s6583_s29  ;;  %v1695_v27 = vshrl.u32 %v1648_v25, 16  ;;  %v1683_v59 = vrot.slane %v1681_v28, 7  ;;  %v7261_v8 = vmul.f32 %v7184_v42, %v8723_v7  ;;  %v7265_v19 = vmul.f32 %v7186_v38, %v8724_v13 }
 0x2c2   : > { %v7269_v15 = vmul.f32 %v7188_v24, %v8725_v23  ;;  %v2098_v14 = vsel %vm2090_vm9, %v2096_v30, %v2097_v46  ;;  %v1650_v50 = vpack.c.bf16 %v1625_v2, %v1624_v34  ;;  %v1684_v26 = vshll.u32 %v1646_v31, 16 }
 0x2c3   : > { %v1688_v51 = vshrl.u32 %v1647_v61, 16  ;;  %2142 = vrot.lane.b32.xlu1 %v2098_v14, %s6584_s30  ;;  %v1676_v45 = vrot.slane %v1674_v18, 7  ;;  %v7275_v42 = vmul.f32 %v7190_v58, %v8726_v52  ;;  %v1649_v3 = vpack.c.bf16 %v1623_v33, %v1622_v20 }
 0x2c4   : > { %v7277_v38 = vpack.c.bf16 %v1627_v47, %v1626_v41  ;;  %v2093_v16 = vrot.slane %v7224_v43, 1  ;;  %v1677_v24 = vshll.u32 %v1645_v48, 16  ;;  %v1697_v32 = vrot.slane %v1695_v27, 7 }
 0x2c5   : > { %v2094_v5 = vrot.slane %v7214_v22, 1  ;;  %v1686_v34 = vor.u32 %v1684_v26, %v1683_v59  ;;  %v7281_v2 = vpack.c.bf16 %v1629_v17, %v1628_v56  ;;  %v7283_v31 = vpack.c.bf16 %v1631_v21, %v1630_v55 }
 0x2c6   : > { %v7285_v57 = vpack.c.bf16 %v1633_v39, %v1632_v54  ;;  %v1698_v37 = vshll.u32 %v1648_v25, 16  ;;  %v1709_v1 = vshrl.u32 %v1650_v50, 16  ;;  %v1690_v58 = vrot.slane %v1688_v51, 7 }
 0x2c7   : > { %v2095_v20 = vsel %vm2090_vm9, %v2093_v16, %v2094_v5  ;;  %v1679_v33 = vor.u32 %v1677_v24, %v1676_v45  ;;  %v7288_v41 = vpack.c.bf16 %v1635_v10, %v1634_v63  ;;  %v7290_v47 = vpack.c.bf16 %v1637_v4, %v1636_v36 }
 0x2c8   : > { %v1691_v48 = vshll.u32 %v1647_v61, 16  ;;  %v1702_v28 = vshrl.u32 %v1649_v3, 16  ;;  %2140 = vrot.lane.b32.xlu0 %v2095_v20, %s6584_s30  ;;  %v1705_v22 = vshll.u32 %v1649_v3, 16  ;;  %v1700_v56 = vor.u32 %v1698_v37, %v1697_v32 }
 0x2c9   : > { %v7295_v17 = vsel %vm7178_vm7, 0, %v1686_v34  ;;  %v1825_v55 = vsel %vm7178_vm7, %v1683_v59, 0  ;;  %v1712_v21 = vshll.u32 %v1650_v50, 16  ;;  %v1716_v25 = vshrl.u32 %v7277_v38, 16 }
 0x2ca   : > { %v1886_v53 = vshll.u32 %v7295_v17, 16  ;;  %v1891_v54 = vshll.u32 %v1825_v55, 16  ;;  %v1719_v49 = vshll.u32 %v7277_v38, 16  ;;  %v1711_v6 = vrot.slane %v1709_v1, 7 }
 0x2cb   : > { %v1693_v29 = vor.u32 %v1691_v48, %v1690_v58  ;;  %v7304_v44 = vsel %vm7178_vm7, 0, %v1679_v33  ;;  %v1723_v39 = vshrl.u32 %v7281_v2, 16  ;;  %v1726_v9 = vshll.u32 %v7281_v2, 16 }
 0x2cc   : > { %v1884_v63 = vshrl.u32 %v7295_v17, 16  ;;  %v1888_v61 = vrot.slane %v1886_v53, 1  ;;  %v1730_v18 = vshrl.u32 %v7283_v31, 16  ;;  %v1737_v12 = vshrl.u32 %v7285_v57, 16 }
 0x2cd   : > { %v1704_v10 = vrot.slane %v1702_v28, 7  ;;  %v7313_v40 = vsel %vm7178_vm7, 0, %v1700_v56  ;;  %v1893_v46 = vrot.slane %v1891_v54, 1  ;;  %v1824_v62 = vsel %vm7178_vm7, %v1676_v45, 0 }
 0x2ce   : > { %v1889_v30 = vor.u32 %v1888_v61, %v1884_v63  ;;  %v1874_v36 = vshll.u32 %v7304_v44, 16  ;;  %v1714_v11 = vor.u32 %v1712_v21, %v1711_v6  ;;  %v7320_v4 = vsel %vm7178_vm7, 0, %v1693_v29 }
 0x2cf   : > { %v1872_v27 = vshrl.u32 %v7304_v44, 16  ;;  %v1879_v59 = vshll.u32 %v1824_v62, 16  ;;  %v2102_v23 = vrot.slane %v7295_v17, 1  ;;  %v1827_v14 = vsel %vm7178_vm7, %v1697_v32, 0 }
 0x2d0   : > { %v1894_v7 = vsel %vm1838_vm8, %v1889_v30, %v1893_v46  ;;  %v1876_v13 = vrot.slane %v1874_v36, 1  ;;  %v7327_v50 = vrot.slane %v1716_v25, 7  ;;  %v7329_v26 = vrot.slane %v1723_v39, 7 }
 0x2d1   : > { %v1707_v51 = vor.u32 %v1705_v22, %v1704_v10  ;;  %2035 = vrot.lane.b32.xlu1 %v1894_v7, %s6583_s29  ;;  %v1910_v45 = vshll.u32 %v7313_v40, 16  ;;  %v1881_v3 = vrot.slane %v1879_v59, 1  ;;  %v2103_v38 = vrot.slane %v1825_v55, 1 }
 0x2d2   : > { %v1877_v52 = vor.u32 %v1876_v13, %v1872_v27  ;;  %v1915_v16 = vshll.u32 %v1827_v14, 16  ;;  %v1908_v24 = vshrl.u32 %v7313_v40, 16  ;;  %v1826_v34 = vsel %vm7178_vm7, %v1690_v58, 0 }
 0x2d3   : > { %v1912_v5 = vrot.slane %v1910_v45, 1  ;;  %v1898_v32 = vshll.u32 %v7320_v4, 16  ;;  %v7339_v2 = vsel %vm7178_vm7, 0, %v1714_v11  ;;  %v2104_v1 = vsel %vm2090_vm9, %v2102_v23, %v2103_v38 }
 0x2d4   : > { %v1882_v37 = vsel %vm1838_vm8, %v1877_v52, %v1881_v3  ;;  %v2099_v20 = vrot.slane %v7304_v44, 1  ;;  %v1728_v33 = vor.u32 %v1726_v9, %v7329_v26  ;;  %v7347_v48 = vsel %vm7178_vm7, 0, %v1707_v51 }
 0x2d5   : > { %2033 = vrot.lane.b32.xlu0 %v1882_v37, %s6583_s29  ;;  %2146 = vrot.lane.b32.xlu1 %v2104_v1, %s6584_s30  ;;  %v1913_v58 = vor.u32 %v1912_v5, %v1908_v24  ;;  %v1900_v28 = vrot.slane %v1898_v32, 1  ;;  %v2100_v22 = vrot.slane %v1824_v62, 1  ;;  %v1917_v56 = vrot.slane %v1915_v16, 1 }
 0x2d6   : > { %v1896_v55 = vshrl.u32 %v7320_v4, 16  ;;  %v1903_v21 = vshll.u32 %v1826_v34, 16  ;;  %v7352_v25 = vrot.slane %v1737_v12, 7  ;;  %v2108_v53 = vrot.slane %v7313_v40, 1 }
 0x2d7   : > { %v1829_v54 = vsel %vm7178_vm7, %v1711_v6, 0  ;;  %v1934_v29 = vshll.u32 %v7339_v2, 16  ;;  %v2101_v39 = vsel %vm2090_vm9, %v2099_v20, %v2100_v22  ;;  %v1918_v9 = vsel %vm1838_vm8, %v1913_v58, %v1917_v56 }
 0x2d8   : > { %v1901_v63 = vor.u32 %v1900_v28, %v1896_v55  ;;  %v1922_v61 = vshll.u32 %v7347_v48, 16  ;;  %v1721_v30 = vor.u32 %v1719_v49, %v7327_v50  ;;  %v7364_v12 = vsel %vm7178_vm7, 0, %v1728_v33 }
 0x2d9   : > { %2144 = vrot.lane.b32.xlu0 %v2101_v39, %s6584_s30  ;;  %2039 = vrot.lane.b32.xlu1 %v1918_v9, %s6583_s29  ;;  %v2109_v6 = vrot.slane %v1827_v14, 1  ;;  %v1936_v46 = vrot.slane %v1934_v29, 1  ;;  %v1740_v62 = vshll.u32 %v7285_v57, 16  ;;  %v1905_v36 = vrot.slane %v1903_v21, 1 }
 0x2da   : > { %v1932_v11 = vshrl.u32 %v7339_v2, 16  ;;  %v1939_v27 = vshll.u32 %v1829_v54, 16  ;;  %v1751_v59 = vshrl.u32 %v7290_v47, 16  ;;  %v2105_v7 = vrot.slane %v7320_v4, 1 }
 0x2db   : > { %v2110_v49 = vsel %vm2090_vm9, %v2108_v53, %v2109_v6  ;;  %v1828_v13 = vsel %vm7178_vm7, %v1704_v10, 0  ;;  %v1906_v23 = vsel %vm1838_vm8, %v1901_v63, %v1905_v36  ;;  %v1924_v14 = vrot.slane %v1922_v61, 1 }
 0x2dc   : > { %v1937_v51 = vor.u32 %v1936_v46, %v1932_v11  ;;  %v1958_v45 = vshll.u32 %v7364_v12, 16  ;;  %v7379_v57 = vrot.slane %v1730_v18, 7  ;;  %v1742_v52 = vor.u32 %v1740_v62, %v7352_v25 }
 0x2dd   : > { %v7384_v3 = vsel %vm7178_vm7, 0, %v1721_v30  ;;  %2037 = vrot.lane.b32.xlu0 %v1906_v23, %s6583_s29  ;;  %2150 = vrot.lane.b32.xlu1 %v2110_v49, %s6584_s30  ;;  %v2106_v10 = vrot.slane %v1826_v34, 1  ;;  %v1733_v38 = vshll.u32 %v7283_v31, 16  ;;  %v1941_v16 = vrot.slane %v1939_v27, 1 }
 0x2de   : > { %v1920_v24 = vshrl.u32 %v7347_v48, 16  ;;  %v1927_v5 = vshll.u32 %v1828_v13, 16  ;;  %v1744_v18 = vshrl.u32 %v7288_v41, 16  ;;  %v2114_v37 = vrot.slane %v7339_v2, 1 }
 0x2df   : > { %v2107_v32 = vsel %vm2090_vm9, %v2105_v7, %v2106_v10  ;;  %v1831_v1 = vsel %vm7178_vm7, %v7329_v26, 0  ;;  %v1942_v20 = vsel %vm1838_vm8, %v1937_v51, %v1941_v16  ;;  %v1960_v34 = vrot.slane %v1958_v45, 1 }
 0x2e0   : > { %v1925_v33 = vor.u32 %v1924_v14, %v1920_v24  ;;  %v1946_v31 = vshll.u32 %v7384_v3, 16  ;;  %v7398_v58 = vrot.slane %v1751_v59, 7  ;;  %v1735_v28 = vor.u32 %v1733_v38, %v7379_v57 }
 0x2e1   : > { %v7403_v22 = vsel %vm7178_vm7, 0, %v1742_v52  ;;  %2148 = vrot.lane.b32.xlu0 %v2107_v32, %s6584_s30  ;;  %2043 = vrot.lane.b32.xlu1 %v1942_v20, %s6583_s29  ;;  %v2115_v56 = vrot.slane %v1829_v54, 1  ;;  %v7409_v26 = vpack.c.bf16 %v7265_v19, %v7261_v8  ;;  %v1929_v55 = vrot.slane %v1927_v5, 1 }
 0x2e2   : > { %v1956_v21 = vshrl.u32 %v7364_v12, 16  ;;  %v1963_v53 = vshll.u32 %v1831_v1, 16  ;;  %v1754_v29 = vshll.u32 %v7290_v47, 16  ;;  %v2111_v9 = vrot.slane %v7347_v48, 1 }
 0x2e3   : > { %v2116_v39 = vsel %vm2090_vm9, %v2114_v37, %v2115_v56  ;;  %v1830_v63 = vsel %vm7178_vm7, %v7327_v50, 0  ;;  %v1930_v54 = vsel %vm1838_vm8, %v1925_v33, %v1929_v55  ;;  %v1948_v30 = vrot.slane %v1946_v31, 1 }
 0x2e4   : > { %v1961_v61 = vor.u32 %v1960_v34, %v1956_v21  ;;  %v1982_v8 = vshll.u32 %v7403_v22, 16  ;;  %v1746_v19 = vrot.slane %v1744_v18, 7  ;;  %v1756_v6 = vor.u32 %v1754_v29, %v7398_v58 }
 0x2e5   : > { %v7423_v47 = vsel %vm7178_vm7, 0, %v1735_v28  ;;  %2041 = vrot.lane.b32.xlu0 %v1930_v54, %s6583_s29  ;;  %2154 = vrot.lane.b32.xlu1 %v2116_v39, %s6584_s30  ;;  %v2112_v46 = vrot.slane %v1828_v13, 1  ;;  %v1658_v50 = vpack.c.bf16 %v7275_v42, %v7269_v15  ;;  %v1965_v62 = vrot.slane %v1963_v53, 1 }
 0x2e6   : > { %v1944_v36 = vshrl.u32 %v7384_v3, 16  ;;  %v1951_v11 = vshll.u32 %v1830_v63, 16  ;;  %v1747_v27 = vshll.u32 %v7288_v41, 16  ;;  %v2120_v49 = vrot.slane %v7364_v12, 1 }
 0x2e7   : > { %v2113_v59 = vsel %vm2090_vm9, %v2111_v9, %v2112_v46  ;;  %v1833_v7 = vsel %vm7178_vm7, %v7352_v25, 0  ;;  %v1966_v23 = vsel %vm1838_vm8, %v1961_v61, %v1965_v62  ;;  %v1984_v51 = vrot.slane %v1982_v8, 1 }
 0x2e8   : > { %v1949_v13 = vor.u32 %v1948_v30, %v1944_v36  ;;  %v1970_v15 = vshll.u32 %v7423_v47, 16  ;;  %v1758_v42 = vshrl.u32 %v7409_v26, 16  ;;  %v1749_v14 = vor.u32 %v1747_v27, %v1746_v19 }
 0x2e9   : > { %v7441_v41 = vsel %vm7178_vm7, 0, %v1756_v6  ;;  %2152 = vrot.lane.b32.xlu0 %v2113_v59, %s6584_s30  ;;  %2047 = vrot.lane.b32.xlu1 %v1966_v23, %s6583_s29  ;;  %v2121_v45 = vrot.slane %v1831_v1, 1  ;;  %v1953_v52 = vrot.slane %v1951_v11, 1  ;;  %v1980_v25 = vshrl.u32 %v7403_v22, 16 }
 0x2ea   : > { %v1987_v10 = vshll.u32 %v1833_v7, 16  ;;  %v2117_v16 = vrot.slane %v7384_v3, 1  ;;  %v1832_v24 = vsel %vm7178_vm7, %v7379_v57, 0  ;;  %v1972_v32 = vrot.slane %v1970_v15, 1 }
 0x2eb   : > { %v2122_v38 = vsel %vm2090_vm9, %v2120_v49, %v2121_v45  ;;  %v1954_v5 = vsel %vm1838_vm8, %v1949_v13, %v1953_v52  ;;  %v1985_v18 = vor.u32 %v1984_v51, %v1980_v25  ;;  %v2006_v37 = vshll.u32 %v7441_v41, 16 }
 0x2ec   : > { %v1765_v20 = vshrl.u32 %v1658_v50, 16  ;;  %v1760_v1 = vrot.slane %v1758_v42, 7  ;;  %v7455_v33 = vsel %vm7178_vm7, 0, %v1749_v14  ;;  %v2118_v34 = vrot.slane %v1830_v63, 1 }
 0x2ed   : > { %2045 = vrot.lane.b32.xlu0 %v1954_v5, %s6583_s29  ;;  %2158 = vrot.lane.b32.xlu1 %v2122_v38, %s6584_s30  ;;  %v1989_v31 = vrot.slane %v1987_v10, 1  ;;  %v1968_v57 = vshrl.u32 %v7423_v47, 16  ;;  %v1975_v28 = vshll.u32 %v1832_v24, 16  ;;  %v1761_v56 = vshll.u32 %v7409_v26, 16 }
 0x2ee   : > { %v2119_v55 = vsel %vm2090_vm9, %v2117_v16, %v2118_v34  ;;  %v2126_v21 = vrot.slane %v7403_v22, 1  ;;  %v1835_v53 = vsel %vm7178_vm7, %v7398_v58, 0  ;;  %v2008_v9 = vrot.slane %v2006_v37, 1 }
 0x2ef   : > { %v1990_v29 = vsel %vm1838_vm8, %v1985_v18, %v1989_v31  ;;  %v1973_v39 = vor.u32 %v1972_v32, %v1968_v57  ;;  %v1994_v63 = vshll.u32 %v7455_v33, 16  ;;  %v1767_v54 = vrot.slane %v1765_v20, 7 }
 0x2f0   : > { %v1763_v61 = vor.u32 %v1761_v56, %v1760_v1  ;;  %v1977_v26 = vrot.slane %v1975_v28, 1  ;;  %v2127_v30 = vrot.slane %v1833_v7, 1  ;;  %v2004_v8 = vshrl.u32 %v7441_v41, 16 }
 0x2f1   : > { %2156 = vrot.lane.b32.xlu0 %v2119_v55, %s6584_s30  ;;  %2051 = vrot.lane.b32.xlu1 %v1990_v29, %s6583_s29  ;;  %v2011_v6 = vshll.u32 %v1835_v53, 16  ;;  %v1768_v46 = vshll.u32 %v1658_v50, 16  ;;  %v2123_v58 = vrot.slane %v7423_v47, 1  ;;  %v1834_v62 = vsel %vm7178_vm7, %v1746_v19, 0 }
 0x2f2   : > { %v1978_v36 = vsel %vm1838_vm8, %v1973_v39, %v1977_v26  ;;  %v2128_v11 = vsel %vm2090_vm9, %v2126_v21, %v2127_v30  ;;  %v2009_v27 = vor.u32 %v2008_v9, %v2004_v8  ;;  %v1996_v59 = vrot.slane %v1994_v63, 1 }
 0x2f3   : > { %v1770_v49 = vor.u32 %v1768_v46, %v1767_v54  ;;  %v7478_v23 = vsel %vm7178_vm7, 0, %v1763_v61  ;;  %v2124_v50 = vrot.slane %v1832_v24, 1  ;;  %v2013_v7 = vrot.slane %v2011_v6, 1 }
 0x2f4   : > { %v1992_v13 = vshrl.u32 %v7455_v33, 16  ;;  %v1999_v19 = vshll.u32 %v1834_v62, 16  ;;  %v2132_v51 = vrot.slane %v7441_v41, 1  ;;  %v2018_v45 = vshll.u32 %v7478_v23, 16 }
 0x2f5   : > { %2049 = vrot.lane.b32.xlu0 %v1978_v36, %s6583_s29  ;;  %2162 = vrot.lane.b32.xlu1 %v2128_v11, %s6584_s30  ;;  %v2125_v15 = vsel %vm2090_vm9, %v2123_v58, %v2124_v50  ;;  %v2014_v42 = vsel %vm1838_vm8, %v2009_v27, %v2013_v7  ;;  %v7489_v52 = vsel %vm7178_vm7, 0, %v1770_v49  ;;  %v2133_v25 = vrot.slane %v1835_v53, 1  ;;  %v6286_v7 = vld [vmem:[%s8712_s0 + $0x8] sm:$0xff]  }
 0x2f6   : > { %v1997_v14 = vor.u32 %v1996_v59, %v1992_v13  ;;  %v2001_v10 = vrot.slane %v1999_v19, 1  ;;  %v2129_v16 = vrot.slane %v7455_v33, 1  ;;  %v1836_v24 = vsel %vm7178_vm7, %v1760_v1, 0  ;;  %v6288_v13 = vld [vmem:[%s8712_s0 + $0x18] sm:$0xff]  }
 0x2f7   : > { %v2134_v38 = vsel %vm2090_vm9, %v2132_v51, %v2133_v25  ;;  %v2135_v18 = vrot.slane %v7478_v23, 1  ;;  %v2020_v32 = vrot.slane %v2018_v45, 1  ;;  %v2250_v37 = vshll.u32 %v7489_v52, 16 }
 0x2f8   : > { %v2002_v5 = vsel %vm1838_vm8, %v1997_v14, %v2001_v10  ;;  %v2130_v20 = vrot.slane %v1834_v62, 1  ;;  %v2136_v34 = vrot.slane %v1836_v24, 1  ;;  %v2016_v31 = vshrl.u32 %v7478_v23, 16 }
 0x2f9   : > { %2160 = vrot.lane.b32.xlu0 %v2125_v15, %s6584_s30  ;;  %2055 = vrot.lane.b32.xlu1 %v2014_v42, %s6583_s29  ;;  %v2023_v57 = vshll.u32 %v1836_v24, 16  ;;  %v1837_v1 = vsel %vm7178_vm7, %v1767_v54, 0  ;;  %v2263_v21 = vrot.slane %v7489_v52, 1  ;;  %v2252_v53 = vrot.slane %v2250_v37, 1 }
 0x2fa   : > { %v2131_v28 = vsel %vm2090_vm9, %v2129_v16, %v2130_v20  ;;  %v2137_v56 = vsel %vm2090_vm9, %v2135_v18, %v2136_v34  ;;  %v2021_v55 = vor.u32 %v2020_v32, %v2016_v31  ;;  %v2264_v39 = vrot.slane %v1837_v1, 1  ;;  %v7571_v16 = vld [vmem:[%s8712_s0 + $0x60] sm:$0xff]  }
 0x2fb   : > { %v2025_v29 = vrot.slane %v2023_v57, 1  ;;  %v2248_v9 = vshrl.u32 %v7489_v52, 16  ;;  %v2255_v63 = vshll.u32 %v1837_v1, 16  ;;  %v8727_v30 = vmov 0  }
 0x2fc   : > { %v2265_v26 = vsel %vm2090_vm9, %v2263_v21, %v2264_v39  ;;  %v7514_v8 = vrot.slane %v8727_v30, 1 }
 0x2fd   : > { %2053 = vrot.lane.b32.xlu0 %v2002_v5, %s6583_s29  ;;  %2166 = vrot.lane.b32.xlu1 %v2134_v38, %s6584_s30  ;;  %v2026_v61 = vsel %vm1838_vm8, %v2021_v55, %v2025_v29  ;;  %v2253_v54 = vor.u32 %v2252_v53, %v2248_v9  ;;  %v2257_v6 = vrot.slane %v2255_v63, 1  ;;  %v6290_v38 = vld [vmem:[%s8712_s0 + $0x28] sm:$0xff]  }
 0x2ff   : > { %v2258_v46 = vsel %vm1838_vm8, %v2253_v54, %v2257_v6 }
 0x301   : > { %2164 = vrot.lane.b32.xlu0 %v2131_v28, %s6584_s30  ;;  %2168 = vrot.lane.b32.xlu1 %v2137_v56, %s6584_s30 }
 0x305   : > { %2057 = vrot.lane.b32.xlu0 %v2026_v61, %s6583_s29  ;;  %2266 = vrot.lane.b32.xlu1 %v2265_v26, %s6584_s30 }
 0x309   : > { %2259 = vrot.lane.b32.xlu0 %v2258_v46, %s6583_s29  ;;  %2138 = vrot.lane.b32.xlu1 %v7514_v8, %s6584_s30 }
 0x30d   : > { %2027 = vrot.lane.b32.xlu0 %v7514_v8, %s6583_s29 }
 0x331   : > { %v2032_v58 = vpop.permute.xlu1 %2031 }
 0x332   : > { %v2175_v11 = vsel %vm821_vm2, %v7210_v60, %v2032_v58  ;;  %v6287_v60 = vld [vmem:[%s8712_s0 + $0x10] sm:$0xff]  }
 0x333   : > { %v2030_v62 = vpop.permute.xlu0 %2029 }
 0x334   : > { %v2173_v27 = vsel %vm821_vm2, %v7224_v43, %v2030_v62 }
 0x335   : > { %v2143_v36 = vpop.permute.xlu1 %2142 }
 0x336   : > { %v7529_v59 = vsel %vm2202_vm10, %v2175_v11, %v2143_v36 }
 0x33a   : > { %v2141_v49 = vpop.permute.xlu0 %2140 }
 0x33b   : > { %v7532_v50 = vsel %vm2202_vm10, %v2173_v27, %v2141_v49 }
 0x33c   : > { %5831 = vmatprep.mubr.msk.bf16.mxu1 %vm2321_vm11, %v7532_v50 }
 0x33d   : > { %5832 = vmatmul.mubr.msk.bf16.vlgmr.msra.gmra.mrb[0].mxu1 %vm2321_vm11, %v7529_v59 }
 0x33e   : > { %5864 = vmatpush3.bf16.msra.mxu1 %v7238_v35  ;;  %v6289_v35 = vld [vmem:[%s8712_s0 + $0x20] sm:$0xff]  }
 0x33f   : > { %5865 = vmatprep.subr.bf16.mxu1 %v6286_v7 }
 0x342   : > { %5866 = vmatpush3.bf16.msra.mxu1 %v6286_v7 }
 0x343   : > { %v2036_v43 = vpop.permute.xlu1 %2035  ;;  %5867 = vmatprep.subr.bf16.mxu1 %v6287_v60 }
 0x344   : > { %v2179_v15 = vsel %vm821_vm2, %v7295_v17, %v2036_v43 }
 0x346   : > { %5868 = vmatpush3.bf16.msra.mxu1 %v6287_v60 }
 0x347   : > { %v2034_v19 = vpop.permute.xlu0 %2033  ;;  %v2147_v51 = vpop.permute.xlu1 %2146  ;;  %5869 = vmatprep.subr.bf16.mxu1 %v6288_v13 }
 0x348   : > { %v2177_v42 = vsel %vm821_vm2, %v7304_v44, %v2034_v19  ;;  %v7556_v14 = vsel %vm2202_vm10, %v2179_v15, %v2147_v51 }
 0x34a   : > { %5870 = vmatpush3.bf16.msra.mxu1 %v6288_v13 }
 0x34b   : > { %v2145_v45 = vpop.permute.xlu0 %2144  ;;  %v2040_v25 = vpop.permute.xlu1 %2039  ;;  %5871 = vmatprep.subr.bf16.mxu1 %v6289_v35 }
 0x34c   : > { %v7559_v10 = vsel %vm2202_vm10, %v2177_v42, %v2145_v45  ;;  %v2183_v24 = vsel %vm821_vm2, %v7313_v40, %v2040_v25  ;;  %v6294_v42 = vld [vmem:[%s8712_s0 + $0x78] sm:$0xff]   ;;  %v6296_v45 = vld [vmem:[%s8712_s0 + $0x88] sm:$0xff]   ;;  %v7733_v25 = vld [vmem:[%s8660_s3] ss:$0 sm:$0xff] }
 0x34d   : > { %5835 = vmatprep.mubr.msk.bf16.mxu1 %vm2321_vm11, %v7559_v10 }
 0x34e   : > { %5836 = vmatmul.mubr.msk.bf16.gmra.mrb[4].mxu1 %vm2321_vm11, %v7556_v14 }
 0x34f   : > { %v2038_v17 = vpop.permute.xlu0 %2037  ;;  %v2151_v44 = vpop.permute.xlu1 %2150  ;;  %5872 = vmatpush3.bf16.msra.mxu1 %v6289_v35 }
 0x350   : > { %5873 = vmatprep.subr.bf16.mxu1 %v6290_v38  ;;  %v2181_v5 = vsel %vm821_vm2, %v7320_v4, %v2038_v17  ;;  %v7578_v18 = vsel %vm2202_vm10, %v2183_v24, %v2151_v44 }
 0x353   : > { %v2149_v32 = vpop.permute.xlu0 %2148  ;;  %v2044_v37 = vpop.permute.xlu1 %2043  ;;  %5874 = vmatpush3.bf16.msra.mxu1 %v6290_v38 }
 0x354   : > { %v7581_v20 = vsel %vm2202_vm10, %v2181_v5, %v2149_v32  ;;  %5907 = vmatprep.subr.bf16.mxu1 %v7571_v16  ;;  %v2187_v4 = vsel %vm821_vm2, %v7339_v2, %v2044_v37 }
 0x355   : > { %5839 = vmatprep.mubr.msk.bf16.mxu1 %vm2321_vm11, %v7581_v20 }
 0x356   : > { %5840 = vmatmul.mubr.msk.bf16.gmra.mrb[8].mxu1 %vm2321_vm11, %v7578_v18 }
 0x357   : > { %v2042_v40 = vpop.permute.xlu0 %2041  ;;  %v2155_v34 = vpop.permute.xlu1 %2154 }
 0x358   : > { %v2185_v31 = vsel %vm821_vm2, %v7347_v48, %v2042_v40  ;;  %v7593_v57 = vsel %vm2202_vm10, %v2187_v4, %v2155_v34 }
 0x35b   : > { %v2153_v28 = vpop.permute.xlu0 %2152  ;;  %v2048_v1 = vpop.permute.xlu1 %2047 }
 0x35c   : > { %v7596_v56 = vsel %vm2202_vm10, %v2185_v31, %v2153_v28  ;;  %v2191_v2 = vsel %vm821_vm2, %v7364_v12, %v2048_v1 }
 0x35d   : > { %5843 = vmatprep.mubr.msk.bf16.mxu1 %vm2321_vm11, %v7596_v56 }
 0x35e   : > { %5844 = vmatmul.mubr.msk.bf16.gmra.mrb[12].mxu1 %vm2321_vm11, %v7593_v57 }
 0x35f   : > { %v2046_v55 = vpop.permute.xlu0 %2045  ;;  %v2159_v21 = vpop.permute.xlu1 %2158 }
 0x360   : > { %v2189_v48 = vsel %vm821_vm2, %v7384_v3, %v2046_v55  ;;  %v7607_v53 = vsel %vm2202_vm10, %v2191_v2, %v2159_v21 }
 0x363   : > { %v2157_v29 = vpop.permute.xlu0 %2156  ;;  %v2052_v39 = vpop.permute.xlu1 %2051 }
 0x364   : > { %v7610_v9 = vsel %vm2202_vm10, %v2189_v48, %v2157_v29  ;;  %v2195_v12 = vsel %vm821_vm2, %v7403_v22, %v2052_v39 }
 0x365   : > { %5847 = vmatprep.mubr.msk.bf16.mxu1 %vm2321_vm11, %v7610_v9 }
 0x366   : > { %5848 = vmatmul.mubr.msk.bf16.gmra.mrb[16].mxu1 %vm2321_vm11, %v7607_v53 }
 0x367   : > { %v2050_v63 = vpop.permute.xlu0 %2049  ;;  %v2163_v61 = vpop.permute.xlu1 %2162 }
 0x368   : > { %v2193_v3 = vsel %vm821_vm2, %v7423_v47, %v2050_v63  ;;  %v7621_v26 = vsel %vm2202_vm10, %v2195_v12, %v2163_v61 }
 0x36b   : > { %v2161_v54 = vpop.permute.xlu0 %2160  ;;  %v2056_v30 = vpop.permute.xlu1 %2055 }
 0x36c   : > { %v7624_v6 = vsel %vm2202_vm10, %v2193_v3, %v2161_v54  ;;  %v2199_v22 = vsel %vm821_vm2, %v7441_v41, %v2056_v30 }
 0x36d   : > { %5851 = vmatprep.mubr.msk.bf16.mxu1 %vm2321_vm11, %v7624_v6 }
 0x36e   : > { %5852 = vmatmul.mubr.msk.bf16.gmra.mrb[20].mxu1 %vm2321_vm11, %v7621_v26 }
 0x36f   : > { %v2054_v46 = vpop.permute.xlu0 %2053  ;;  %v2167_v58 = vpop.permute.xlu1 %2166 }
 0x370   : > { %v2197_v47 = vsel %vm821_vm2, %v7455_v33, %v2054_v46  ;;  %v7635_v62 = vsel %vm2202_vm10, %v2199_v22, %v2167_v58 }
 0x373   : > { %v2165_v36 = vpop.permute.xlu0 %2164  ;;  %v2169_v27 = vpop.permute.xlu1 %2168 }
 0x374   : > { %v2230_v11 = vsel %vm2202_vm10, %v2197_v47, %v2165_v36  ;;  %v6299_v47 = vld [vmem:[%s8661_s4 + $0x28] sm:$0xff]  }
 0x375   : > { %5855 = vmatprep.mubr.msk.bf16.mxu1 %vm2321_vm11, %v2230_v11 }
 0x376   : > { %5856 = vmatmul.mubr.msk.bf16.gmra.mrb[24].mxu1 %vm2321_vm11, %v7635_v62 }
 0x377   : > { %v2058_v49 = vpop.permute.xlu0 %2057  ;;  %v2267_v33 = vpop.permute.xlu1 %2266 }
 0x378   : > { %v2201_v7 = vsel %vm821_vm2, %v7478_v23, %v2058_v49  ;;  %v6292_v23 = vld [vmem:[%s8712_s0 + $0x68] sm:$0xff]  }
 0x379   : > { %v2234_v41 = vsel %vm2202_vm10, %v2201_v7, %v2169_v27 }
 0x37a   : > { %5859 = vmatprep.mubr.msk.bf16.mxu1 %vm2321_vm11, %v2234_v41 }
 0x37b   : > { %v2260_v60 = vpop.permute.xlu0 %2259  ;;  %v2139_v19 = vpop.permute.xlu1 %2138 }
 0x37c   : > { %v2269_v43 = vsel %vm821_vm2, %v7489_v52, %v2260_v60  ;;  %v6293_v52 = vld [vmem:[%s8712_s0 + $0x70] sm:$0xff]  }
 0x37d   : > { %v2271_v13 = vsel %vm2202_vm10, %v2269_v43, %v2267_v33 }
 0x37e   : > { %5860 = vmatmul.mubr.msk.bf16.gmra.mrb[28].mxu1 %vm2321_vm11, %v2271_v13 }
 0x37f   : > { %v2028_v51 = vpop.permute.xlu0 %2027 }
 0x380   : > { %v2171_v35 = vsel %vm821_vm2, 0, %v2028_v51 }
 0x381   : > { %v2204_v15 = vsel %vm2202_vm10, %v2171_v35, %v2139_v19 }
 0x382   : > { %5875 = vmatprep.mubr.msk.bf16.mxu1 %vm2321_vm11, %v2204_v15 }
 0x386   : > { %5876 = vmatmul.mubr.msk.bf16.vlgmr.msra.gmra.mrb[0].mxu1 %vm2321_vm11, %v7532_v50  ;;  %v6295_v50 = vld [vmem:[%s8712_s0 + $0x80] sm:$0xff]  }
 0x387   : > { %5879 = vmatprep.mubr.msk.bf16.mxu1 %vm2321_vm11, %v7529_v59  ;;  %5908 = vmatpush3.bf16.msra.mxu1 %v7571_v16 }
 0x388   : > { %5909 = vmatprep.subr.bf16.mxu1 %v6292_v23 }
 0x38b   : > { %5910 = vmatpush3.bf16.msra.mxu1 %v6292_v23 }
 0x38c   : > { %5911 = vmatprep.subr.bf16.mxu1 %v6293_v52 }
 0x38e   : > { %5880 = vmatmul.mubr.msk.bf16.gmra.mrb[4].mxu1 %vm2321_vm11, %v7559_v10 }
 0x38f   : > { %5883 = vmatprep.mubr.msk.bf16.mxu1 %vm2321_vm11, %v7556_v14  ;;  %5912 = vmatpush3.bf16.msra.mxu1 %v6293_v52 }
 0x390   : > { %5913 = vmatprep.subr.bf16.mxu1 %v6294_v42 }
 0x393   : > { %5914 = vmatpush3.bf16.msra.mxu1 %v6294_v42 }
 0x394   : > { %5915 = vmatprep.subr.bf16.mxu1 %v6295_v50 }
 0x396   : > { %5884 = vmatmul.mubr.msk.bf16.gmra.mrb[8].mxu1 %vm2321_vm11, %v7581_v20 }
 0x397   : > { %5887 = vmatprep.mubr.msk.bf16.mxu1 %vm2321_vm11, %v7578_v18  ;;  %5916 = vmatpush3.bf16.msra.mxu1 %v6295_v50 }
 0x398   : > { %5917 = vmatprep.subr.bf16.mxu1 %v6296_v45 }
 0x39b   : > { %5918 = vmatpush3.bf16.msra.mxu1 %v6296_v45 }
 0x39e   : > { %5888 = vmatmul.mubr.msk.bf16.gmra.mrb[12].mxu1 %vm2321_vm11, %v7596_v56 }
 0x39f   : > { %5891 = vmatprep.mubr.msk.bf16.mxu1 %vm2321_vm11, %v7593_v57 }
 0x3a6   : > { %5892 = vmatmul.mubr.msk.bf16.gmra.mrb[16].mxu1 %vm2321_vm11, %v7610_v9 }
 0x3a7   : > { %5895 = vmatprep.mubr.msk.bf16.mxu1 %vm2321_vm11, %v7607_v53 }
 0x3ae   : > { %5896 = vmatmul.mubr.msk.bf16.gmra.mrb[20].mxu1 %vm2321_vm11, %v7624_v6 }
 0x3af   : > { %5899 = vmatprep.mubr.msk.bf16.mxu1 %vm2321_vm11, %v7621_v26 }
 0x3b6   : > { %5900 = vmatmul.mubr.msk.bf16.gmra.mrb[24].mxu1 %vm2321_vm11, %v2230_v11 }
 0x3b7   : > { %5903 = vmatprep.mubr.msk.bf16.mxu1 %vm2321_vm11, %v7635_v62 }
 0x3be   : > { %5904 = vmatmul.mubr.msk.bf16.gmra.mrb[28].mxu1 %vm2321_vm11, %v2234_v41 }
 0x3bf   : > { %5919 = vmatprep.mubr.msk.bf16.mxu1 %vm2321_vm11, %v7529_v59  ;;  %v6297_v59 = vld [vmem:[%s8661_s4 + $0x18] sm:$0xff]  }
 0x3c0   : > { %5951 = vmatprep.subr.bf16.mxu0 %v6297_v59 }
 0x3c1   : > { %5952 = vmatpush3.bf16.msra.mxu0 %v6297_v59 }
 0x3c6   : > { %5920 = vmatmul.mubr.msk.bf16.vlgmr.msra.gmra.mrb[0].mxu1 %vm2321_vm11, %v7559_v10 }
 0x3c7   : > { %5923 = vmatprep.mubr.msk.bf16.mxu1 %vm2321_vm11, %v7556_v14  ;;  %v6298_v14 = vld [vmem:[%s8661_s4 + $0x20] sm:$0xff]  }
 0x3c8   : > { %5953 = vmatprep.subr.bf16.mxu0 %v6298_v14 }
 0x3c9   : > { %5954 = vmatpush3.bf16.msra.mxu0 %v6298_v14 }
 0x3ca   : > { %5955 = vmatprep.subr.bf16.mxu0 %v6299_v47 }
 0x3cd   : > { %5956 = vmatpush3.bf16.msra.mxu0 %v6299_v47 }
 0x3ce   : > { %5924 = vmatmul.mubr.msk.bf16.gmra.mrb[4].mxu1 %vm2321_vm11, %v7581_v20 }
 0x3cf   : > { %5927 = vmatprep.mubr.msk.bf16.mxu1 %vm2321_vm11, %v7578_v18 }
 0x3d6   : > { %5928 = vmatmul.mubr.msk.bf16.gmra.mrb[8].mxu1 %vm2321_vm11, %v7596_v56 }
 0x3d7   : > { %5931 = vmatprep.mubr.msk.bf16.mxu1 %vm2321_vm11, %v7593_v57 }
 0x3de   : > { %5932 = vmatmul.mubr.msk.bf16.gmra.mrb[12].mxu1 %vm2321_vm11, %v7610_v9 }
 0x3df   : > { %5935 = vmatprep.mubr.msk.bf16.mxu1 %vm2321_vm11, %v7607_v53 }
 0x3e6   : > { %5936 = vmatmul.mubr.msk.bf16.gmra.mrb[16].mxu1 %vm2321_vm11, %v7624_v6 }
 0x3e7   : > { %5939 = vmatprep.mubr.msk.bf16.mxu1 %vm2321_vm11, %v7621_v26 }
 0x3ee   : > { %5940 = vmatmul.mubr.msk.bf16.gmra.mrb[20].mxu1 %vm2321_vm11, %v2230_v11 }
 0x3ef   : > { %5943 = vmatprep.mubr.msk.bf16.mxu1 %vm2321_vm11, %v7635_v62 }
 0x3f6   : > { %5944 = vmatmul.mubr.msk.bf16.gmra.mrb[24].mxu1 %vm2321_vm11, %v2234_v41 }
 0x3f7   : > { %5947 = vmatprep.mubr.msk.bf16.mxu1 %vm2321_vm11, %v2271_v13 }
 0x3fe   : > { %5948 = vmatmul.mubr.msk.bf16.gmra.mrb[28].mxu1 %vm2321_vm11, %v2204_v15 }
 0x499   : > { %v5921_v10 = vpop.f32.mrb[0].mxu1 }
 0x49a   : > { %v2964_v38 = vadd.f32 %v5921_v10, %v7733_v25  ;;  %v2797_v17 = vpop.f32.mrb[1].mxu1 }
 0x49b   : > { %v2962_v44 = vadd.f32 %v7733_v25, %v2797_v17  ;;  %v5922_v16 = vpop.f32.mrb[2].mxu1 }
 0x49c   : > { %v2965_v24 = vadd.f32 %v5922_v16, %v7733_v25  ;;  %v2800_v5 = vpop.f32.mrb[3].mxu1  ;;  %v2996_v32 = vmax.f32 %v2964_v38, 0.0 }
 0x49d   : > { %v2963_v18 = vadd.f32 %v7733_v25, %v2800_v5  ;;  %v2994_v20 = vmax.f32 %v2962_v44, 0.0  ;;  %v7774_v44 = vld [vmem:[%s8661_s4] sm:$0xff]  }
 0x49e   : > { %v2997_v37 = vmax.f32 %v2965_v24, 0.0  ;;  %5989 = vmatprep.subr.bf16.mxu0 %v7774_v44 }
 0x49f   : > { %v2995_v40 = vmax.f32 %v2963_v18, 0.0 }
 0x4a0   : > { %v3028_v34 = vpack.c.bf16 %v2997_v37, %v2996_v32 }
 0x4a1   : > { %v3027_v4 = vpack.c.bf16 %v2995_v40, %v2994_v20  ;;  %v5925_v31 = vpop.f32.mrb[4].mxu1 }
 0x4a2   : > { %v3051_v57 = vshrl.u32 %v3028_v34, 16  ;;  %v2968_v28 = vadd.f32 %v5925_v31, %v7733_v25  ;;  %v2813_v1 = vpop.f32.mrb[5].mxu1  ;;  %v3054_v48 = vshll.u32 %v3028_v34, 16 }
 0x4a3   : > { %v3044_v56 = vshrl.u32 %v3027_v4, 16  ;;  %v2966_v55 = vadd.f32 %v7733_v25, %v2813_v1  ;;  %v5926_v21 = vpop.f32.mrb[6].mxu1  ;;  %v3047_v9 = vshll.u32 %v3027_v4, 16 }
 0x4a4   : > { %v3053_v2 = vrot.slane %v3051_v57, 7  ;;  %v2969_v53 = vadd.f32 %v5926_v21, %v7733_v25  ;;  %v2816_v29 = vpop.f32.mrb[7].mxu1  ;;  %v3000_v3 = vmax.f32 %v2968_v28, 0.0 }
 0x4a5   : > { %v3046_v39 = vrot.slane %v3044_v56, 7  ;;  %v2967_v63 = vadd.f32 %v7733_v25, %v2816_v29  ;;  %v2998_v30 = vmax.f32 %v2966_v55, 0.0 }
 0x4a6   : > { %v3056_v61 = vor.u32 %v3054_v48, %v3053_v2  ;;  %v7745_v12 = vsel %vm7178_vm7, %v3053_v2, 0  ;;  %v3001_v26 = vmax.f32 %v2969_v53, 0.0 }
 0x4a7   : > { %v3049_v54 = vor.u32 %v3047_v9, %v3046_v39  ;;  %v2999_v6 = vmax.f32 %v2967_v63, 0.0  ;;  %v3239_v22 = vshll.u32 %v7745_v12, 16  ;;  %v7757_v62 = vsel %vm7178_vm7, %v3046_v39, 0 }
 0x4a8   : > { %v7749_v46 = vsel %vm7178_vm7, 0, %v3056_v61  ;;  %v3030_v58 = vpack.c.bf16 %v3001_v26, %v3000_v3  ;;  %v3227_v52 = vshll.u32 %v7757_v62, 16  ;;  %v3465_v40 = vrot.slane %v7745_v12, 1 }
 0x4a9   : > { %v3029_v36 = vpack.c.bf16 %v2999_v6, %v2998_v30  ;;  %v5929_v11 = vpop.f32.mrb[8].mxu1  ;;  %v3234_v27 = vshll.u32 %v7749_v46, 16  ;;  %v7762_v49 = vsel %vm7178_vm7, 0, %v3049_v54  ;;  %v3232_v19 = vshrl.u32 %v7749_v46, 16 }
 0x4aa   : > { %v3065_v7 = vshrl.u32 %v3030_v58, 16  ;;  %v2972_v41 = vadd.f32 %v5929_v11, %v7733_v25  ;;  %v2829_v33 = vpop.f32.mrb[9].mxu1  ;;  %v3241_v23 = vrot.slane %v3239_v22, 1  ;;  %v3068_v14 = vshll.u32 %v3030_v58, 16 }
 0x4ab   : > { %v3058_v60 = vshrl.u32 %v3029_v36, 16  ;;  %v2970_v43 = vadd.f32 %v7733_v25, %v2829_v33  ;;  %v5930_v13 = vpop.f32.mrb[10].mxu1  ;;  %v3236_v51 = vrot.slane %v3234_v27, 1  ;;  %v3222_v17 = vshll.u32 %v7762_v49, 16 }
 0x4ac   : > { %v2973_v35 = vadd.f32 %v5930_v13, %v7733_v25  ;;  %v2832_v15 = vpop.f32.mrb[11].mxu1  ;;  %v3067_v42 = vrot.slane %v3065_v7, 7  ;;  %v3004_v10 = vmax.f32 %v2972_v41, 0.0  ;;  %v3061_v16 = vshll.u32 %v3029_v36, 16 }
 0x4ad   : > { %v3060_v50 = vrot.slane %v3058_v60, 7  ;;  %v2971_v45 = vadd.f32 %v7733_v25, %v2832_v15  ;;  %v3237_v59 = vor.u32 %v3236_v51, %v3232_v19  ;;  %v3002_v24 = vmax.f32 %v2970_v43, 0.0 }
 0x4ae   : > { %v3005_v38 = vmax.f32 %v2973_v35, 0.0  ;;  %v3220_v37 = vshrl.u32 %v7762_v49, 16  ;;  %v3224_v20 = vrot.slane %v3222_v17, 1  ;;  %v3070_v34 = vor.u32 %v3068_v14, %v3067_v42 }
 0x4af   : > { %v3003_v5 = vmax.f32 %v2971_v45, 0.0  ;;  %v3242_v18 = vsel %vm1838_vm8, %v3237_v59, %v3241_v23  ;;  %v3063_v4 = vor.u32 %v3061_v16, %v3060_v50  ;;  %v3464_v28 = vrot.slane %v7749_v46, 1 }
 0x4b0   : > { %v3032_v32 = vpack.c.bf16 %v3005_v38, %v3004_v10  ;;  %3403 = vrot.lane.b32.xlu1 %v3242_v18, %s6578_s2  ;;  %v3225_v56 = vor.u32 %v3224_v20, %v3220_v37  ;;  %v3229_v55 = vrot.slane %v3227_v52, 1  ;;  %v7785_v48 = vsel %vm7178_vm7, %v3067_v42, 0 }
 0x4b1   : > { %v3031_v31 = vpack.c.bf16 %v3003_v5, %v3002_v24  ;;  %v5933_v57 = vpop.f32.mrb[12].mxu1  ;;  %v3466_v9 = vsel %vm2090_vm9, %v3464_v28, %v3465_v40  ;;  %v7791_v63 = vsel %vm7178_vm7, %v3060_v50, 0  ;;  %v3461_v26 = vrot.slane %v7762_v49, 1 }
 0x4b2   : > { %v3079_v1 = vshrl.u32 %v3032_v32, 16  ;;  %v2976_v21 = vadd.f32 %v5933_v57, %v7733_v25  ;;  %v2845_v2 = vpop.f32.mrb[13].mxu1  ;;  %v3230_v61 = vsel %vm1838_vm8, %v3225_v56, %v3229_v55  ;;  %v7799_v54 = vsel %vm7178_vm7, 0, %v3070_v34 }
 0x4b3   : > { %v3072_v53 = vshrl.u32 %v3031_v31, 16  ;;  %v2974_v29 = vadd.f32 %v7733_v25, %v2845_v2  ;;  %v5934_v39 = vpop.f32.mrb[14].mxu1  ;;  %v7803_v30 = vsel %vm7178_vm7, 0, %v3063_v4  ;;  %3401 = vrot.lane.b32.xlu0 %v3230_v61, %s6578_s2  ;;  %v3462_v11 = vrot.slane %v7757_v62, 1 }
 0x4b4   : > { %v2977_v12 = vadd.f32 %v5934_v39, %v7733_v25  ;;  %3510 = vrot.lane.b32.xlu1 %v3466_v9, %s6583_s29  ;;  %v2848_v3 = vpop.f32.mrb[15].mxu1  ;;  %v3081_v6 = vrot.slane %v3079_v1, 7  ;;  %v3008_v47 = vmax.f32 %v2976_v21, 0.0  ;;  %v3082_v27 = vshll.u32 %v3032_v32, 16 }
 0x4b5   : > { %v2975_v58 = vadd.f32 %v7733_v25, %v2848_v3  ;;  %v3074_v22 = vrot.slane %v3072_v53, 7  ;;  %v3075_v7 = vshll.u32 %v3031_v31, 16  ;;  %v3006_v41 = vmax.f32 %v2974_v29, 0.0 }
 0x4b6   : > { %v3009_v36 = vmax.f32 %v2977_v12, 0.0  ;;  %v3463_v43 = vsel %vm2090_vm9, %v3461_v26, %v3462_v11  ;;  %v3258_v13 = vshll.u32 %v7799_v54, 16  ;;  %v3263_v19 = vshll.u32 %v7785_v48, 16 }
 0x4b7   : > { %v3007_v33 = vmax.f32 %v2975_v58, 0.0  ;;  %v3084_v51 = vor.u32 %v3082_v27, %v3081_v6  ;;  %v7813_v35 = vsel %vm7178_vm7, %v3081_v6, 0  ;;  %3508 = vrot.lane.b32.xlu0 %v3463_v43, %s6583_s29  ;;  %v3246_v62 = vshll.u32 %v7803_v30, 16 }
 0x4b8   : > { %v3034_v60 = vpack.c.bf16 %v3009_v36, %v3008_v47  ;;  %v3077_v52 = vor.u32 %v3075_v7, %v3074_v22  ;;  %v3256_v50 = vshrl.u32 %v7799_v54, 16  ;;  %v3260_v45 = vrot.slane %v3258_v13, 1 }
 0x4b9   : > { %v3033_v15 = vpack.c.bf16 %v3007_v33, %v3006_v41  ;;  %v5937_v23 = vpop.f32.mrb[16].mxu1  ;;  %v3244_v10 = vshrl.u32 %v7803_v30, 16  ;;  %v3248_v38 = vrot.slane %v3246_v62, 1  ;;  %v3251_v17 = vshll.u32 %v7791_v63, 16 }
 0x4ba   : > { %v3093_v42 = vshrl.u32 %v3034_v60, 16  ;;  %v2861_v59 = vpop.f32.mrb[17].mxu1  ;;  %v7822_v24 = vsel %vm7178_vm7, %v3074_v22, 0  ;;  %v3261_v5 = vor.u32 %v3260_v45, %v3256_v50  ;;  %v3265_v18 = vrot.slane %v3263_v19, 1 }
 0x4bb   : > { %v3086_v14 = vshrl.u32 %v3033_v15, 16  ;;  %v5938_v16 = vpop.f32.mrb[18].mxu1  ;;  %v2980_v32 = vadd.f32 %v5937_v23, %v7733_v25  ;;  %v3249_v40 = vor.u32 %v3248_v38, %v3244_v10  ;;  %v3253_v34 = vrot.slane %v3251_v17, 1 }
 0x4bc   : > { %v2864_v37 = vpop.f32.mrb[19].mxu1  ;;  %v3095_v20 = vrot.slane %v3093_v42, 7  ;;  %v2981_v4 = vadd.f32 %v5938_v16, %v7733_v25  ;;  %v7828_v31 = vsel %vm7178_vm7, 0, %v3084_v51  ;;  %v7832_v57 = vsel %vm7178_vm7, 0, %v3077_v52 }
 0x4bd   : > { %v3088_v28 = vrot.slane %v3086_v14, 7  ;;  %v3266_v1 = vsel %vm1838_vm8, %v3261_v5, %v3265_v18  ;;  %v3096_v56 = vshll.u32 %v3034_v60, 16  ;;  %v3089_v55 = vshll.u32 %v3033_v15, 16 }
 0x4be   : > { %3407 = vrot.lane.b32.xlu1 %v3266_v1, %s6578_s2  ;;  %v3254_v21 = vsel %vm1838_vm8, %v3249_v40, %v3253_v34  ;;  %v2978_v2 = vadd.f32 %v7733_v25, %v2861_v59  ;;  %v3012_v53 = vmax.f32 %v2980_v32, 0.0  ;;  %v3013_v29 = vmax.f32 %v2981_v4, 0.0 }
 0x4bf   : > { %3405 = vrot.lane.b32.xlu0 %v3254_v21, %s6578_s2  ;;  %v3470_v39 = vrot.slane %v7799_v54, 1  ;;  %v3471_v9 = vrot.slane %v7785_v48, 1  ;;  %v3098_v61 = vor.u32 %v3096_v56, %v3095_v20  ;;  %v2979_v12 = vadd.f32 %v7733_v25, %v2864_v37 }
 0x4c0   : > { %v3467_v3 = vrot.slane %v7803_v30, 1  ;;  %v3468_v26 = vrot.slane %v7791_v63, 1  ;;  %v3091_v58 = vor.u32 %v3089_v55, %v3088_v28  ;;  %v3036_v22 = vpack.c.bf16 %v3013_v29, %v3012_v53 }
 0x4c1   : > { %v5941_v6 = vpop.f32.mrb[20].mxu1  ;;  %v3472_v47 = vsel %vm2090_vm9, %v3470_v39, %v3471_v9  ;;  %v3282_v36 = vshll.u32 %v7828_v31, 16  ;;  %v3010_v27 = vmax.f32 %v2978_v2, 0.0  ;;  %v3011_v7 = vmax.f32 %v2979_v12, 0.0 }
 0x4c2   : > { %v2877_v11 = vpop.f32.mrb[21].mxu1  ;;  %3514 = vrot.lane.b32.xlu1 %v3472_v47, %s6583_s29  ;;  %v3469_v48 = vsel %vm2090_vm9, %v3467_v3, %v3468_v26  ;;  %v3287_v41 = vshll.u32 %v7813_v35, 16  ;;  %v7851_v63 = vsel %vm7178_vm7, %v3095_v20, 0  ;;  %v3280_v60 = vshrl.u32 %v7828_v31, 16 }
 0x4c3   : > { %v5942_v33 = vpop.f32.mrb[22].mxu1  ;;  %3512 = vrot.lane.b32.xlu0 %v3469_v48, %s6583_s29  ;;  %v3284_v43 = vrot.slane %v3282_v36, 1  ;;  %v3270_v13 = vshll.u32 %v7832_v57, 16  ;;  %v7858_v51 = vsel %vm7178_vm7, %v3088_v28, 0  ;;  %v3107_v15 = vshrl.u32 %v3036_v22, 16 }
 0x4c4   : > { %v2880_v19 = vpop.f32.mrb[23].mxu1  ;;  %v3035_v62 = vpack.c.bf16 %v3011_v7, %v3010_v27  ;;  %v3275_v23 = vshll.u32 %v7822_v24, 16  ;;  %v3289_v42 = vrot.slane %v3287_v41, 1  ;;  %v3268_v50 = vshrl.u32 %v7832_v57, 16 }
 0x4c5   : > { %v3285_v52 = vor.u32 %v3284_v43, %v3280_v60  ;;  %v3272_v45 = vrot.slane %v3270_v13, 1  ;;  %v7864_v59 = vsel %vm7178_vm7, 0, %v3098_v61  ;;  %v7868_v14 = vsel %vm7178_vm7, 0, %v3091_v58 }
 0x4c6   : > { %v3100_v10 = vshrl.u32 %v3035_v62, 16  ;;  %v2984_v38 = vadd.f32 %v5941_v6, %v7733_v25  ;;  %v3277_v5 = vrot.slane %v3275_v23, 1  ;;  %v2982_v18 = vadd.f32 %v7733_v25, %v2877_v11 }
 0x4c7   : > { %v3290_v17 = vsel %vm1838_vm8, %v3285_v52, %v3289_v42  ;;  %v3273_v16 = vor.u32 %v3272_v45, %v3268_v50  ;;  %v3109_v32 = vrot.slane %v3107_v15, 7  ;;  %v3110_v37 = vshll.u32 %v3036_v22, 16 }
 0x4c8   : > { %3411 = vrot.lane.b32.xlu1 %v3290_v17, %s6578_s2  ;;  %v2985_v20 = vadd.f32 %v5942_v33, %v7733_v25  ;;  %v3476_v40 = vrot.slane %v7828_v31, 1  ;;  %v3103_v4 = vshll.u32 %v3035_v62, 16  ;;  %v3477_v1 = vrot.slane %v7813_v35, 1 }
 0x4c9   : > { %v5945_v34 = vpop.f32.mrb[24].mxu1  ;;  %v3278_v28 = vsel %vm1838_vm8, %v3273_v16, %v3277_v5  ;;  %v2983_v56 = vadd.f32 %v7733_v25, %v2880_v19  ;;  %v3102_v21 = vrot.slane %v3100_v10, 7  ;;  %v3016_v2 = vmax.f32 %v2984_v38, 0.0 }
 0x4ca   : > { %v2893_v55 = vpop.f32.mrb[25].mxu1  ;;  %3409 = vrot.lane.b32.xlu0 %v3278_v28, %s6578_s2  ;;  %v3017_v53 = vmax.f32 %v2985_v20, 0.0  ;;  %v3473_v29 = vrot.slane %v7832_v57, 1  ;;  %v3014_v9 = vmax.f32 %v2982_v18, 0.0  ;;  %v3478_v61 = vsel %vm2090_vm9, %v3476_v40, %v3477_v1 }
 0x4cb   : > { %v5946_v39 = vpop.f32.mrb[26].mxu1  ;;  %v3015_v12 = vmax.f32 %v2983_v56, 0.0  ;;  %v3474_v3 = vrot.slane %v7822_v24, 1  ;;  %v3112_v6 = vor.u32 %v3110_v37, %v3109_v32  ;;  %v3306_v58 = vshll.u32 %v7864_v59, 16 }
 0x4cc   : > { %v2896_v26 = vpop.f32.mrb[27].mxu1  ;;  %v3038_v35 = vpack.c.bf16 %v3017_v53, %v3016_v2  ;;  %3518 = vrot.lane.b32.xlu1 %v3478_v61, %s6583_s29  ;;  %v3311_v22 = vshll.u32 %v7851_v63, 16  ;;  %v7888_v47 = vsel %vm7178_vm7, %v3109_v32, 0  ;;  %v3294_v27 = vshll.u32 %v7868_v14, 16 }
 0x4cd   : > { %v3037_v36 = vpack.c.bf16 %v3015_v12, %v3014_v9  ;;  %v3475_v11 = vsel %vm2090_vm9, %v3473_v29, %v3474_v3  ;;  %v3105_v7 = vor.u32 %v3103_v4, %v3102_v21  ;;  %v3304_v48 = vshrl.u32 %v7864_v59, 16 }
 0x4ce   : > { %v3121_v24 = vshrl.u32 %v3038_v35, 16  ;;  %3516 = vrot.lane.b32.xlu0 %v3475_v11, %s6583_s29  ;;  %v3308_v41 = vrot.slane %v3306_v58, 1  ;;  %v3292_v60 = vshrl.u32 %v7868_v14, 16  ;;  %v3296_v43 = vrot.slane %v3294_v27, 1 }
 0x4cf   : > { %v3114_v33 = vshrl.u32 %v3037_v36, 16  ;;  %v3299_v13 = vshll.u32 %v7858_v51, 16  ;;  %v7898_v19 = vsel %vm7178_vm7, 0, %v3112_v6  ;;  %v3313_v62 = vrot.slane %v3311_v22, 1 }
 0x4d0   : > { %v3309_v15 = vor.u32 %v3308_v41, %v3304_v48  ;;  %v2988_v23 = vadd.f32 %v5945_v34, %v7733_v25  ;;  %v3123_v42 = vrot.slane %v3121_v24, 7  ;;  %v3297_v50 = vor.u32 %v3296_v43, %v3292_v60 }
 0x4d1   : > { %v5949_v52 = vpop.f32.mrb[28].mxu1  ;;  %v3301_v45 = vrot.slane %v3299_v13, 1  ;;  %v2989_v10 = vadd.f32 %v5946_v39, %v7733_v25  ;;  %v7904_v17 = vsel %vm7178_vm7, 0, %v3105_v7  ;;  %v7908_v16 = vsel %vm7178_vm7, %v3102_v21, 0 }
 0x4d2   : > { %v2909_v38 = vpop.f32.mrb[29].mxu1  ;;  %v3116_v5 = vrot.slane %v3114_v33, 7  ;;  %v3314_v18 = vsel %vm1838_vm8, %v3309_v15, %v3313_v62  ;;  %v3124_v37 = vshll.u32 %v3038_v35, 16  ;;  %v3117_v20 = vshll.u32 %v3037_v36, 16 }
 0x4d3   : > { %v5950_v32 = vpop.f32.mrb[30].mxu1  ;;  %3415 = vrot.lane.b32.xlu1 %v3314_v18, %s6578_s2  ;;  %v3302_v40 = vsel %vm1838_vm8, %v3297_v50, %v3301_v45  ;;  %v2986_v34 = vadd.f32 %v7733_v25, %v2893_v55  ;;  %v3020_v28 = vmax.f32 %v2988_v23, 0.0  ;;  %v3021_v1 = vmax.f32 %v2989_v10, 0.0 }
 0x4d4   : > { %v2912_v4 = vpop.f32.mrb[31].mxu1  ;;  %3413 = vrot.lane.b32.xlu0 %v3302_v40, %s6578_s2  ;;  %v3482_v56 = vrot.slane %v7864_v59, 1  ;;  %v3483_v21 = vrot.slane %v7851_v63, 1  ;;  %v3126_v2 = vor.u32 %v3124_v37, %v3123_v42  ;;  %v2987_v53 = vadd.f32 %v7733_v25, %v2896_v26 }
 0x4d5   : > { %v3479_v29 = vrot.slane %v7868_v14, 1  ;;  %v3480_v39 = vrot.slane %v7858_v51, 1  ;;  %v3119_v9 = vor.u32 %v3117_v20, %v3116_v5  ;;  %v3040_v61 = vpack.c.bf16 %v3021_v1, %v3020_v28 }
 0x4d6   : > { %v3484_v55 = vsel %vm2090_vm9, %v3482_v56, %v3483_v21  ;;  %v3330_v12 = vshll.u32 %v7898_v19, 16  ;;  %v3018_v3 = vmax.f32 %v2986_v34, 0.0  ;;  %v3019_v6 = vmax.f32 %v2987_v53, 0.0 }
 0x4d7   : > { %3522 = vrot.lane.b32.xlu1 %v3484_v55, %s6583_s29  ;;  %v3481_v35 = vsel %vm2090_vm9, %v3479_v29, %v3480_v39  ;;  %v3335_v63 = vshll.u32 %v7888_v47, 16  ;;  %v7927_v26 = vsel %vm7178_vm7, %v3123_v42, 0  ;;  %v3328_v51 = vshrl.u32 %v7898_v19, 16 }
 0x4d8   : > { %3520 = vrot.lane.b32.xlu0 %v3481_v35, %s6583_s29  ;;  %v3332_v58 = vrot.slane %v3330_v12, 1  ;;  %v3318_v22 = vshll.u32 %v7904_v17, 16  ;;  %v7934_v36 = vsel %vm7178_vm7, %v3116_v5, 0  ;;  %v3135_v11 = vshrl.u32 %v3040_v61, 16 }
 0x4d9   : > { %v3039_v27 = vpack.c.bf16 %v3019_v6, %v3018_v3  ;;  %v3323_v7 = vshll.u32 %v7908_v16, 16  ;;  %v3337_v48 = vrot.slane %v3335_v63, 1  ;;  %v3316_v41 = vshrl.u32 %v7904_v17, 16 }
 0x4da   : > { %v3333_v24 = vor.u32 %v3332_v58, %v3328_v51  ;;  %v3320_v33 = vrot.slane %v3318_v22, 1  ;;  %v7940_v60 = vsel %vm7178_vm7, 0, %v3126_v2  ;;  %v7944_v43 = vsel %vm7178_vm7, 0, %v3119_v9 }
 0x4db   : > { %v3128_v13 = vshrl.u32 %v3039_v27, 16  ;;  %v2992_v15 = vadd.f32 %v5949_v52, %v7733_v25  ;;  %v3325_v42 = vrot.slane %v3323_v7, 1  ;;  %v2990_v50 = vadd.f32 %v7733_v25, %v2909_v38 }
 0x4dc   : > { %v3338_v62 = vsel %vm1838_vm8, %v3333_v24, %v3337_v48  ;;  %v3321_v23 = vor.u32 %v3320_v33, %v3316_v41  ;;  %v3137_v45 = vrot.slane %v3135_v11, 7  ;;  %v3138_v10 = vshll.u32 %v3040_v61, 16 }
 0x4dd   : > { %3419 = vrot.lane.b32.xlu1 %v3338_v62, %s6578_s2  ;;  %v2993_v5 = vadd.f32 %v5950_v32, %v7733_v25  ;;  %v3488_v18 = vrot.slane %v7898_v19, 1  ;;  %v3131_v37 = vshll.u32 %v3039_v27, 16  ;;  %v3489_v40 = vrot.slane %v7888_v47, 1 }
 0x4de   : > { %v3326_v20 = vsel %vm1838_vm8, %v3321_v23, %v3325_v42  ;;  %v2991_v52 = vadd.f32 %v7733_v25, %v2912_v4  ;;  %v3130_v34 = vrot.slane %v3128_v13, 7  ;;  %v3024_v28 = vmax.f32 %v2992_v15, 0.0 }
 0x4df   : > { %3417 = vrot.lane.b32.xlu0 %v3326_v20, %s6578_s2  ;;  %v3025_v38 = vmax.f32 %v2993_v5, 0.0  ;;  %v3485_v1 = vrot.slane %v7904_v17, 1  ;;  %v3022_v56 = vmax.f32 %v2990_v50, 0.0  ;;  %v3490_v21 = vsel %vm2090_vm9, %v3488_v18, %v3489_v40 }
 0x4e0   : > { %v3023_v32 = vmax.f32 %v2991_v52, 0.0  ;;  %v3486_v2 = vrot.slane %v7908_v16, 1  ;;  %v3140_v53 = vor.u32 %v3138_v10, %v3137_v45  ;;  %v3354_v47 = vshll.u32 %v7940_v60, 16 }
 0x4e1   : > { %v3042_v29 = vpack.c.bf16 %v3025_v38, %v3024_v28  ;;  %3526 = vrot.lane.b32.xlu1 %v3490_v21, %s6583_s29  ;;  %v3359_v25 = vshll.u32 %v7927_v26, 16  ;;  %v7964_v4 = vsel %vm7178_vm7, %v3137_v45, 0  ;;  %v3342_v61 = vshll.u32 %v7944_v43, 16 }
 0x4e2   : > { %v3041_v39 = vpack.c.bf16 %v3023_v32, %v3022_v56  ;;  %v3487_v9 = vsel %vm2090_vm9, %v3485_v1, %v3486_v2  ;;  %v3133_v55 = vor.u32 %v3131_v37, %v3130_v34  ;;  %v3352_v16 = vshrl.u32 %v7940_v60, 16 }
 0x4e3   : > { %v3149_v12 = vshrl.u32 %v3042_v29, 16  ;;  %3524 = vrot.lane.b32.xlu0 %v3487_v9, %s6583_s29  ;;  %v3356_v3 = vrot.slane %v3354_v47, 1  ;;  %v3340_v35 = vshrl.u32 %v7944_v43, 16  ;;  %v3344_v63 = vrot.slane %v3342_v61, 1 }
 0x4e4   : > { %v3142_v6 = vshrl.u32 %v3041_v39, 16  ;;  %v3347_v51 = vshll.u32 %v7934_v36, 16  ;;  %v7974_v58 = vsel %vm7178_vm7, 0, %v3140_v53  ;;  %v3145_v22 = vshll.u32 %v3041_v39, 16 }
 0x4e5   : > { %v3357_v11 = vor.u32 %v3356_v3, %v3352_v16  ;;  %v3361_v27 = vrot.slane %v3359_v25, 1  ;;  %v3151_v7 = vrot.slane %v3149_v12, 7  ;;  %v3345_v48 = vor.u32 %v3344_v63, %v3340_v35 }
 0x4e6   : > { %v3144_v24 = vrot.slane %v3142_v6, 7  ;;  %v3349_v41 = vrot.slane %v3347_v51, 1  ;;  %v7978_v33 = vsel %vm7178_vm7, 0, %v3133_v55  ;;  %v3215_v13 = vsel %vm7178_vm7, %v3130_v34, 0 }
 0x4e7   : > { %v3362_v15 = vsel %vm1838_vm8, %v3357_v11, %v3361_v27  ;;  %v3494_v62 = vrot.slane %v7940_v60, 1  ;;  %v3152_v23 = vshll.u32 %v3042_v29, 16  ;;  %v3491_v45 = vrot.slane %v7944_v43, 1 }
 0x4e8   : > { %v3147_v42 = vor.u32 %v3145_v22, %v3144_v24  ;;  %3423 = vrot.lane.b32.xlu1 %v3362_v15, %s6578_s2  ;;  %v3350_v50 = vsel %vm1838_vm8, %v3345_v48, %v3349_v41  ;;  %v3495_v10 = vrot.slane %v7927_v26, 1  ;;  %v3378_v5 = vshll.u32 %v7974_v58, 16 }
 0x4e9   : > { %3421 = vrot.lane.b32.xlu0 %v3350_v50, %s6578_s2  ;;  %v3383_v18 = vshll.u32 %v7964_v4, 16  ;;  %v3154_v37 = vor.u32 %v3152_v23, %v3151_v7  ;;  %v3492_v20 = vrot.slane %v7934_v36, 1  ;;  %v3366_v40 = vshll.u32 %v7978_v33, 16 }
 0x4ea   : > { %v3496_v52 = vsel %vm2090_vm9, %v3494_v62, %v3495_v10  ;;  %v3376_v34 = vshrl.u32 %v7974_v58, 16  ;;  %v3380_v28 = vrot.slane %v3378_v5, 1  ;;  %v3371_v38 = vshll.u32 %v3215_v13, 16 }
 0x4eb   : > { %v7997_v1 = vsel %vm7178_vm7, 0, %v3147_v42  ;;  %v3493_v26 = vsel %vm2090_vm9, %v3491_v45, %v3492_v20  ;;  %v3364_v56 = vshrl.u32 %v7978_v33, 16  ;;  %v3368_v21 = vrot.slane %v3366_v40, 1 }
 0x4ec   : > { %3530 = vrot.lane.b32.xlu1 %v3496_v52, %s6583_s29  ;;  %v3217_v36 = vsel %vm7178_vm7, %v3144_v24, 0  ;;  %v3381_v32 = vor.u32 %v3380_v28, %v3376_v34  ;;  %v3385_v2 = vrot.slane %v3383_v18, 1  ;;  %v8007_v53 = vsel %vm7178_vm7, 0, %v3154_v37  ;;  %v6301_v28 = vld [vmem:[%s8661_s4 + $0x8] sm:$0xff]  }
 0x4ed   : > { %3528 = vrot.lane.b32.xlu0 %v3493_v26, %s6583_s29  ;;  %v3369_v29 = vor.u32 %v3368_v21, %v3364_v56  ;;  %v3373_v47 = vrot.slane %v3371_v38, 1  ;;  %v3500_v39 = vrot.slane %v7974_v58, 1  ;;  %v3390_v9 = vshll.u32 %v7997_v1, 16  ;;  %v8064_v26 = vld [vmem:[%s8661_s4 + $0x30] sm:$0xff]  }
 0x4ee   : > { %v3386_v25 = vsel %vm1838_vm8, %v3381_v32, %v3385_v2  ;;  %v3497_v55 = vrot.slane %v7978_v33, 1  ;;  %v3395_v12 = vshll.u32 %v3217_v36, 16  ;;  %v3501_v16 = vrot.slane %v7964_v4, 1 }
 0x4ef   : > { %v3374_v61 = vsel %vm1838_vm8, %v3369_v29, %v3373_v47  ;;  %v3388_v3 = vshrl.u32 %v7997_v1, 16  ;;  %v3392_v6 = vrot.slane %v3390_v9, 1  ;;  %v3611_v35 = vshll.u32 %v8007_v53, 16 }
 0x4f0   : > { %3427 = vrot.lane.b32.xlu1 %v3386_v25, %s6578_s2  ;;  %v3498_v63 = vrot.slane %v3215_v13, 1  ;;  %v3218_v51 = vsel %vm7178_vm7, %v3151_v7, 0  ;;  %v3502_v22 = vsel %vm2090_vm9, %v3500_v39, %v3501_v16  ;;  %v3503_v11 = vrot.slane %v7997_v1, 1 }
 0x4f1   : > { %3425 = vrot.lane.b32.xlu0 %v3374_v61, %s6578_s2  ;;  %v3393_v27 = vor.u32 %v3392_v6, %v3388_v3  ;;  %v3397_v48 = vrot.slane %v3395_v12, 1  ;;  %v3613_v4 = vrot.slane %v3611_v35, 1  ;;  %v3504_v41 = vrot.slane %v3217_v36, 1 }
 0x4f2   : > { %v3499_v24 = vsel %vm2090_vm9, %v3497_v55, %v3498_v63  ;;  %v3609_v13 = vshrl.u32 %v8007_v53, 16  ;;  %v3616_v0 = vshll.u32 %v3218_v51, 16  ;;  %v3624_v62 = vrot.slane %v8007_v53, 1 }
 0x4f3   : > { %v3398_v15 = vsel %vm1838_vm8, %v3393_v27, %v3397_v48  ;;  %v3505_v7 = vsel %vm2090_vm9, %v3503_v11, %v3504_v41  ;;  %v3625_v42 = vrot.slane %v3218_v51, 1 }
 0x4f4   : > { %3534 = vrot.lane.b32.xlu1 %v3502_v22, %s6583_s29  ;;  %v3614_v23 = vor.u32 %v3613_v4, %v3609_v13  ;;  %v3618_v50 = vrot.slane %v3616_v0, 1 }
 0x4f5   : > { %3532 = vrot.lane.b32.xlu0 %v3499_v24, %s6583_s29  ;;  %v3626_v45 = vsel %vm2090_vm9, %v3624_v62, %v3625_v42 }
 0x4f6   : > { %v3619_v10 = vsel %vm1838_vm8, %v3614_v23, %v3618_v50 }
 0x4f8   : > { %3536 = vrot.lane.b32.xlu1 %v3505_v7, %s6583_s29 }
 0x4f9   : > { %3429 = vrot.lane.b32.xlu0 %v3398_v15, %s6578_s2 }
 0x4fc   : > { %3627 = vrot.lane.b32.xlu1 %v3626_v45, %s6583_s29 }
 0x4fd   : > { %3620 = vrot.lane.b32.xlu0 %v3619_v10, %s6578_s2 }
 0x500   : > { %3506 = vrot.lane.b32.xlu1 %v7514_v8, %s6583_s29 }
 0x501   : > { %3399 = vrot.lane.b32.xlu0 %v7514_v8, %s6578_s2 }
 0x522   : > { %v3404_v5 = vpop.permute.xlu1 %3403 }
 0x523   : > { %v3543_v52 = vsel %vm779_vm1, %v7749_v46, %v3404_v5  ;;  %v6302_v46 = vld [vmem:[%s8661_s4 + $0x10] sm:$0xff]  }
 0x525   : > { %v3402_v18 = vpop.permute.xlu0 %3401 }
 0x526   : > { %v3511_v37 = vpop.permute.xlu1 %3510  ;;  %v3541_v20 = vsel %vm779_vm1, %v7762_v49, %v3402_v18 }
 0x527   : > { %v8051_v8 = vsel %vm821_vm2, %v3543_v52, %v3511_v37 }
 0x529   : > { %v3509_v40 = vpop.permute.xlu0 %3508 }
 0x52a   : > { %v8045_v34 = vsel %vm821_vm2, %v3541_v20, %v3509_v40 }
 0x52b   : > { %5957 = vmatprep.mubr.msk.bf16.mxu0 %vm3658_vm12, %v8045_v34 }
 0x52c   : > { %5958 = vmatmul.mubr.msk.bf16.vlgmr.msra.gmra.mrb[4].mxu0 %vm3658_vm12, %v8051_v8 }
 0x52d   : > { %5990 = vmatpush3.bf16.msra.mxu0 %v7774_v44 }
 0x52e   : > { %5991 = vmatprep.subr.bf16.mxu0 %v6301_v28 }
 0x530   : > { %v3408_v49 = vpop.permute.xlu1 %3407 }
 0x531   : > { %v3406_v38 = vpop.permute.xlu0 %3405  ;;  %5992 = vmatpush3.bf16.msra.mxu0 %v6301_v28  ;;  %v3547_v44 = vsel %vm779_vm1, %v7799_v54, %v3408_v49 }
 0x532   : > { %5993 = vmatprep.subr.bf16.mxu0 %v6302_v46  ;;  %v3545_v21 = vsel %vm779_vm1, %v7803_v30, %v3406_v38  ;;  %v4321_v38 = vld [vmem:[%s8669_s12] sm:$0xff] }
 0x534   : > { %v3515_v56 = vpop.permute.xlu1 %3514 }
 0x535   : > { %v3513_v36 = vpop.permute.xlu0 %3512  ;;  %5994 = vmatpush3.bf16.msra.mxu0 %v6302_v46  ;;  %v8074_v2 = vsel %vm821_vm2, %v3547_v44, %v3515_v56 }
 0x536   : > { %v8071_v32 = vsel %vm821_vm2, %v3545_v21, %v3513_v36  ;;  %6027 = vmatprep.subr.bf16.mxu0 %v8064_v26  ;;  %v8220_v21 = vld [vmem:[%s8662_s5] ss:$0 sm:$0xff] }
 0x537   : > { %5961 = vmatprep.mubr.msk.bf16.mxu0 %vm3658_vm12, %v8071_v32 }
 0x538   : > { %5962 = vmatmul.mubr.msk.bf16.gmra.mrb[8].mxu0 %vm3658_vm12, %v8074_v2 }
 0x53a   : > { %v3412_v30 = vpop.permute.xlu1 %3411 }
 0x53b   : > { %v3551_v39 = vsel %vm779_vm1, %v7828_v31, %v3412_v30 }
 0x53c   : > { %v3410_v29 = vpop.permute.xlu0 %3409 }
 0x53d   : > { %v3549_v54 = vsel %vm779_vm1, %v7832_v57, %v3410_v29 }
 0x53e   : > { %v3519_v47 = vpop.permute.xlu1 %3518 }
 0x53f   : > { %v8089_v61 = vsel %vm821_vm2, %v3551_v39, %v3519_v47 }
 0x540   : > { %v3517_v25 = vpop.permute.xlu0 %3516 }
 0x541   : > { %v8086_v9 = vsel %vm821_vm2, %v3549_v54, %v3517_v25 }
 0x542   : > { %5965 = vmatprep.mubr.msk.bf16.mxu0 %vm3658_vm12, %v8086_v9 }
 0x543   : > { %5966 = vmatmul.mubr.msk.bf16.gmra.mrb[12].mxu0 %vm3658_vm12, %v8089_v61 }
 0x545   : > { %v3416_v55 = vpop.permute.xlu1 %3415 }
 0x546   : > { %v3414_v12 = vpop.permute.xlu0 %3413  ;;  %v3555_v31 = vsel %vm779_vm1, %v7864_v59, %v3416_v55 }
 0x547   : > { %v3553_v57 = vsel %vm779_vm1, %v7868_v14, %v3414_v12 }
 0x549   : > { %v3523_v16 = vpop.permute.xlu1 %3522 }
 0x54a   : > { %v3521_v3 = vpop.permute.xlu0 %3520  ;;  %v8103_v35 = vsel %vm821_vm2, %v3555_v31, %v3523_v16 }
 0x54b   : > { %v8100_v6 = vsel %vm821_vm2, %v3553_v57, %v3521_v3 }
 0x54c   : > { %5969 = vmatprep.mubr.msk.bf16.mxu0 %vm3658_vm12, %v8100_v6 }
 0x54d   : > { %5970 = vmatmul.mubr.msk.bf16.gmra.mrb[16].mxu0 %vm3658_vm12, %v8103_v35 }
 0x54f   : > { %v3420_v63 = vpop.permute.xlu1 %3419 }
 0x550   : > { %v3559_v59 = vsel %vm779_vm1, %v7898_v19, %v3420_v63 }
 0x551   : > { %v3418_v51 = vpop.permute.xlu0 %3417 }
 0x552   : > { %v3557_v14 = vsel %vm779_vm1, %v7904_v17, %v3418_v51 }
 0x553   : > { %v3527_v22 = vpop.permute.xlu1 %3526 }
 0x554   : > { %v8117_v24 = vsel %vm821_vm2, %v3559_v59, %v3527_v22 }
 0x555   : > { %v3525_v11 = vpop.permute.xlu0 %3524 }
 0x556   : > { %v8114_v27 = vsel %vm821_vm2, %v3557_v14, %v3525_v11 }
 0x557   : > { %5973 = vmatprep.mubr.msk.bf16.mxu0 %vm3658_vm12, %v8114_v27 }
 0x558   : > { %5974 = vmatmul.mubr.msk.bf16.gmra.mrb[20].mxu0 %vm3658_vm12, %v8117_v24 }
 0x55a   : > { %v3424_v48 = vpop.permute.xlu1 %3423 }
 0x55b   : > { %v3422_v4 = vpop.permute.xlu0 %3421  ;;  %v3563_v19 = vsel %vm779_vm1, %v7940_v60, %v3424_v48 }
 0x55c   : > { %v3561_v17 = vsel %vm779_vm1, %v7944_v43, %v3422_v4 }
 0x55e   : > { %v3531_v41 = vpop.permute.xlu1 %3530 }
 0x55f   : > { %v3529_v15 = vpop.permute.xlu0 %3528  ;;  %v3595_v0 = vsel %vm821_vm2, %v3563_v19, %v3531_v41 }
 0x560   : > { %v3593_v13 = vsel %vm821_vm2, %v3561_v17, %v3529_v15 }
 0x561   : > { %5977 = vmatprep.mubr.msk.bf16.mxu0 %vm3658_vm12, %v3593_v13 }
 0x562   : > { %5978 = vmatmul.mubr.msk.bf16.gmra.mrb[24].mxu0 %vm3658_vm12, %v3595_v0  ;;  %v3428_v7 = vpop.permute.xlu1 %3427 }
 0x563   : > { %v3426_v62 = vpop.permute.xlu0 %3425  ;;  %v3567_v43 = vsel %vm779_vm1, %v7974_v58, %v3428_v7 }
 0x564   : > { %v3565_v42 = vsel %vm779_vm1, %v7978_v33, %v3426_v62 }
 0x566   : > { %v3535_v23 = vpop.permute.xlu1 %3534 }
 0x567   : > { %v3533_v50 = vpop.permute.xlu0 %3532  ;;  %v3599_v45 = vsel %vm821_vm2, %v3567_v43, %v3535_v23 }
 0x568   : > { %v3597_v60 = vsel %vm821_vm2, %v3565_v42, %v3533_v50 }
 0x569   : > { %5981 = vmatprep.mubr.msk.bf16.mxu0 %vm3658_vm12, %v3597_v60 }
 0x56a   : > { %5982 = vmatmul.mubr.msk.bf16.gmra.mrb[28].mxu0 %vm3658_vm12, %v3599_v45  ;;  %v3537_v10 = vpop.permute.xlu1 %3536 }
 0x56b   : > { %v3430_v5 = vpop.permute.xlu0 %3429 }
 0x56c   : > { %v3569_v18 = vsel %vm779_vm1, %v7997_v1, %v3430_v5  ;;  %v6304_v1 = vld [vmem:[%s8661_s4 + $0x38] sm:$0xff]  }
 0x56d   : > { %v3601_v37 = vsel %vm821_vm2, %v3569_v18, %v3537_v10 }
 0x56e   : > { %v3628_v33 = vpop.permute.xlu1 %3627  ;;  %5985 = vmatprep.mubr.msk.bf16.mxu0 %vm3658_vm12, %v3601_v37 }
 0x56f   : > { %v3621_v20 = vpop.permute.xlu0 %3620 }
 0x570   : > { %v3630_v58 = vsel %vm779_vm1, %v8007_v53, %v3621_v20  ;;  %v6305_v53 = vld [vmem:[%s8661_s4 + $0x40] sm:$0xff]  }
 0x571   : > { %v3632_v40 = vsel %vm821_vm2, %v3630_v58, %v3628_v33 }
 0x572   : > { %5986 = vmatmul.mubr.msk.bf16.gmra.mrb[32].mxu0 %vm3658_vm12, %v3632_v40  ;;  %v3507_v52 = vpop.permute.xlu1 %3506 }
 0x573   : > { %v3400_v28 = vpop.permute.xlu0 %3399 }
 0x574   : > { %v3539_v46 = vsel %vm779_vm1, 0, %v3400_v28 }
 0x575   : > { %v3571_v49 = vsel %vm821_vm2, %v3539_v46, %v3507_v52 }
 0x576   : > { %5995 = vmatprep.mubr.msk.bf16.mxu0 %vm3658_vm12, %v3571_v49 }
 0x57a   : > { %5996 = vmatmul.mubr.msk.bf16.vlgmr.msra.gmra.mrb[4].mxu0 %vm3658_vm12, %v8045_v34  ;;  %v8728_v34 = vmov 0.0|0.0  }
 0x57b   : > { %5999 = vmatprep.mubr.msk.bf16.mxu0 %vm3658_vm12, %v8051_v8  ;;  %6028 = vmatpush3.bf16.msra.mxu0 %v8064_v26  ;;  %v4322_v26 = vld [vmem:[%s8669_s12 + $0x8] sm:$0xff] }
 0x57c   : > { %6029 = vmatprep.subr.bf16.mxu0 %v6304_v1  ;;  %v6084_v56 = vpack.c.bf16 %v4322_v26, %v4321_v38 }
 0x57f   : > { %6030 = vmatpush3.bf16.msra.mxu0 %v6304_v1 }
 0x580   : > { %6031 = vmatprep.subr.bf16.mxu0 %v6305_v53 }
 0x582   : > { %6000 = vmatmul.mubr.msk.bf16.gmra.mrb[8].mxu0 %vm3658_vm12, %v8071_v32 }
 0x583   : > { %6003 = vmatprep.mubr.msk.bf16.mxu0 %vm3658_vm12, %v8074_v2  ;;  %6032 = vmatpush3.bf16.msra.mxu0 %v6305_v53 }
 0x584   : > { %6083 = vmatprep.subr.bf16.mxu0 %v8728_v34 }
 0x58a   : > { %6004 = vmatmul.mubr.msk.bf16.gmra.mrb[12].mxu0 %vm3658_vm12, %v8086_v9 }
 0x58b   : > { %6007 = vmatprep.mubr.msk.bf16.mxu0 %vm3658_vm12, %v8089_v61 }
 0x592   : > { %6008 = vmatmul.mubr.msk.bf16.gmra.mrb[16].mxu0 %vm3658_vm12, %v8100_v6 }
 0x593   : > { %6011 = vmatprep.mubr.msk.bf16.mxu0 %vm3658_vm12, %v8103_v35 }
 0x59a   : > { %6012 = vmatmul.mubr.msk.bf16.gmra.mrb[20].mxu0 %vm3658_vm12, %v8114_v27 }
 0x59b   : > { %6015 = vmatprep.mubr.msk.bf16.mxu0 %vm3658_vm12, %v8117_v24 }
 0x5a2   : > { %6016 = vmatmul.mubr.msk.bf16.gmra.mrb[24].mxu0 %vm3658_vm12, %v3593_v13 }
 0x5a3   : > { %6019 = vmatprep.mubr.msk.bf16.mxu0 %vm3658_vm12, %v3595_v0 }
 0x5aa   : > { %6020 = vmatmul.mubr.msk.bf16.gmra.mrb[28].mxu0 %vm3658_vm12, %v3597_v60 }
 0x5ab   : > { %6023 = vmatprep.mubr.msk.bf16.mxu0 %vm3658_vm12, %v3599_v45 }
 0x5b2   : > { %6024 = vmatmul.mubr.msk.bf16.gmra.mrb[32].mxu0 %vm3658_vm12, %v3601_v37 }
 0x5b3   : > { %6033 = vmatprep.mubr.msk.bf16.mxu0 %vm3658_vm12, %v8051_v8  ;;  %v8729_v8 = vmov 0.0  }
 0x5ba   : > { %6034 = vmatmul.mubr.msk.bf16.vlgmr.msra.gmra.mrb[4].mxu0 %vm3658_vm12, %v8071_v32 }
 0x5bb   : > { %6037 = vmatprep.mubr.msk.bf16.mxu0 %vm3658_vm12, %v8074_v2  ;;  %6085 = vmatpush3.bf16.msra.mxu0 %v6084_v56 }
 0x5bc   : > { %6072 = vmatprep.subr.mxu0 %v8729_v8 }
 0x5c2   : > { %6038 = vmatmul.mubr.msk.bf16.gmra.mrb[8].mxu0 %vm3658_vm12, %v8086_v9 }
 0x5c3   : > { %6041 = vmatprep.mubr.msk.bf16.mxu0 %vm3658_vm12, %v8089_v61 }
 0x5ca   : > { %6042 = vmatmul.mubr.msk.bf16.gmra.mrb[12].mxu0 %vm3658_vm12, %v8100_v6 }
 0x5cb   : > { %6045 = vmatprep.mubr.msk.bf16.mxu0 %vm3658_vm12, %v8103_v35 }
 0x5d2   : > { %6046 = vmatmul.mubr.msk.bf16.gmra.mrb[16].mxu0 %vm3658_vm12, %v8114_v27 }
 0x5d3   : > { %6049 = vmatprep.mubr.msk.bf16.mxu0 %vm3658_vm12, %v8117_v24 }
 0x5da   : > { %6050 = vmatmul.mubr.msk.bf16.gmra.mrb[20].mxu0 %vm3658_vm12, %v3593_v13 }
 0x5db   : > { %6053 = vmatprep.mubr.msk.bf16.mxu0 %vm3658_vm12, %v3595_v0 }
 0x5e2   : > { %6054 = vmatmul.mubr.msk.bf16.gmra.mrb[24].mxu0 %vm3658_vm12, %v3597_v60 }
 0x5e3   : > { %6057 = vmatprep.mubr.msk.bf16.mxu0 %vm3658_vm12, %v3599_v45 }
 0x5ea   : > { %6058 = vmatmul.mubr.msk.bf16.gmra.mrb[28].mxu0 %vm3658_vm12, %v3601_v37 }
 0x5eb   : > { %6061 = vmatprep.mubr.msk.bf16.mxu0 %vm3658_vm12, %v3632_v40 }
 0x5f2   : > { %6062 = vmatmul.mubr.msk.bf16.gmra.mrb[32].mxu0 %vm3658_vm12, %v3571_v49 }
 0x5f3   : > { %6069 = vmatprep.mubr.msk.f32.mxu0 %vm6580_vm0, %v8729_v8 }
 0x68d   : > { %v6035_v36 = vpop.f32.mrb[4].mxu0 }
 0x68e   : > { %v4092_v44 = vpop.f32.mrb[5].mxu0  ;;  %v4259_v32 = vadd.f32 %v6035_v36, %v8220_v21 }
 0x68f   : > { %v4257_v2 = vadd.f32 %v8220_v21, %v4092_v44  ;;  %v6036_v30 = vpop.f32.mrb[6].mxu0 }
 0x690   : > { %v4095_v29 = vpop.f32.mrb[7].mxu0  ;;  %v4260_v54 = vadd.f32 %v6036_v30, %v8220_v21  ;;  %v8228_v39 = vmax.f32 %v4259_v32, 0.0 }
 0x691   : > { %v8224_v47 = vmax.f32 %v4257_v2, 0.0  ;;  %v4258_v25 = vadd.f32 %v8220_v21, %v4095_v29 }
 0x692   : > { %v8234_v55 = vmax.f32 %v4260_v54, 0.0  ;;  %v4331_v31 = vsel %vm779_vm1, %v8228_v39, 0.0 }
 0x693   : > { %v8230_v9 = vmax.f32 %v4258_v25, 0.0  ;;  %v4328_v61 = vsel %vm779_vm1, %v8224_v47, 0.0 }
 0x694   : > { %v4333_v14 = vsel %vm779_vm1, %v8234_v55, 0.0 }
 0x695   : > { %v4329_v12 = vsel %vm779_vm1, %v8230_v9, 0.0  ;;  %v6039_v16 = vpop.f32.mrb[8].mxu0 }
 0x696   : > { %v4330_v57 = vadd.f32 %v4329_v12, %v4328_v61  ;;  %v4108_v3 = vpop.f32.mrb[9].mxu0  ;;  %v4263_v6 = vadd.f32 %v6039_v16, %v8220_v21 }
 0x697   : > { %v4261_v35 = vadd.f32 %v8220_v21, %v4108_v3  ;;  %v6040_v63 = vpop.f32.mrb[10].mxu0 }
 0x698   : > { %v4332_v51 = vadd.f32 %v4331_v31, %v4330_v57  ;;  %v4111_v22 = vpop.f32.mrb[11].mxu0  ;;  %v4264_v59 = vadd.f32 %v6040_v63, %v8220_v21  ;;  %v8248_v48 = vmax.f32 %v4263_v6, 0.0 }
 0x699   : > { %v8244_v11 = vmax.f32 %v4261_v35, 0.0  ;;  %v4262_v27 = vadd.f32 %v8220_v21, %v4111_v22 }
 0x69a   : > { %v4334_v24 = vadd.f32 %v4333_v14, %v4332_v51  ;;  %v8254_v15 = vmax.f32 %v4264_v59, 0.0  ;;  %v4339_v62 = vsel %vm779_vm1, %v8248_v48, 0.0 }
 0x69b   : > { %v4335_v4 = vsel %vm779_vm1, %v8244_v11, 0.0  ;;  %v8252_v41 = vmax.f32 %v4262_v27, 0.0 }
 0x69c   : > { %v4336_v17 = vadd.f32 %v4335_v4, %v4334_v24  ;;  %v4341_v45 = vsel %vm779_vm1, %v8254_v15, 0.0 }
 0x69d   : > { %v4337_v19 = vsel %vm779_vm1, %v8252_v41, 0.0  ;;  %v6043_v13 = vpop.f32.mrb[12].mxu0 }
 0x69e   : > { %v4338_v0 = vadd.f32 %v4337_v19, %v4336_v17  ;;  %v4124_v7 = vpop.f32.mrb[13].mxu0  ;;  %v4267_v23 = vadd.f32 %v6043_v13, %v8220_v21  ;;  %v8311_v19 = vld [vmem:[%s8672_s16] ss:$0 sm:$0xff] }
 0x69f   : > { %v4265_v42 = vadd.f32 %v8220_v21, %v4124_v7  ;;  %v6044_v50 = vpop.f32.mrb[14].mxu0 }
 0x6a0   : > { %v4340_v43 = vadd.f32 %v4339_v62, %v4338_v0  ;;  %v4127_v60 = vpop.f32.mrb[15].mxu0  ;;  %v4268_v5 = vadd.f32 %v6044_v50, %v8220_v21  ;;  %v8268_v33 = vmax.f32 %v4267_v23, 0.0  ;;  %v4562_v50 = vmul.f32 %v8311_v19, %v8224_v47 }
 0x6a1   : > { %v8264_v10 = vmax.f32 %v4265_v42, 0.0  ;;  %v4266_v18 = vadd.f32 %v8220_v21, %v4127_v60 }
 0x6a2   : > { %v4342_v37 = vadd.f32 %v4341_v45, %v4340_v43  ;;  %v8274_v52 = vmax.f32 %v4268_v5, 0.0  ;;  %v4347_v53 = vsel %vm779_vm1, %v8268_v33, 0.0 }
 0x6a3   : > { %v4343_v20 = vsel %vm779_vm1, %v8264_v10, 0.0  ;;  %v8272_v58 = vmax.f32 %v4266_v18, 0.0 }
 0x6a4   : > { %v4344_v40 = vadd.f32 %v4343_v20, %v4342_v37  ;;  %v4349_v44 = vsel %vm779_vm1, %v8274_v52, 0.0 }
 0x6a5   : > { %v4345_v28 = vsel %vm779_vm1, %v8272_v58, 0.0  ;;  %v6047_v46 = vpop.f32.mrb[16].mxu0 }
 0x6a6   : > { %v4346_v49 = vadd.f32 %v4345_v28, %v4344_v40  ;;  %v4140_v1 = vpop.f32.mrb[17].mxu0  ;;  %v4271_v34 = vadd.f32 %v6047_v46, %v8220_v21 }
 0x6a7   : > { %v4269_v38 = vadd.f32 %v8220_v21, %v4140_v1  ;;  %v6048_v26 = vpop.f32.mrb[18].mxu0 }
 0x6a8   : > { %v4348_v56 = vadd.f32 %v4347_v53, %v4346_v49  ;;  %v4143_v36 = vpop.f32.mrb[19].mxu0  ;;  %v4272_v2 = vadd.f32 %v6048_v26, %v8220_v21  ;;  %v8288_v54 = vmax.f32 %v4271_v34, 0.0  ;;  %v4594_v26 = vsel %vm779_vm1, %v4562_v50, 0.0 }
 0x6a9   : > { %v8284_v32 = vmax.f32 %v4269_v38, 0.0  ;;  %v4270_v30 = vadd.f32 %v8220_v21, %v4143_v36 }
 0x6aa   : > { %v4350_v29 = vadd.f32 %v4349_v44, %v4348_v56  ;;  %v8294_v16 = vmax.f32 %v4272_v2, 0.0  ;;  %v4355_v63 = vsel %vm779_vm1, %v8288_v54, 0.0  ;;  %v4563_v56 = vmul.f32 %v8311_v19, %v8230_v9 }
 0x6ab   : > { %v4351_v25 = vsel %vm779_vm1, %v8284_v32, 0.0  ;;  %v8292_v61 = vmax.f32 %v4270_v30, 0.0 }
 0x6ac   : > { %v4352_v12 = vadd.f32 %v4351_v25, %v4350_v29  ;;  %v4357_v27 = vsel %vm779_vm1, %v8294_v16, 0.0  ;;  %v4564_v25 = vmul.f32 %v8311_v19, %v8228_v39 }
 0x6ad   : > { %v4353_v57 = vsel %vm779_vm1, %v8292_v61, 0.0  ;;  %v6051_v3 = vpop.f32.mrb[20].mxu0 }
 0x6ae   : > { %v4354_v31 = vadd.f32 %v4353_v57, %v4352_v12  ;;  %v4275_v6 = vadd.f32 %v6051_v3, %v8220_v21  ;;  %v4156_v35 = vpop.f32.mrb[21].mxu0 }
 0x6af   : > { %v4273_v51 = vadd.f32 %v8220_v21, %v4156_v35  ;;  %v6052_v22 = vpop.f32.mrb[22].mxu0 }
 0x6b0   : > { %v4356_v14 = vadd.f32 %v4355_v63, %v4354_v31  ;;  %v4159_v59 = vpop.f32.mrb[23].mxu0  ;;  %v4276_v4 = vadd.f32 %v6052_v22, %v8220_v21  ;;  %v8313_v13 = vmax.f32 %v4275_v6, 0.0 }
 0x6b1   : > { %v8304_v24 = vmax.f32 %v4273_v51, 0.0  ;;  %v4274_v17 = vadd.f32 %v8220_v21, %v4159_v59 }
 0x6b2   : > { %v4358_v0 = vadd.f32 %v4357_v27, %v4356_v14  ;;  %v8323_v43 = vmax.f32 %v4276_v4, 0.0  ;;  %v4363_v37 = vsel %vm779_vm1, %v8313_v13, 0.0  ;;  %v4580_v53 = vmul.f32 %v8311_v19, %v8313_v13 }
 0x6b3   : > { %v4359_v7 = vsel %vm779_vm1, %v8304_v24, 0.0  ;;  %v8317_v62 = vmax.f32 %v4274_v17, 0.0  ;;  %v4578_v23 = vmul.f32 %v8311_v19, %v8304_v24  ;;  %v4597_v14 = vsel %vm779_vm1, %v4563_v56, 0.0 }
 0x6b4   : > { %v4360_v42 = vadd.f32 %v4359_v7, %v4358_v0  ;;  %v4365_v36 = vsel %vm779_vm1, %v8323_v43, 0.0  ;;  %v4648_v31 = vsel %vm779_vm1, %v4580_v53, 0.0  ;;  %v4581_v35 = vmul.f32 %v8311_v19, %v8323_v43 }
 0x6b5   : > { %v4361_v60 = vsel %vm779_vm1, %v8317_v62, 0.0  ;;  %v6055_v45 = vpop.f32.mrb[24].mxu0  ;;  %v4642_v5 = vsel %vm779_vm1, %v4578_v23, 0.0  ;;  %v4579_v18 = vmul.f32 %v8311_v19, %v8317_v62  ;;  %v4600_v4 = vsel %vm779_vm1, %v4564_v25, 0.0 }
 0x6b6   : > { %v4362_v20 = vadd.f32 %v4361_v60, %v4360_v42  ;;  %4643 = vadd.xlane.f32.xlu0 %v4642_v5  ;;  %v4172_v40 = vpop.f32.mrb[25].mxu0  ;;  %v4279_v28 = vadd.f32 %v6055_v45, %v8220_v21  ;;  %v4651_v45 = vsel %vm779_vm1, %v4581_v35, 0.0  ;;  %v4565_v5 = vmul.f32 %v8311_v19, %v8234_v55 }
 0x6b7   : > { %v4277_v46 = vadd.f32 %v8220_v21, %v4172_v40  ;;  %v6056_v49 = vpop.f32.mrb[26].mxu0  ;;  %v4645_v1 = vsel %vm779_vm1, %v4579_v18, 0.0 }
 0x6b8   : > { %v4364_v34 = vadd.f32 %v4363_v37, %v4362_v20  ;;  %4646 = vadd.xlane.f32.xlu1 %v4645_v1  ;;  %v4175_v38 = vpop.f32.mrb[27].mxu0  ;;  %v4280_v2 = vadd.f32 %v6056_v49, %v8220_v21  ;;  %v8348_v12 = vmax.f32 %v4279_v28, 0.0 }
 0x6b9   : > { %v8342_v44 = vmax.f32 %v4277_v46, 0.0  ;;  %v4278_v30 = vadd.f32 %v8220_v21, %v4175_v38  ;;  %v4566_v46 = vmul.f32 %v8311_v19, %v8244_v11 }
 0x6ba   : > { %v4366_v29 = vadd.f32 %v4365_v36, %v4364_v34  ;;  %4595 = vadd.xlane.f32.xlu0 %v4594_v26  ;;  %v8357_v63 = vmax.f32 %v4280_v2, 0.0  ;;  %v4371_v17 = vsel %vm779_vm1, %v8348_v12, 0.0 }
 0x6bb   : > { %v4367_v57 = vsel %vm779_vm1, %v8342_v44, 0.0  ;;  %v8352_v3 = vmax.f32 %v4278_v30, 0.0  ;;  %v4582_v42 = vmul.f32 %v8311_v19, %v8342_v44  ;;  %v4603_v30 = vsel %vm779_vm1, %v4565_v5, 0.0 }
 0x6bc   : > { %v4368_v6 = vadd.f32 %v4367_v57, %v4366_v29  ;;  %4649 = vadd.xlane.f32.xlu1 %v4648_v31  ;;  %v4373_v18 = vsel %vm779_vm1, %v8357_v63, 0.0  ;;  %v4606_v57 = vsel %vm779_vm1, %v4566_v46, 0.0  ;;  %v4585_v46 = vmul.f32 %v8311_v19, %v8357_v63 }
 0x6bd   : > { %v4369_v51 = vsel %vm779_vm1, %v8352_v3, 0.0  ;;  %v6059_v22 = vpop.f32.mrb[28].mxu0  ;;  %v4654_v34 = vsel %vm779_vm1, %v4582_v42, 0.0  ;;  %v4583_v26 = vmul.f32 %v8311_v19, %v8352_v3 }
 0x6be   : > { %v4370_v59 = vadd.f32 %v4369_v51, %v4368_v6  ;;  %4598 = vadd.xlane.f32.xlu0 %v4597_v14  ;;  %v4188_v27 = vpop.f32.mrb[29].mxu0  ;;  %v4283_v0 = vadd.f32 %v6059_v22, %v8220_v21  ;;  %v4584_v22 = vmul.f32 %v8311_v19, %v8348_v12 }
 0x6bf   : > { %v4281_v7 = vadd.f32 %v8220_v21, %v4188_v27  ;;  %v6060_v23 = vpop.f32.mrb[30].mxu0  ;;  %v4657_v27 = vsel %vm779_vm1, %v4583_v26, 0.0 }
 0x6c0   : > { %v4372_v50 = vadd.f32 %v4371_v17, %v4370_v59  ;;  %4601 = vadd.xlane.f32.xlu1 %v4600_v4  ;;  %v4191_v60 = vpop.f32.mrb[31].mxu0  ;;  %v4284_v20 = vadd.f32 %v6060_v23, %v8220_v21  ;;  %v8380_v49 = vmax.f32 %v4283_v0, 0.0  ;;  %v4567_v4 = vmul.f32 %v8311_v19, %v8252_v41 }
 0x6c1   : > { %v8374_v37 = vmax.f32 %v4281_v7, 0.0  ;;  %v4282_v40 = vadd.f32 %v8220_v21, %v4191_v60 }
 0x6c2   : > { %v4374_v28 = vadd.f32 %v4373_v18, %v4372_v50  ;;  %4652 = vadd.xlane.f32.xlu0 %v4651_v45  ;;  %v8389_v56 = vmax.f32 %v4284_v20, 0.0  ;;  %v4379_v31 = vsel %vm779_vm1, %v8380_v49, 0.0  ;;  %v4568_v50 = vmul.f32 %v8311_v19, %v8248_v48 }
 0x6c3   : > { %v4375_v1 = vsel %vm779_vm1, %v8374_v37, 0.0  ;;  %v8384_v53 = vmax.f32 %v4282_v40, 0.0  ;;  %v4660_v18 = vsel %vm779_vm1, %v4584_v22, 0.0  ;;  %v4586_v26 = vmul.f32 %v8311_v19, %v8374_v37 }
 0x6c4   : > { %v4376_v38 = vadd.f32 %v4375_v1, %v4374_v28  ;;  %4655 = vadd.xlane.f32.xlu1 %v4654_v34  ;;  %v4381_v17 = vsel %vm779_vm1, %v8389_v56, 0.0  ;;  %v4609_v28 = vsel %vm779_vm1, %v4567_v4, 0.0 }
 0x6c5   : > { %v4377_v36 = vsel %vm779_vm1, %v8384_v53, 0.0  ;;  %v6063_v2 = vpop.f32.mrb[32].mxu0 }
 0x6c6   : > { %v4378_v29 = vadd.f32 %v4377_v36, %v4376_v38  ;;  %4604 = vadd.xlane.f32.xlu0 %v4603_v30  ;;  %v4204_v25 = vpop.f32.mrb[33].mxu0  ;;  %v4287_v6 = vadd.f32 %v6063_v2, %v8220_v21  ;;  %v4612_v38 = vsel %vm779_vm1, %v4568_v50, 0.0  ;;  %v4663_v30 = vsel %vm779_vm1, %v4585_v46, 0.0 }
 0x6c7   : > { %v4285_v35 = vadd.f32 %v8220_v21, %v4204_v25  ;;  %v6064_v51 = vpop.f32.mrb[34].mxu0 }
 0x6c8   : > { %v4380_v14 = vadd.f32 %v4379_v31, %v4378_v29  ;;  %4607 = vadd.xlane.f32.xlu1 %v4606_v57  ;;  %v4207_v59 = vpop.f32.mrb[35].mxu0  ;;  %v4288_v7 = vadd.f32 %v6064_v51, %v8220_v21  ;;  %v8412_v60 = vmax.f32 %v4287_v6, 0.0  ;;  %v4569_v29 = vmul.f32 %v8311_v19, %v8254_v15 }
 0x6c9   : > { %v8406_v0 = vmax.f32 %v4285_v35, 0.0  ;;  %v4286_v23 = vadd.f32 %v8220_v21, %v4207_v59  ;;  %v4666_v57 = vsel %vm779_vm1, %v4586_v26, 0.0  ;;  %v4570_v31 = vmul.f32 %v8311_v19, %v8264_v10 }
 0x6ca   : > { %v4382_v42 = vadd.f32 %v4381_v17, %v4380_v14  ;;  %4658 = vadd.xlane.f32.xlu0 %v4657_v27  ;;  %v8419_v40 = vmax.f32 %v4288_v7, 0.0  ;;  %v4387_v34 = vsel %vm779_vm1, %v8412_v60, 0.0  ;;  %v4615_v35 = vsel %vm779_vm1, %v4569_v29, 0.0 }
 0x6cb   : > { %v4383_v45 = vsel %vm779_vm1, %v8406_v0, 0.0  ;;  %v8416_v5 = vmax.f32 %v4286_v23, 0.0  ;;  %v4587_v51 = vmul.f32 %v8311_v19, %v8384_v53  ;;  %v4618_v14 = vsel %vm779_vm1, %v4570_v31, 0.0 }
 0x6cc   : > { %v4384_v20 = vadd.f32 %v4383_v45, %v4382_v42  ;;  %4661 = vadd.xlane.f32.xlu1 %v4660_v18  ;;  %v4389_v2 = vsel %vm779_vm1, %v8419_v40, 0.0  ;;  %v4588_v59 = vmul.f32 %v8311_v19, %v8380_v49  ;;  %v4571_v17 = vmul.f32 %v8311_v19, %v8272_v58 }
 0x6cd   : > { %v4385_v21 = vsel %vm779_vm1, %v8416_v5, 0.0  ;;  %v4669_v4 = vsel %vm779_vm1, %v4587_v51, 0.0  ;;  %v4572_v42 = vmul.f32 %v8311_v19, %v8268_v33  ;;  %v4589_v18 = vmul.f32 %v8311_v19, %v8389_v56 }
 0x6ce   : > { %v4386_v1 = vadd.f32 %v4385_v21, %v4384_v20  ;;  %4610 = vadd.xlane.f32.xlu0 %v4609_v28  ;;  %v4672_v23 = vsel %vm779_vm1, %v4588_v59, 0.0  ;;  %v4621_v45 = vsel %vm779_vm1, %v4571_v17, 0.0  ;;  %v4590_v28 = vmul.f32 %v8311_v19, %v8406_v0  ;;  %v8490_v17 = vld [vmem:[#allocation4] ss:$0 sm:$0xff] }
 0x6cf   : > { %v4624_v21 = vsel %vm779_vm1, %v4572_v42, 0.0  ;;  %v4574_v26 = vmul.f32 %v8311_v19, %v8284_v32  ;;  %v4592_v29 = vmul.f32 %v8311_v19, %v8412_v60  ;;  %v4593_v51 = vmul.f32 %v8311_v19, %v8419_v40 }
 0x6d0   : > { %v4388_v36 = vadd.f32 %v4387_v34, %v4386_v1  ;;  %4613 = vadd.xlane.f32.xlu1 %v4612_v38  ;;  %v4675_v1 = vsel %vm779_vm1, %v4589_v18, 0.0  ;;  %v4573_v34 = vmul.f32 %v8311_v19, %v8274_v52  ;;  %v4678_v38 = vsel %vm779_vm1, %v4590_v28, 0.0 }
 0x6d1   : > { %v4684_v31 = vsel %vm779_vm1, %v4592_v29, 0.0  ;;  %v4577_v59 = vmul.f32 %v8311_v19, %v8294_v16 }
 0x6d2   : > { %v4390_v25 = vadd.f32 %v4389_v2, %v4388_v36  ;;  %4664 = vadd.xlane.f32.xlu0 %v4663_v30  ;;  %v4627_v36 = vsel %vm779_vm1, %v4573_v34, 0.0  ;;  %v4591_v2 = vmul.f32 %v8311_v19, %v8416_v5  ;;  %v4630_v30 = vsel %vm779_vm1, %v4574_v26, 0.0 }
 0x6d4   : > { %v4391_v6 = vrot.slane %v4390_v25, 4  ;;  %4667 = vadd.xlane.f32.xlu1 %v4666_v57  ;;  %v4575_v57 = vmul.f32 %v8311_v19, %v8292_v61 }
 0x6d6   : > { %v4392_v22 = vadd.f32 %v4391_v6, %v4390_v25  ;;  %4616 = vadd.xlane.f32.xlu0 %v4615_v35  ;;  %v4681_v25 = vsel %vm779_vm1, %v4591_v2, 0.0  ;;  %v4576_v6 = vmul.f32 %v8311_v19, %v8288_v54  ;;  %v4633_v35 = vsel %vm779_vm1, %v4575_v57, 0.0 }
 0x6d8   : > { %v4393_v27 = vrot.slane %v4392_v22, 2  ;;  %4619 = vadd.xlane.f32.xlu1 %v4618_v14  ;;  %v4687_v14 = vsel %vm779_vm1, %v4593_v51, 0.0 }
 0x6da   : > { %v4394_v7 = vadd.f32 %v4393_v27, %v4392_v22  ;;  %4670 = vadd.xlane.f32.xlu0 %v4669_v4  ;;  %v4636_v22 = vsel %vm779_vm1, %v4576_v6, 0.0  ;;  %v4639_v27 = vsel %vm779_vm1, %v4577_v59, 0.0  ;;  %v4324_v4 = vld [vmem:[%s8670_s14] sm:$0x1] }
 0x6dc   : > { %v4395_v50 = vrot.slane %v4394_v7, 1  ;;  %4673 = vadd.xlane.f32.xlu1 %v4672_v23 }
 0x6de   : > { %v4396_v20 = vadd.f32 %v4395_v50, %v4394_v7  ;;  %4622 = vadd.xlane.f32.xlu0 %v4621_v45 }
 0x6e0   : > { %v4397_v46 = vmul.f32 0.00390625, %v4396_v20  ;;  %4625 = vadd.xlane.f32.xlu1 %v4624_v21 }
 0x6e2   : > { %4676 = vadd.xlane.f32.xlu0 %v4675_v1  ;;  %6070 = vmatmul.mubr.msk.f32.vlgmr.msra.gmra.mrb[36].mxu0 %vm779_vm1, %v4397_v46 }
 0x6e3   : > { %6074 = vmatprep.mubr.msk.f32.mxu0 %vm6580_vm0, %v8729_v8  ;;  %6073 = vmatpush3.msk.msra.mxu0 %vm1803_vm5, %v4324_v4 }
 0x6e4   : > { %4679 = vadd.xlane.f32.xlu1 %v4678_v38 }
 0x6e6   : > { %4628 = vadd.xlane.f32.xlu0 %v4627_v36 }
 0x6e8   : > { %4631 = vadd.xlane.f32.xlu1 %v4630_v30 }
 0x6ea   : > { %4682 = vadd.xlane.f32.xlu0 %v4681_v25 }
 0x6ec   : > { %4685 = vadd.xlane.f32.xlu1 %v4684_v31 }
 0x6ee   : > { %4634 = vadd.xlane.f32.xlu0 %v4633_v35 }
 0x6f0   : > { %4637 = vadd.xlane.f32.xlu1 %v4636_v22 }
 0x6f2   : > { %4688 = vadd.xlane.f32.xlu0 %v4687_v14 }
 0x6f6   : > { %4640 = vadd.xlane.f32.xlu0 %v4639_v27 }
 0x743   : > { %v4644_v7 = vpop.xlane.xlu0 %4643 }
 0x744   : > { %v4712_v23 = vadd.f32 %v8490_v17, %v4644_v7 }
 0x745   : > { %v4647_v42 = vpop.xlane.xlu1 %4646 }
 0x746   : > { %v4744_v50 = vsub.f32 0.0, %v4712_v23  ;;  %v4713_v45 = vadd.f32 %v8490_v17, %v4647_v42 }
 0x747   : > { %v4596_v19 = vpop.xlane.xlu0 %4595 }
 0x748   : > { %v4792_v18 = vmul.f32 1.442695, %v4744_v50  ;;  %v4745_v20 = vsub.f32 0.0, %v4713_v45  ;;  %v4696_v21 = vadd.f32 %v8490_v17, %v4596_v19 }
 0x749   : > { %v4650_v28 = vpop.xlane.xlu1 %4649 }
 0x74a   : > { %6438 = vpow2.f32 %v4792_v18  ;;  %v4794_v46 = vmul.f32 1.442695, %v4745_v20  ;;  %v4728_v1 = vsub.f32 0.0, %v4696_v21  ;;  %v4714_v34 = vadd.f32 %v8490_v17, %v4650_v28 }
 0x74b   : > { %v4599_v38 = vpop.xlane.xlu0 %4598 }
 0x74c   : > { %6440 = vpow2.f32 %v4794_v46  ;;  %v4760_v26 = vmul.f32 1.442695, %v4728_v1  ;;  %v4746_v36 = vsub.f32 0.0, %v4714_v34  ;;  %v4697_v2 = vadd.f32 %v8490_v17, %v4599_v38 }
 0x74d   : > { %v4602_v30 = vpop.xlane.xlu1 %4601 }
 0x74e   : > { %6442 = vpow2.f32 %v4760_v26  ;;  %v4796_v29 = vmul.f32 1.442695, %v4746_v36  ;;  %v4729_v25 = vsub.f32 0.0, %v4697_v2  ;;  %v4698_v57 = vadd.f32 %v8490_v17, %v4602_v30 }
 0x74f   : > { %v4653_v31 = vpop.xlane.xlu0 %4652 }
 0x750   : > { %6444 = vpow2.f32 %v4796_v29  ;;  %v4762_v6 = vmul.f32 1.442695, %v4729_v25  ;;  %v4730_v35 = vsub.f32 0.0, %v4698_v57  ;;  %v4715_v51 = vadd.f32 %v8490_v17, %v4653_v31 }
 0x751   : > { %v4656_v22 = vpop.xlane.xlu1 %4655 }
 0x752   : > { %6446 = vpow2.f32 %v4762_v6  ;;  %v4764_v14 = vmul.f32 1.442695, %v4730_v35  ;;  %v4747_v59 = vsub.f32 0.0, %v4715_v51  ;;  %v4716_v27 = vadd.f32 %v8490_v17, %v4656_v22 }
 0x753   : > { %v4605_v4 = vpop.xlane.xlu0 %4604 }
 0x754   : > { %v6439_v7 = vpop.eup %6438  ;;  %6448 = vpow2.f32 %v4764_v14  ;;  %v4798_v23 = vmul.f32 1.442695, %v4747_v59  ;;  %v4748_v42 = vsub.f32 0.0, %v4716_v27  ;;  %v4699_v50 = vadd.f32 %v8490_v17, %v4605_v4 }
 0x755   : > { %v4840_v45 = vadd.f32 1.0, %v6439_v7  ;;  %v4608_v19 = vpop.xlane.xlu1 %4607 }
 0x756   : > { %v6441_v18 = vpop.eup %6440  ;;  %6450 = vpow2.f32 %v4798_v23  ;;  %v4800_v20 = vmul.f32 1.442695, %v4748_v42  ;;  %v4731_v21 = vsub.f32 0.0, %v4699_v50  ;;  %v4700_v28 = vadd.f32 %v8490_v17, %v4608_v19 }
 0x757   : > { %6452 = vrcp.f32 %v4840_v45  ;;  %v4841_v46 = vadd.f32 1.0, %v6441_v18  ;;  %v4659_v1 = vpop.xlane.xlu0 %4658 }
 0x758   : > { %v6443_v34 = vpop.eup %6442  ;;  %6454 = vpow2.f32 %v4800_v20  ;;  %v4766_v38 = vmul.f32 1.442695, %v4731_v21  ;;  %v4732_v26 = vsub.f32 0.0, %v4700_v28  ;;  %v4717_v36 = vadd.f32 %v8490_v17, %v4659_v1 }
 0x759   : > { %6456 = vrcp.f32 %v4841_v46  ;;  %v4824_v2 = vadd.f32 1.0, %v6443_v34  ;;  %v4662_v30 = vpop.xlane.xlu1 %4661 }
 0x75a   : > { %v6445_v29 = vpop.eup %6444  ;;  %6458 = vpow2.f32 %v4766_v38  ;;  %v4768_v25 = vmul.f32 1.442695, %v4732_v26  ;;  %v4749_v57 = vsub.f32 0.0, %v4717_v36  ;;  %v4718_v31 = vadd.f32 %v8490_v17, %v4662_v30 }
 0x75b   : > { %6460 = vrcp.f32 %v4824_v2  ;;  %v4842_v6 = vadd.f32 1.0, %v6445_v29  ;;  %v4611_v35 = vpop.xlane.xlu0 %4610 }
 0x75c   : > { %v6447_v51 = vpop.eup %6446  ;;  %6462 = vpow2.f32 %v4768_v25  ;;  %v4802_v22 = vmul.f32 1.442695, %v4749_v57  ;;  %v4750_v14 = vsub.f32 0.0, %v4718_v31  ;;  %v4701_v59 = vadd.f32 %v8490_v17, %v4611_v35 }
 0x75d   : > { %6464 = vrcp.f32 %v4842_v6  ;;  %v4825_v27 = vadd.f32 1.0, %v6447_v51  ;;  %v4614_v4 = vpop.xlane.xlu1 %4613 }
 0x75e   : > { %v6449_v7 = vpop.eup %6448  ;;  %6466 = vpow2.f32 %v4802_v22  ;;  %v4804_v23 = vmul.f32 1.442695, %v4750_v14  ;;  %v4733_v42 = vsub.f32 0.0, %v4701_v59  ;;  %v4702_v50 = vadd.f32 %v8490_v17, %v4614_v4 }
 0x75f   : > { %6468 = vrcp.f32 %v4825_v27  ;;  %v4826_v45 = vadd.f32 1.0, %v6449_v7  ;;  %v4665_v19 = vpop.xlane.xlu0 %4664 }
 0x760   : > { %v6451_v18 = vpop.eup %6450  ;;  %6470 = vpow2.f32 %v4804_v23  ;;  %v4770_v20 = vmul.f32 1.442695, %v4733_v42  ;;  %v4734_v21 = vsub.f32 0.0, %v4702_v50  ;;  %v4719_v28 = vadd.f32 %v8490_v17, %v4665_v19 }
 0x761   : > { %v6453_v46 = vpop.eup %6452  ;;  %6472 = vrcp.f32 %v4826_v45  ;;  %v4843_v1 = vadd.f32 1.0, %v6451_v18  ;;  %v4668_v34 = vpop.xlane.xlu1 %4667 }
 0x762   : > { %v6455_v38 = vpop.eup %6454  ;;  %6474 = vpow2.f32 %v4770_v20  ;;  %v4772_v26 = vmul.f32 1.442695, %v4734_v21  ;;  %v4751_v36 = vsub.f32 0.0, %v4719_v28  ;;  %v4720_v2 = vadd.f32 %v8490_v17, %v4668_v34  ;;  %5006 = vperm.xlu1 %6277, %v6453_v46  }
 0x763   : > { %v6457_v30 = vpop.eup %6456  ;;  %6476 = vrcp.f32 %v4843_v1  ;;  %v4844_v29 = vadd.f32 1.0, %v6455_v38  ;;  %v4617_v25 = vpop.xlane.xlu0 %4616 }
 0x764   : > { %v6459_v57 = vpop.eup %6458  ;;  %6478 = vpow2.f32 %v4772_v26  ;;  %v4806_v31 = vmul.f32 1.442695, %v4751_v36  ;;  %v4752_v6 = vsub.f32 0.0, %v4720_v2  ;;  %v4703_v35 = vadd.f32 %v8490_v17, %v4617_v25  ;;  %5011 = vperm.xlu0 %6278, %v6457_v30  }
 0x765   : > { %v6461_v51 = vpop.eup %6460  ;;  %6480 = vrcp.f32 %v4844_v29  ;;  %v4827_v22 = vadd.f32 1.0, %v6459_v57  ;;  %v4620_v14 = vpop.xlane.xlu1 %4619 }
 0x766   : > { %v6463_v59 = vpop.eup %6462  ;;  %6482 = vpow2.f32 %v4806_v31  ;;  %v4808_v27 = vmul.f32 1.442695, %v4752_v6  ;;  %v4735_v4 = vsub.f32 0.0, %v4703_v35  ;;  %v4704_v7 = vadd.f32 %v8490_v17, %v4620_v14  ;;  %4926 = vperm.xlu1 %6277, %v6461_v51  }
 0x767   : > { %v6465_v23 = vpop.eup %6464  ;;  %6484 = vrcp.f32 %v4827_v22  ;;  %v4828_v42 = vadd.f32 1.0, %v6463_v59  ;;  %v4671_v50 = vpop.xlane.xlu0 %4670 }
 0x768   : > { %v6467_v45 = vpop.eup %6466  ;;  %6486 = vpow2.f32 %v4808_v27  ;;  %v4774_v19 = vmul.f32 1.442695, %v4735_v4  ;;  %v4736_v18 = vsub.f32 0.0, %v4704_v7  ;;  %v4721_v20 = vadd.f32 %v8490_v17, %v4671_v50  ;;  %5016 = vperm.xlu0 %6278, %v6465_v23  }
 0x769   : > { %v6469_v21 = vpop.eup %6468  ;;  %6488 = vrcp.f32 %v4828_v42  ;;  %v4845_v28 = vadd.f32 1.0, %v6467_v45  ;;  %v4674_v46 = vpop.xlane.xlu1 %4673 }
 0x76a   : > { %v6471_v1 = vpop.eup %6470  ;;  %6490 = vpow2.f32 %v4774_v19  ;;  %v4776_v34 = vmul.f32 1.442695, %v4736_v18  ;;  %v4753_v38 = vsub.f32 0.0, %v4721_v20  ;;  %v4722_v26 = vadd.f32 %v8490_v17, %v4674_v46  ;;  %4931 = vperm.xlu1 %6277, %v6469_v21  }
 0x76b   : > { %v6473_v36 = vpop.eup %6472  ;;  %6492 = vrcp.f32 %v4845_v28  ;;  %v4846_v2 = vadd.f32 1.0, %v6471_v1  ;;  %v4623_v30 = vpop.xlane.xlu0 %4622 }
 0x76c   : > { %v6475_v29 = vpop.eup %6474  ;;  %6494 = vpow2.f32 %v4776_v34  ;;  %v4810_v25 = vmul.f32 1.442695, %v4753_v38  ;;  %v4754_v57 = vsub.f32 0.0, %v4722_v26  ;;  %v4705_v31 = vadd.f32 %v8490_v17, %v4623_v30  ;;  %4936 = vperm.xlu0 %6278, %v6473_v36  }
 0x76d   : > { %v6477_v6 = vpop.eup %6476  ;;  %6496 = vrcp.f32 %v4846_v2  ;;  %v4829_v35 = vadd.f32 1.0, %v6475_v29  ;;  %v4626_v51 = vpop.xlane.xlu1 %4625 }
 0x76e   : > { %v6479_v22 = vpop.eup %6478  ;;  %6498 = vpow2.f32 %v4810_v25  ;;  %v4812_v14 = vmul.f32 1.442695, %v4754_v57  ;;  %v4737_v59 = vsub.f32 0.0, %v4705_v31  ;;  %v4706_v27 = vadd.f32 %v8490_v17, %v4626_v51  ;;  %5021 = vperm.xlu1 %6277, %v6477_v6  }
 0x76f   : > { %v6481_v4 = vpop.eup %6480  ;;  %6500 = vrcp.f32 %v4829_v35  ;;  %v4830_v7 = vadd.f32 1.0, %v6479_v22  ;;  %v4677_v23 = vpop.xlane.xlu0 %4676 }
 0x770   : > { %v6483_v42 = vpop.eup %6482  ;;  %6502 = vpow2.f32 %v4812_v14  ;;  %v4778_v50 = vmul.f32 1.442695, %v4737_v59  ;;  %v4738_v45 = vsub.f32 0.0, %v4706_v27  ;;  %v4723_v19 = vadd.f32 %v8490_v17, %v4677_v23  ;;  %5026 = vperm.xlu0 %6278, %v6481_v4  }
 0x771   : > { %v6485_v18 = vpop.eup %6484  ;;  %6504 = vrcp.f32 %v4830_v7  ;;  %v4847_v20 = vadd.f32 1.0, %v6483_v42  ;;  %v4680_v21 = vpop.xlane.xlu1 %4679 }
 0x772   : > { %v6487_v28 = vpop.eup %6486  ;;  %6506 = vpow2.f32 %v4778_v50  ;;  %v4780_v46 = vmul.f32 1.442695, %v4738_v45  ;;  %v4755_v1 = vsub.f32 0.0, %v4723_v19  ;;  %v4724_v34 = vadd.f32 %v8490_v17, %v4680_v21  ;;  %4941 = vperm.xlu1 %6277, %v6485_v18  }
 0x773   : > { %v6489_v38 = vpop.eup %6488  ;;  %6508 = vrcp.f32 %v4847_v20  ;;  %v4848_v26 = vadd.f32 1.0, %v6487_v28  ;;  %v4629_v36 = vpop.xlane.xlu0 %4628 }
 0x774   : > { %v6491_v2 = vpop.eup %6490  ;;  %6510 = vpow2.f32 %v4780_v46  ;;  %v4814_v30 = vmul.f32 1.442695, %v4755_v1  ;;  %v4756_v29 = vsub.f32 0.0, %v4724_v34  ;;  %v4707_v25 = vadd.f32 %v8490_v17, %v4629_v36  ;;  %4946 = vperm.xlu0 %6278, %v6489_v38  }
 0x775   : > { %v6493_v57 = vpop.eup %6492  ;;  %6512 = vrcp.f32 %v4848_v26  ;;  %v4831_v31 = vadd.f32 1.0, %v6491_v2  ;;  %v4632_v6 = vpop.xlane.xlu1 %4631 }
 0x776   : > { %v6495_v35 = vpop.eup %6494  ;;  %6514 = vpow2.f32 %v4814_v30  ;;  %v4816_v51 = vmul.f32 1.442695, %v4756_v29  ;;  %v4739_v22 = vsub.f32 0.0, %v4707_v25  ;;  %v4708_v14 = vadd.f32 %v8490_v17, %v4632_v6  ;;  %5031 = vperm.xlu1 %6277, %v6493_v57  }
 0x777   : > { %v6497_v59 = vpop.eup %6496  ;;  %6516 = vrcp.f32 %v4831_v31  ;;  %v4832_v27 = vadd.f32 1.0, %v6495_v35  ;;  %v4683_v4 = vpop.xlane.xlu0 %4682 }
 0x778   : > { %v6499_v7 = vpop.eup %6498  ;;  %6518 = vpow2.f32 %v4816_v51  ;;  %v4782_v23 = vmul.f32 1.442695, %v4739_v22  ;;  %v4740_v42 = vsub.f32 0.0, %v4708_v14  ;;  %v4725_v50 = vadd.f32 %v8490_v17, %v4683_v4  ;;  %5036 = vperm.xlu0 %6278, %v6497_v59  }
 0x779   : > { %v6501_v45 = vpop.eup %6500  ;;  %6520 = vrcp.f32 %v4832_v27  ;;  %v4849_v19 = vadd.f32 1.0, %v6499_v7  ;;  %v4686_v18 = vpop.xlane.xlu1 %4685 }
 0x77a   : > { %v6503_v20 = vpop.eup %6502  ;;  %6522 = vpow2.f32 %v4782_v23  ;;  %v4784_v21 = vmul.f32 1.442695, %v4740_v42  ;;  %v4757_v28 = vsub.f32 0.0, %v4725_v50  ;;  %v4726_v46 = vadd.f32 %v8490_v17, %v4686_v18  ;;  %4951 = vperm.xlu1 %6277, %v6501_v45  }
 0x77b   : > { %v6505_v1 = vpop.eup %6504  ;;  %6524 = vrcp.f32 %v4849_v19  ;;  %v4850_v34 = vadd.f32 1.0, %v6503_v20  ;;  %v4635_v38 = vpop.xlane.xlu0 %4634 }
 0x77c   : > { %v6507_v26 = vpop.eup %6506  ;;  %6526 = vpow2.f32 %v4784_v21  ;;  %v4818_v36 = vmul.f32 1.442695, %v4757_v28  ;;  %v4758_v2 = vsub.f32 0.0, %v4726_v46  ;;  %v4709_v30 = vadd.f32 %v8490_v17, %v4635_v38  ;;  %4956 = vperm.xlu0 %6278, %v6505_v1  }
 0x77d   : > { %v6509_v29 = vpop.eup %6508  ;;  %6528 = vrcp.f32 %v4850_v34  ;;  %v4833_v25 = vadd.f32 1.0, %v6507_v26  ;;  %v4638_v57 = vpop.xlane.xlu1 %4637 }
 0x77e   : > { %v6511_v31 = vpop.eup %6510  ;;  %6530 = vpow2.f32 %v4818_v36  ;;  %v4820_v6 = vmul.f32 1.442695, %v4758_v2  ;;  %v4741_v35 = vsub.f32 0.0, %v4709_v30  ;;  %v4710_v51 = vadd.f32 %v8490_v17, %v4638_v57  ;;  %5041 = vperm.xlu1 %6277, %v6509_v29  }
 0x77f   : > { %v6513_v22 = vpop.eup %6512  ;;  %6532 = vrcp.f32 %v4833_v25  ;;  %v4834_v14 = vadd.f32 1.0, %v6511_v31  ;;  %v4689_v59 = vpop.xlane.xlu0 %4688 }
 0x780   : > { %v6515_v27 = vpop.eup %6514  ;;  %6534 = vpow2.f32 %v4820_v6  ;;  %v4786_v4 = vmul.f32 1.442695, %v4741_v35  ;;  %v4742_v7 = vsub.f32 0.0, %v4710_v51  ;;  %v4727_v23 = vadd.f32 %v8490_v17, %v4689_v59  ;;  %5046 = vperm.xlu0 %6278, %v6513_v22  }
 0x781   : > { %v6517_v42 = vpop.eup %6516  ;;  %6536 = vrcp.f32 %v4834_v14  ;;  %v4851_v50 = vadd.f32 1.0, %v6515_v27 }
 0x782   : > { %v6519_v45 = vpop.eup %6518  ;;  %6538 = vpow2.f32 %v4786_v4  ;;  %v4788_v19 = vmul.f32 1.442695, %v4742_v7  ;;  %v4759_v18 = vsub.f32 0.0, %v4727_v23  ;;  %4961 = vperm.xlu1 %6277, %v6517_v42  }
 0x783   : > { %v6521_v20 = vpop.eup %6520  ;;  %6540 = vrcp.f32 %v4851_v50  ;;  %v4852_v21 = vadd.f32 1.0, %v6519_v45  ;;  %v4641_v28 = vpop.xlane.xlu0 %4640 }
 0x784   : > { %v6523_v46 = vpop.eup %6522  ;;  %6542 = vpow2.f32 %v4788_v19  ;;  %v4822_v1 = vmul.f32 1.442695, %v4759_v18  ;;  %v4711_v34 = vadd.f32 %v8490_v17, %v4641_v28  ;;  %4966 = vperm.xlu0 %6278, %v6521_v20  }
 0x785   : > { %v6525_v38 = vpop.eup %6524  ;;  %6544 = vrcp.f32 %v4852_v21  ;;  %v4835_v26 = vadd.f32 1.0, %v6523_v46 }
 0x786   : > { %v6527_v36 = vpop.eup %6526  ;;  %6546 = vpow2.f32 %v4822_v1  ;;  %v4743_v2 = vsub.f32 0.0, %v4711_v34  ;;  %5051 = vperm.xlu1 %6277, %v6525_v38   ;;  %v4323_v38 = vld [vmem:[#allocation3] sm:$0x1] }
 0x787   : > { %v6529_v30 = vpop.eup %6528  ;;  %6548 = vrcp.f32 %v4835_v26  ;;  %v4836_v29 = vadd.f32 1.0, %v6527_v36 }
 0x788   : > { %v6531_v25 = vpop.eup %6530  ;;  %v4790_v57 = vmul.f32 1.442695, %v4743_v2  ;;  %5056 = vperm.xlu0 %6278, %v6529_v30  }
 0x789   : > { %v6533_v31 = vpop.eup %6532  ;;  %6550 = vrcp.f32 %v4836_v29  ;;  %v4853_v6 = vadd.f32 1.0, %v6531_v25  ;;  %v8730_v29 = vlaneseq }
 0x78a   : > { %v6535_v35 = vpop.eup %6534  ;;  %6552 = vpow2.f32 %v4790_v57  ;;  %4971 = vperm.xlu1 %6277, %v6533_v31   ;;  %v8731_v57 = vld [vmem:[#allocation16_spill] sm:$0xff] }
 0x78b   : > { %v6537_v17 = vpop.eup %6536  ;;  %6554 = vrcp.f32 %v4853_v6  ;;  %v4854_v51 = vadd.f32 1.0, %v6535_v35  ;;  %v8525_v25 = vand.u32 127, %v8730_v29  ;;  %v4325_v6 = vld [vmem:[%s8671_s15] sm:$0x1] }
 0x78c   : > { %v6539_v22 = vpop.eup %6538  ;;  %4976 = vperm.xlu0 %6278, %v6537_v17  }
 0x78d   : > { %v6541_v14 = vpop.eup %6540  ;;  %6556 = vrcp.f32 %v4854_v51  ;;  %v4837_v59 = vadd.f32 1.0, %v6539_v22  ;;  %vm5153_vm14 = vcmp.eq.s32.totalorder %v8731_v57, %v8525_v25 }
 0x78e   : > { %v6543_v27 = vpop.eup %6542  ;;  %5061 = vperm.xlu1 %6277, %v6541_v14   ;;  %v8530_v31 = vsel %vm5153_vm14, 1.0, %v8729_v8 }
 0x78f   : > { %v6545_v4 = vpop.eup %6544  ;;  %6558 = vrcp.f32 %v4837_v59  ;;  %v4838_v7 = vadd.f32 1.0, %v6543_v27  ;;  %5799 = vmatprep.mubr.msk.f32.mxu1 %vm779_vm1, %v8530_v31 }
 0x790   : > { %v6547_v23 = vpop.eup %6546  ;;  %5066 = vperm.xlu0 %6278, %v6545_v4  }
 0x791   : > { %v6549_v42 = vpop.eup %6548  ;;  %6560 = vrcp.f32 %v4838_v7  ;;  %v4855_v50 = vadd.f32 1.0, %v6547_v23 }
 0x792   : > { %4981 = vperm.xlu1 %6277, %v6549_v42  }
 0x793   : > { %v6551_v45 = vpop.eup %6550  ;;  %6562 = vrcp.f32 %v4855_v50 }
 0x794   : > { %v6553_v19 = vpop.eup %6552  ;;  %4986 = vperm.xlu0 %6278, %v6551_v45  }
 0x795   : > { %v6555_v18 = vpop.eup %6554  ;;  %v4839_v20 = vadd.f32 1.0, %v6553_v19 }
 0x796   : > { %5071 = vperm.xlu1 %6277, %v6555_v18  }
 0x797   : > { %v6557_v21 = vpop.eup %6556  ;;  %6564 = vrcp.f32 %v4839_v20 }
 0x798   : > { %5076 = vperm.xlu0 %6278, %v6557_v21  }
 0x799   : > { %v6559_v28 = vpop.eup %6558 }
 0x79a   : > { %4991 = vperm.xlu1 %6277, %v6559_v28  }
 0x79b   : > { %v6561_v46 = vpop.eup %6560 }
 0x79c   : > { %4996 = vperm.xlu0 %6278, %v6561_v46  }
 0x79d   : > { %v6563_v1 = vpop.eup %6562 }
 0x79e   : > { %5081 = vperm.xlu1 %6277, %v6563_v1  }
 0x7a1   : > { %v6565_v34 = vpop.eup %6564 }
 0x7a2   : > { %5001 = vperm.xlu1 %6277, %v6565_v34   ;;  %v8732_v34 = vsub.s32 0, %v8731_v57 }
 0x7b5   : > { %v4467_v26 = vpop.f32.mrb[36].mxu0 }
 0x7b6   : > { %v4468_v36 = vadd.f32 %v4467_v26, %v4323_v38  ;;  %v6071_v2 = vpop.f32.mrb[37].mxu0 }
 0x7b8   : > { %v4471_v30 = vmax.f32 %v4468_v36, 0.0 }
 0x7ba   : > { %6075 = vmatmul.mubr.msk.f32.vlgmr.msra.gmra.mrb[38].mxu0 %vm4472_vm13, %v4471_v30 }
 0x7e1   : > { %v5007_v35 = vpop.permute.xlu1 %5006 }
 0x7e3   : > { %v5012_v4 = vpop.permute.xlu0 %5011 }
 0x7e5   : > { %v4927_v27 = vpop.permute.xlu1 %4926 }
 0x7e7   : > { %v5017_v42 = vpop.permute.xlu0 %5016 }
 0x7e9   : > { %v4932_v7 = vpop.permute.xlu1 %4931 }
 0x7eb   : > { %v4937_v19 = vpop.permute.xlu0 %4936 }
 0x7ed   : > { %v5022_v50 = vpop.permute.xlu1 %5021 }
 0x7ef   : > { %v5027_v20 = vpop.permute.xlu0 %5026 }
 0x7f1   : > { %v4942_v18 = vpop.permute.xlu1 %4941 }
 0x7f3   : > { %v4947_v46 = vpop.permute.xlu0 %4946 }
 0x7f5   : > { %v5032_v21 = vpop.permute.xlu1 %5031 }
 0x7f7   : > { %v5037_v29 = vpop.permute.xlu0 %5036 }
 0x7f9   : > { %v4952_v1 = vpop.permute.xlu1 %4951 }
 0x88d   : > { %v4546_v17 = vpop.f32.mrb[38].mxu0 }
 0x88e   : > { %v4547_v51 = vadd.f32 %v4546_v17, %v4325_v6  ;;  %v6076_v22 = vpop.f32.mrb[39].mxu0  ;;  %v5042_v6 = vpop.permute.xlu1 %5041 }
 0x890   : > { %v4550_v14 = vsub.f32 0.0, %v4547_v51 }
 0x892   : > { %v4551_v59 = vmul.f32 1.442695, %v4550_v14 }
 0x894   : > { %6566 = vpow2.f32 %v4551_v59 }
 0x89e   : > { %v6567_v23 = vpop.eup %6566 }
 0x89f   : > { %v4553_v45 = vadd.f32 1.0, %v6567_v23  ;;  %v4957_v23 = vpop.permute.xlu0 %4956 }
 0x8a1   : > { %6568 = vrcp.f32 %v4553_v45 }
 0x8a3   : > { %v5047_v45 = vpop.permute.xlu0 %5046 }
 0x8ab   : > { %v6569_v28 = vpop.eup %6568 }
 0x8ac   : > { %v8539_v38 = vrot.slane %v6569_v28, %v8732_v34 }
 0x8ae   : > { %v5084_v26 = vadd.f32 %v4927_v27, %v8539_v38  ;;  %v5085_v36 = vadd.f32 %v4932_v7, %v8539_v38  ;;  %v5100_v2 = vadd.f32 %v5007_v35, %v8539_v38  ;;  %v5101_v30 = vadd.f32 %v5012_v4, %v8539_v38  ;;  %v4962_v4 = vpop.permute.xlu1 %4961 }
 0x8af   : > { %v5102_v17 = vadd.f32 %v5017_v42, %v8539_v38  ;;  %v5103_v51 = vadd.f32 %v5022_v50, %v8539_v38  ;;  %v5088_v34 = vadd.f32 %v4947_v46, %v8539_v38 }
 0x8b0   : > { %v5116_v22 = vmul.f32 %v5084_v26, %v8224_v47  ;;  %v5117_v14 = vmul.f32 %v5085_v36, %v8230_v9  ;;  %v5132_v59 = vmul.f32 %v5100_v2, %v8304_v24  ;;  %v5133_v27 = vmul.f32 %v5101_v30, %v8317_v62 }
 0x8b1   : > { %v5134_v7 = vmul.f32 %v5102_v17, %v8313_v13  ;;  %v5135_v35 = vmul.f32 %v5103_v51, %v8323_v43  ;;  %v5086_v9 = vadd.f32 %v4937_v19, %v8539_v38  ;;  %v5087_v24 = vadd.f32 %v4942_v18, %v8539_v38  ;;  %v4967_v51 = vpop.permute.xlu0 %4966 }
 0x8b2   : > { %v6086_v50 = vpack.c.bf16 %v5133_v27, %v5132_v59  ;;  %v6089_v47 = vpack.c.bf16 %v5117_v14, %v5116_v22  ;;  %v5104_v62 = vadd.f32 %v5027_v20, %v8539_v38  ;;  %v5105_v13 = vadd.f32 %v5032_v21, %v8539_v38  ;;  %v5052_v28 = vpop.permute.xlu1 %5051 }
 0x8b3   : > { %v6092_v43 = vpack.c.bf16 %v5135_v35, %v5134_v7  ;;  %v5118_v19 = vmul.f32 %v5086_v9, %v8228_v39  ;;  %v5119_v18 = vmul.f32 %v5087_v24, %v8234_v55  ;;  %v5089_v26 = vadd.f32 %v4952_v1, %v8539_v38 }
 0x8b4   : > { %6088 = vmatprep.subr.msk.bf16.mxu1 %vm8555_vm15, %v6086_v50  ;;  %v5136_v20 = vmul.f32 %v5104_v62, %v8342_v44  ;;  %v5137_v21 = vmul.f32 %v5105_v13, %v8352_v3  ;;  %v5106_v2 = vadd.f32 %v5037_v29, %v8539_v38  ;;  %v5107_v30 = vadd.f32 %v5042_v6, %v8539_v38 }
 0x8b5   : > { %6091 = vmatpush3.bf16.xpose.msk.msra.mxu1 %vm8555_vm15, %v6089_v47  ;;  %v6095_v36 = vpack.c.bf16 %v5119_v18, %v5118_v19  ;;  %v5120_v39 = vmul.f32 %v5088_v34, %v8244_v11  ;;  %v5121_v55 = vmul.f32 %v5089_v26, %v8252_v41  ;;  %v5057_v46 = vpop.permute.xlu0 %5056  ;;  %v5090_v29 = vadd.f32 %v4957_v23, %v8539_v38 }
 0x8b6   : > { %6094 = vmatprep.subr.msk.bf16.mxu1 %vm8555_vm15, %v6092_v43  ;;  %v6098_v17 = vpack.c.bf16 %v5137_v21, %v5136_v20  ;;  %v4972_v22 = vpop.permute.xlu1 %4971  ;;  %v5138_v44 = vmul.f32 %v5106_v2, %v8348_v12  ;;  %v5139_v3 = vmul.f32 %v5107_v30, %v8357_v63  ;;  %v5091_v6 = vadd.f32 %v4962_v4, %v8539_v38 }
 0x8b7   : > { %v6101_v14 = vpack.c.bf16 %v5121_v55, %v5120_v39  ;;  %v5108_v59 = vadd.f32 %v5047_v45, %v8539_v38  ;;  %v5109_v27 = vadd.f32 %v5052_v28, %v8539_v38  ;;  %v5122_v11 = vmul.f32 %v5090_v29, %v8248_v48 }
 0x8b8   : > { %v6104_v7 = vpack.c.bf16 %v5139_v3, %v5138_v44  ;;  %v5123_v41 = vmul.f32 %v5091_v6, %v8254_v15  ;;  %v5092_v4 = vadd.f32 %v4967_v51, %v8539_v38  ;;  %v5093_v50 = vadd.f32 %v4972_v22, %v8539_v38 }
 0x8b9   : > { %v5140_v12 = vmul.f32 %v5108_v59, %v8374_v37  ;;  %v5141_v63 = vmul.f32 %v5109_v27, %v8384_v53  ;;  %v4977_v35 = vpop.permute.xlu0 %4976  ;;  %v5110_v9 = vadd.f32 %v5057_v46, %v8539_v38 }
 0x8ba   : > { %v5062_v1 = vpop.permute.xlu1 %5061  ;;  %v6107_v47 = vpack.c.bf16 %v5123_v41, %v5122_v11  ;;  %v5124_v37 = vmul.f32 %v5092_v4, %v8264_v10  ;;  %v5125_v53 = vmul.f32 %v5093_v50, %v8272_v58  ;;  %v5094_v45 = vadd.f32 %v4977_v35, %v8539_v38 }
 0x8bb   : > { %v5111_v24 = vadd.f32 %v5062_v1, %v8539_v38  ;;  %v6110_v62 = vpack.c.bf16 %v5141_v63, %v5140_v12  ;;  %v5142_v13 = vmul.f32 %v5110_v9, %v8380_v49 }
 0x8bc   : > { %v6113_v19 = vpack.c.bf16 %v5125_v53, %v5124_v37  ;;  %v5126_v10 = vmul.f32 %v5094_v45, %v8268_v33 }
 0x8bd   : > { %6097 = vmatpush3.bf16.xpose.msk.msra.mxu1 %vm8555_vm15, %v6095_v36  ;;  %v5067_v48 = vpop.permute.xlu0 %5066  ;;  %v5143_v43 = vmul.f32 %v5111_v24, %v8389_v56 }
 0x8be   : > { %6100 = vmatprep.subr.msk.bf16.mxu1 %vm8555_vm15, %v6098_v17  ;;  %v4982_v23 = vpop.permute.xlu1 %4981  ;;  %v5112_v18 = vadd.f32 %v5067_v48, %v8539_v38 }
 0x8bf   : > { %v5095_v28 = vadd.f32 %v4982_v23, %v8539_v38  ;;  %v6116_v21 = vpack.c.bf16 %v5143_v43, %v5142_v13 }
 0x8c0   : > { %v5144_v49 = vmul.f32 %v5112_v18, %v8406_v0 }
 0x8c1   : > { %v4987_v34 = vpop.permute.xlu0 %4986  ;;  %v5127_v58 = vmul.f32 %v5095_v28, %v8274_v52 }
 0x8c2   : > { %v5072_v15 = vpop.permute.xlu1 %5071  ;;  %v5096_v30 = vadd.f32 %v4987_v34, %v8539_v38 }
 0x8c3   : > { %v5113_v20 = vadd.f32 %v5072_v15, %v8539_v38  ;;  %v6119_v51 = vpack.c.bf16 %v5127_v58, %v5126_v10 }
 0x8c4   : > { %v5128_v33 = vmul.f32 %v5096_v30, %v8284_v32 }
 0x8c5   : > { %6103 = vmatpush3.bf16.xpose.msk.msra.mxu1 %vm8555_vm15, %v6101_v14  ;;  %v5145_v56 = vmul.f32 %v5113_v20, %v8416_v5  ;;  %v5077_v36 = vpop.permute.xlu0 %5076 }
 0x8c6   : > { %6106 = vmatprep.subr.msk.bf16.mxu1 %vm8555_vm15, %v6104_v7  ;;  %v4992_v26 = vpop.permute.xlu1 %4991  ;;  %v5114_v22 = vadd.f32 %v5077_v36, %v8539_v38 }
 0x8c7   : > { %v5097_v17 = vadd.f32 %v4992_v26, %v8539_v38  ;;  %v6122_v55 = vpack.c.bf16 %v5145_v56, %v5144_v49 }
 0x8c8   : > { %v5146_v0 = vmul.f32 %v5114_v22, %v8412_v60 }
 0x8c9   : > { %v5129_v52 = vmul.f32 %v5097_v17, %v8292_v61  ;;  %v4997_v44 = vpop.permute.xlu0 %4996 }
 0x8ca   : > { %v5082_v2 = vpop.permute.xlu1 %5081  ;;  %v5098_v46 = vadd.f32 %v4997_v44, %v8539_v38 }
 0x8cb   : > { %v5115_v39 = vadd.f32 %v5082_v2, %v8539_v38  ;;  %v6125_v29 = vpack.c.bf16 %v5129_v52, %v5128_v33 }
 0x8cc   : > { %v5130_v32 = vmul.f32 %v5098_v46, %v8288_v54 }
 0x8cd   : > { %6109 = vmatpush3.bf16.xpose.msk.msra.mxu1 %vm8555_vm15, %v6107_v47  ;;  %v5147_v5 = vmul.f32 %v5115_v39, %v8419_v40  ;;  %v5150_v40 = vadd.s32 8, %v8731_v57 }
 0x8ce   : > { %6112 = vmatprep.subr.msk.bf16.mxu1 %vm8555_vm15, %v6110_v62  ;;  %v5002_v3 = vpop.permute.xlu1 %5001 }
 0x8cf   : > { %v5099_v1 = vadd.f32 %v5002_v3, %v8539_v38  ;;  %v6128_v6 = vpack.c.bf16 %v5147_v5, %v5146_v0  ;;  %vm5154_vm0 = vcmp.eq.s32.totalorder %v5150_v40, %v8525_v25 }
 0x8d0   : > { %v5592_v38 = vsel %vm5154_vm0, 1.0, %v8729_v8 }
 0x8d1   : > { %v5131_v61 = vmul.f32 %v5099_v1, %v8294_v16 }
 0x8d3   : > { %v6131_v60 = vpack.c.bf16 %v5131_v61, %v5130_v32 }
 0x8d5   : > { %6115 = vmatpush3.bf16.xpose.msk.msra.mxu1 %vm8555_vm15, %v6113_v19 }
 0x8d6   : > { %6118 = vmatprep.subr.msk.bf16.mxu1 %vm8555_vm15, %v6116_v21 }
 0x8dd   : > { %6121 = vmatpush3.bf16.xpose.msk.msra.mxu1 %vm8555_vm15, %v6119_v51 }
 0x8de   : > { %6124 = vmatprep.subr.msk.bf16.mxu1 %vm8555_vm15, %v6122_v55 }
 0x8e5   : > { %6127 = vmatpush3.bf16.xpose.msk.msra.mxu1 %vm8555_vm15, %v6125_v29 }
 0x8e6   : > { %6130 = vmatprep.subr.msk.bf16.mxu1 %vm8555_vm15, %v6128_v6 }
 0x8ed   : > { %6133 = vmatpush3.bf16.xpose.msk.msra.mxu1 %vm8555_vm15, %v6131_v60 }
 0x8f4   : > { %5800 = vmatmul.mubr.msk.f32.vlgmr.msra.gmra.mrb[32].mxu1 %vm779_vm1, %v8530_v31 }
 0x8f5   : > { %5801 = vmatprep.mubr.msk.f32.mxu1 %vm779_vm1, %v5592_v38 }
 0x8f8   : > { %5802 = vmatmul.mubr.msk.f32.gmra.mrb[34].mxu1 %vm779_vm1, %v5592_v38 }
 0x9c7   : > { %v5327_v54 = vpop.f32.mrb[32].mxu1 }
 0x9c8   : > { %5338 = vst [vmem:[%s601_s13] sm:$0xff] %v5327_v54  ;;  %v5329_v16 = vpop.f32.mrb[33].mxu1 }
 0x9c9   : > { %5339 = vst [vmem:[%s601_s13 + $0x8] sm:$0xff] %v5329_v16 }
 0x9cb   : > { %v5333_v57 = vpop.f32.mrb[34].mxu1 }
 0x9cc   : > { %5340 = vst [vmem:[%s601_s13 + $0x10] sm:$0xff] %v5333_v57  ;;  %v5335_v25 = vpop.f32.mrb[35].mxu1 }
 0x9cd   : > { %5341 = vst [vmem:[%s601_s13 + $0x18] sm:$0xff] %v5335_v25 }
 0x9ce PF: > { %s34_s1 = sadd.s32 1, %s6576_s1  }
 0x9cf   : > { %p31_p4 = scmp.ge.s32.totalorder %s34_s1, 4  }
 0x9d1   :  { %33 = sbr.rel (!%p31_p4) target bundleno = 4 (0x4), region = 129 }

</bundles_post_ra>
